<compile_context>
chip_gen: v6e
topology: v6e:2x2x1
jax: 0.10.0
libtpu: 0.0.40
codegen_flags: <defaults>
</compile_context>

<pallas_src>
import functools
import math

import jax
import jax.numpy as jnp
from jax import lax
from jax.experimental import pallas as pl
from jax.experimental.pallas import tpu as pltpu

LN_EPS = 1e-5
LANE = 128


def _round_up(v, m):
    return (v + m - 1) // m * m


def _layernorm_masked(x, gamma, beta, n_real):
    """LayerNorm over the first `n_real` lanes of a lane-padded (R, WP) slab.

    Padded lanes of `x` are exactly zero by construction, so single-pass sums
    over all lanes give the correct statistics when divided by n_real.
    gamma/beta are zero in padded lanes, so padded outputs stay zero.
    (One-pass E[x^2]-E[x]^2 is fine at these activation scales; switch to
    two-pass if activations ever grow large-mean.)
    """
    inv_n = 1.0 / n_real
    s1 = jnp.sum(x, axis=-1, keepdims=True)
    s2 = jnp.sum(x * x, axis=-1, keepdims=True)
    mu = s1 * inv_n
    var = s2 * inv_n - mu * mu
    inv = lax.rsqrt(var + LN_EPS)
    return (x - mu) * inv * gamma + beta


def _gelu_exact(x):
    # torch F.gelu default: 0.5 * x * (1 + erf(x / sqrt(2)))
    return 0.5 * x * (1.0 + lax.erf(x * (1.0 / math.sqrt(2.0))))


def toy_model_kernel(adj_ref, x_ref, vec_ref,
                     w1_ref, w2_ref, wc1_ref, wc3_ref,
                     out_ref, *, bg, n, hp, cp, h_real):
    adj = adj_ref[...]                                   # (BG*N, BG*N) block-diag
    x = x_ref[...]                                       # (BG*N, Din)
    vecs = vec_ref[...]                                  # (16, WP) bias/gamma/beta slab

    b1, g1, be1 = vecs[0:1, :hp], vecs[1:2, :hp], vecs[2:3, :hp]
    b2, g2, be2 = vecs[3:4, :hp], vecs[4:5, :hp], vecs[5:6, :hp]
    bc1, g3, be3 = vecs[6:7, :hp], vecs[7:8, :hp], vecs[8:9, :hp]
    bc3 = vecs[9:10, :cp]

    # --- GraphConv 1:  (A @ X) @ W1  (Din < hidden -> aggregate first) ---
    ax = jnp.dot(adj, x, preferred_element_type=jnp.float32)        # (BG*N, Din)
    h = jnp.dot(ax, w1_ref[...], preferred_element_type=jnp.float32) + b1
    h = _gelu_exact(_layernorm_masked(h, g1, be1, h_real))          # (BG*N, HP)

    # --- GraphConv 2:  A @ (H @ W2)  (in == out -> transform first) ---
    hw = jnp.dot(h, w2_ref[...], preferred_element_type=jnp.float32)
    h2 = jnp.dot(adj, hw, preferred_element_type=jnp.float32) + b2
    h2 = _gelu_exact(_layernorm_masked(h2, g2, be2, h_real))        # (BG*N, HP)

    # --- readout: mean over nodes (all graphs here have exactly N nodes) ---
    # N is a multiple of 8, so this reshape is a layout no-op.
    # TODO(synk): variable-size graphs need per-graph node counts (scalar
    # prefetch) and row masking to match dgl.mean_nodes exactly.
    hg = jnp.mean(h2.reshape(bg, n, hp), axis=1)                    # (BG, HP)

    # --- classifier, batched over the whole graph block ---
    o = jnp.dot(hg, wc1_ref[...], preferred_element_type=jnp.float32) + bc1
    o = jnp.maximum(_layernorm_masked(o, g3, be3, h_real), 0.0)
    o = jnp.dot(o, wc3_ref[...], preferred_element_type=jnp.float32) + bc3

    out_ref[...] = o                                     # (BG, CP) lane-dense


def toy_model_forward(adj_norm, x, params, *, num_blocks=1):
    """adj_norm: [B, N, N] normalized dense adjacency; x: [B, N, in_dim].

    num_blocks = grid size; use 1 on single-TC chips (v5e/v6e), 2 on v7x.
    """
    B, N, Din = x.shape
    H = params["w1"].shape[1]
    C = params["wc3"].shape[1]
    HP = _round_up(H, LANE)                  # lane-padded hidden width
    CP = _round_up(C, LANE)                  # lane-padded class width
    WP = max(HP, CP)                         # vector-slab lane width
    assert B % num_blocks == 0, "batch must be a multiple of num_blocks"
    BG = B // num_blocks                     # graphs per grid step
    BGN = BG * N

    # ---- block-diagonal adjacency, one (BGN, BGN) slab per grid step ----
    adj4 = adj_norm.reshape(num_blocks, BG, N, N)
    eye = jnp.eye(BG, dtype=adj_norm.dtype)
    adj_bd = jnp.einsum('gbij,bc->gbicj', adj4, eye)
    adj_bd = adj_bd.reshape(num_blocks * BGN, BGN)

    x_flat = x.reshape(B * N, Din)

    # ---- concatenate all bias / gamma / beta vectors into one (16, WP) slab
    # (zero padding is REQUIRED by the masked-LayerNorm trick) ----
    def row(v):
        v = v.reshape(1, -1)
        return jnp.pad(v, ((0, 0), (0, WP - v.shape[1])))

    vec_rows = [params["b1"], params["g1"], params["be1"],
                params["b2"], params["g2"], params["be2"],
                params["bc1"], params["g3"], params["be3"], params["bc3"]]
    vec_slab = jnp.concatenate([row(v) for v in vec_rows], axis=0)
    vec_slab = jnp.pad(vec_slab, ((0, 16 - vec_slab.shape[0]), (0, 0)))

    def pad2(a, rows, cols):
        r, c = a.shape
        return jnp.pad(a, ((0, rows - r), (0, cols - c)))   # zero padding

    w1 = pad2(params["w1"], Din, HP)
    w2 = pad2(params["w2"], HP, HP)
    wc1 = pad2(params["wc1"], HP, HP)
    wc3 = pad2(params["wc3"], HP, CP)
    consts = [vec_slab, w1, w2, wc1, wc3]

    def const_spec(arr):
        r, c = arr.shape
        try:
            # Constant across the grid -> single buffer, no pipeline bookkeeping.
            return pl.BlockSpec((r, c), lambda g: (0, 0),
                                pipeline_mode=pl.Buffered(1))
        except TypeError:
            return pl.BlockSpec((r, c), lambda g: (0, 0))

    kernel = functools.partial(
        toy_model_kernel, bg=BG, n=N, hp=HP, cp=CP, h_real=float(H))

    flops = 2 * num_blocks * (BGN * BGN * Din + BGN * Din * HP
                              + BGN * HP * HP + BGN * BGN * HP
                              + BG * HP * HP + BG * HP * CP)
    transcendentals = 2 * B * N * HP
    bytes_accessed = 4 * (adj_bd.size + x_flat.size + B * CP
                          + sum(int(c.size) for c in consts))

    grid_spec = pltpu.PrefetchScalarGridSpec(
        num_scalar_prefetch=0,
        grid=(num_blocks,),
        in_specs=[
            pl.BlockSpec((BGN, BGN), lambda g: (g, 0)),     # block-diag adjacency
            pl.BlockSpec((BGN, Din), lambda g: (g, 0)),     # node features (K=Din, unpadded)
        ] + [const_spec(a) for a in consts],
        out_specs=pl.BlockSpec((BG, CP), lambda g: (g, 0)),
    )

    out = pl.pallas_call(
        kernel,
        out_shape=jax.ShapeDtypeStruct((B, CP), jnp.float32),
        grid_spec=grid_spec,
        compiler_params=pltpu.CompilerParams(
            dimension_semantics=("parallel",)),
        cost_estimate=pl.CostEstimate(
            flops=flops,
            transcendentals=transcendentals,
            bytes_accessed=bytes_accessed),
    )(adj_bd, x_flat, *consts)

    return out[:, :C]                                    # [B, n_classes]


# ----------------------- pure-JAX reference (for checking) ------------------

def reference_forward(adj_norm, x, params):
    def ln(v, g, b):
        mu = jnp.mean(v, axis=-1, keepdims=True)
        var = jnp.mean((v - mu) ** 2, axis=-1, keepdims=True)
        return (v - mu) / jnp.sqrt(var + LN_EPS) * g + b

    def gelu(v):
        return 0.5 * v * (1.0 + lax.erf(v / math.sqrt(2.0)))

    h = jnp.einsum('bij,bjd->bid', adj_norm, x) @ params["w1"] + params["b1"]
    h = gelu(ln(h, params["g1"], params["be1"]))
    h = jnp.einsum('bij,bjd->bid', adj_norm, h @ params["w2"]) + params["b2"]
    h = gelu(ln(h, params["g2"], params["be2"]))
    hg = jnp.mean(h, axis=1)
    o = jnp.maximum(ln(hg @ params["wc1"] + params["bc1"],
                       params["g3"], params["be3"]), 0.0)
    return o @ params["wc3"] + params["bc3"]


# ------------------------------ setup helpers -------------------------------

def init_params(key, in_dim, hidden_dim, n_classes):
    ks = jax.random.split(key, 8)
    scale = 0.1

    def dense(k, fan_in, fan_out):
        return scale * jax.random.normal(k, (fan_in, fan_out), jnp.float32)

    return {
        # GraphConv 1
        "w1": dense(ks[0], in_dim, hidden_dim),
        "b1": jnp.zeros((1, hidden_dim), jnp.float32),
        "g1": jnp.ones((1, hidden_dim), jnp.float32),
        "be1": jnp.zeros((1, hidden_dim), jnp.float32),
        # GraphConv 2
        "w2": dense(ks[1], hidden_dim, hidden_dim),
        "b2": jnp.zeros((1, hidden_dim), jnp.float32),
        "g2": jnp.ones((1, hidden_dim), jnp.float32),
        "be2": jnp.zeros((1, hidden_dim), jnp.float32),
        # classify1 + ln3
        "wc1": dense(ks[2], hidden_dim, hidden_dim),
        "bc1": scale * jax.random.normal(ks[3], (1, hidden_dim), jnp.float32),
        "g3": jnp.ones((1, hidden_dim), jnp.float32),
        "be3": jnp.zeros((1, hidden_dim), jnp.float32),
        # classify3
        "wc3": dense(ks[4], hidden_dim, n_classes),
        "bc3": scale * jax.random.normal(ks[5], (1, n_classes), jnp.float32),
    }
    # NOTE: classify2 / ln4 exist in the PyTorch __init__ but are unused in
    # forward(), so they are intentionally not materialized.


def build_normalized_adjacency(key, B, N):
    """Random undirected graphs with self-loops, symmetric D^-1/2 A D^-1/2."""
    raw = jax.random.bernoulli(key, 0.4, (B, N, N)).astype(jnp.float32)
    adj = jnp.maximum(raw, jnp.transpose(raw, (0, 2, 1)))          # symmetrize
    adj = jnp.maximum(adj, jnp.eye(N, dtype=jnp.float32)[None])    # self-loops
    deg = jnp.sum(adj, axis=-1)
    d_inv_sqrt = 1.0 / jnp.sqrt(jnp.maximum(deg, 1.0))
    return adj * d_inv_sqrt[:, :, None] * d_inv_sqrt[:, None, :]


if __name__ == "__main__":
    B, N = 32, 8                       # 32 graphs, 8 nodes each (N % 8 == 0)
    in_dim, hidden_dim, n_classes = 16, 32, 4
    num_blocks = 1                     # grid=(1,); use 2 on v7x to feed both TCs

    key = jax.random.PRNGKey(0)
    k_x, k_adj, k_p = jax.random.split(key, 3)

    x = jax.random.normal(k_x, (B, N, in_dim), jnp.float32)
    adj_norm = build_normalized_adjacency(k_adj, B, N)
    params = init_params(k_p, in_dim, hidden_dim, n_classes)

    out = toy_model_forward(adj_norm, x, params, num_blocks=num_blocks)
    out = jax.block_until_ready(out)
    assert out.shape == (B, n_classes)

    ref = jax.block_until_ready(reference_forward(adj_norm, x, params))
    max_err = float(jnp.max(jnp.abs(out - ref)))
    assert max_err < 1e-3, f"mismatch vs reference: {max_err}"

    print("KERNEL_OK")
</pallas_src>

<mosaic_0001>
module attributes {stable_mosaic.version = 11 : i64} {
  func.func @toy_model_kernel(%arg0: i32, %arg1: memref<256x256xf32, #tpu.memory_space<vmem>>, %arg2: memref<256x16xf32, #tpu.memory_space<vmem>>, %arg3: memref<16x128xf32, #tpu.memory_space<vmem>>, %arg4: memref<16x128xf32, #tpu.memory_space<vmem>>, %arg5: memref<128x128xf32, #tpu.memory_space<vmem>>, %arg6: memref<128x128xf32, #tpu.memory_space<vmem>>, %arg7: memref<128x128xf32, #tpu.memory_space<vmem>>, %arg8: memref<32x128xf32, #tpu.memory_space<vmem>>) attributes {dimension_semantics = [#tpu.dimension_semantics<parallel>], iteration_bounds = array<i64: 1>, scalar_prefetch = 0 : i64, scratch_operands = 0 : i64, tpu.core_type = #tpu.core_type<tc>, window_params = [{transform_indices = @transform_0, window_bounds = array<i64: 256, 256>}, {transform_indices = @transform_1, window_bounds = array<i64: 256, 16>}, {pipeline_mode = #tpu.pipeline_mode<synchronous>, transform_indices = @transform_2, window_bounds = array<i64: 16, 128>}, {pipeline_mode = #tpu.pipeline_mode<synchronous>, transform_indices = @transform_3, window_bounds = array<i64: 16, 128>}, {pipeline_mode = #tpu.pipeline_mode<synchronous>, transform_indices = @transform_4, window_bounds = array<i64: 128, 128>}, {pipeline_mode = #tpu.pipeline_mode<synchronous>, transform_indices = @transform_5, window_bounds = array<i64: 128, 128>}, {pipeline_mode = #tpu.pipeline_mode<synchronous>, transform_indices = @transform_6, window_bounds = array<i64: 128, 128>}, {transform_indices = @transform_7, window_bounds = array<i64: 32, 128>}]} {
    %c0 = arith.constant 0 : index
    %c0_0 = arith.constant 0 : index
    %0 = vector.load %arg1[%c0, %c0_0] : memref<256x256xf32, #tpu.memory_space<vmem>>, vector<256x256xf32>
    %c0_1 = arith.constant 0 : index
    %c0_2 = arith.constant 0 : index
    %1 = vector.load %arg2[%c0_1, %c0_2] : memref<256x16xf32, #tpu.memory_space<vmem>>, vector<256x16xf32>
    %c0_3 = arith.constant 0 : index
    %c0_4 = arith.constant 0 : index
    %2 = vector.load %arg3[%c0_3, %c0_4] : memref<16x128xf32, #tpu.memory_space<vmem>>, vector<16x128xf32>
    %3 = vector.extract_strided_slice %2 {offsets = [0, 0], sizes = [1, 128], strides = [1, 1]} : vector<16x128xf32> to vector<1x128xf32>
    %4 = vector.extract_strided_slice %2 {offsets = [1, 0], sizes = [1, 128], strides = [1, 1]} : vector<16x128xf32> to vector<1x128xf32>
    %5 = vector.extract_strided_slice %2 {offsets = [2, 0], sizes = [1, 128], strides = [1, 1]} : vector<16x128xf32> to vector<1x128xf32>
    %6 = vector.extract_strided_slice %2 {offsets = [3, 0], sizes = [1, 128], strides = [1, 1]} : vector<16x128xf32> to vector<1x128xf32>
    %7 = vector.extract_strided_slice %2 {offsets = [4, 0], sizes = [1, 128], strides = [1, 1]} : vector<16x128xf32> to vector<1x128xf32>
    %8 = vector.extract_strided_slice %2 {offsets = [5, 0], sizes = [1, 128], strides = [1, 1]} : vector<16x128xf32> to vector<1x128xf32>
    %9 = vector.extract_strided_slice %2 {offsets = [6, 0], sizes = [1, 128], strides = [1, 1]} : vector<16x128xf32> to vector<1x128xf32>
    %10 = vector.extract_strided_slice %2 {offsets = [7, 0], sizes = [1, 128], strides = [1, 1]} : vector<16x128xf32> to vector<1x128xf32>
    %11 = vector.extract_strided_slice %2 {offsets = [8, 0], sizes = [1, 128], strides = [1, 1]} : vector<16x128xf32> to vector<1x128xf32>
    %12 = vector.extract_strided_slice %2 {offsets = [9, 0], sizes = [1, 128], strides = [1, 1]} : vector<16x128xf32> to vector<1x128xf32>
    %cst = arith.constant dense<0.000000e+00> : vector<256x16xf32>
    %13 = tpu.matmul %0, %1, %cst {dimension_numbers = #tpu.dot_dimension_numbers<[1], [0], [0], [1], [0, 0, 1, 1], [], []>} : vector<256x256xf32>, vector<256x16xf32>, vector<256x16xf32> -> vector<256x16xf32>
    %c0_5 = arith.constant 0 : index
    %c0_6 = arith.constant 0 : index
    %14 = vector.load %arg4[%c0_5, %c0_6] : memref<16x128xf32, #tpu.memory_space<vmem>>, vector<16x128xf32>
    %cst_7 = arith.constant dense<0.000000e+00> : vector<256x128xf32>
    %15 = tpu.matmul %13, %14, %cst_7 {dimension_numbers = #tpu.dot_dimension_numbers<[1], [0], [0], [1], [0, 0, 1, 1], [], []>} : vector<256x16xf32>, vector<16x128xf32>, vector<256x128xf32> -> vector<256x128xf32>
    %16 = vector.broadcast %3 : vector<1x128xf32> to vector<256x128xf32>
    %17 = arith.addf %15, %16 : vector<256x128xf32>
    %cst_8 = arith.constant dense<0.000000e+00> : vector<256xf32>
    %18 = vector.multi_reduction <add>, %17, %cst_8 [1] : vector<256x128xf32> to vector<256xf32>
    %19 = vector.shape_cast %18 : vector<256xf32> to vector<256x1xf32>
    %20 = arith.mulf %17, %17 : vector<256x128xf32>
    %cst_9 = arith.constant dense<0.000000e+00> : vector<256xf32>
    %21 = vector.multi_reduction <add>, %20, %cst_9 [1] : vector<256x128xf32> to vector<256xf32>
    %22 = vector.shape_cast %21 : vector<256xf32> to vector<256x1xf32>
    %cst_10 = arith.constant 3.125000e-02 : f32
    %23 = vector.broadcast %cst_10 : f32 to vector<256x1xf32>
    %24 = arith.mulf %19, %23 : vector<256x1xf32>
    %cst_11 = arith.constant 3.125000e-02 : f32
    %25 = vector.broadcast %cst_11 : f32 to vector<256x1xf32>
    %26 = arith.mulf %22, %25 : vector<256x1xf32>
    %27 = arith.mulf %24, %24 : vector<256x1xf32>
    %28 = arith.subf %26, %27 : vector<256x1xf32>
    %cst_12 = arith.constant 9.99999974E-6 : f32
    %29 = vector.broadcast %cst_12 : f32 to vector<256x1xf32>
    %30 = arith.addf %28, %29 : vector<256x1xf32>
    %31 = math.rsqrt %30 : vector<256x1xf32>
    %32 = vector.broadcast %24 : vector<256x1xf32> to vector<256x128xf32>
    %33 = arith.subf %17, %32 : vector<256x128xf32>
    %34 = vector.broadcast %31 : vector<256x1xf32> to vector<256x128xf32>
    %35 = arith.mulf %33, %34 : vector<256x128xf32>
    %36 = vector.broadcast %4 : vector<1x128xf32> to vector<256x128xf32>
    %37 = arith.mulf %35, %36 : vector<256x128xf32>
    %38 = vector.broadcast %5 : vector<1x128xf32> to vector<256x128xf32>
    %39 = arith.addf %37, %38 : vector<256x128xf32>
    %cst_13 = arith.constant 5.000000e-01 : f32
    %40 = vector.broadcast %cst_13 : f32 to vector<256x128xf32>
    %41 = arith.mulf %40, %39 : vector<256x128xf32>
    %cst_14 = arith.constant 0.707106769 : f32
    %42 = vector.broadcast %cst_14 : f32 to vector<256x128xf32>
    %43 = arith.mulf %39, %42 : vector<256x128xf32>
    %44 = math.erf %43 : vector<256x128xf32>
    %cst_15 = arith.constant 1.000000e+00 : f32
    %45 = vector.broadcast %cst_15 : f32 to vector<256x128xf32>
    %46 = arith.addf %45, %44 : vector<256x128xf32>
    %47 = arith.mulf %41, %46 : vector<256x128xf32>
    %c0_16 = arith.constant 0 : index
    %c0_17 = arith.constant 0 : index
    %48 = vector.load %arg5[%c0_16, %c0_17] : memref<128x128xf32, #tpu.memory_space<vmem>>, vector<128x128xf32>
    %cst_18 = arith.constant dense<0.000000e+00> : vector<256x128xf32>
    %49 = tpu.matmul %47, %48, %cst_18 {dimension_numbers = #tpu.dot_dimension_numbers<[1], [0], [0], [1], [0, 0, 1, 1], [], []>} : vector<256x128xf32>, vector<128x128xf32>, vector<256x128xf32> -> vector<256x128xf32>
    %cst_19 = arith.constant dense<0.000000e+00> : vector<256x128xf32>
    %50 = tpu.matmul %0, %49, %cst_19 {dimension_numbers = #tpu.dot_dimension_numbers<[1], [0], [0], [1], [0, 0, 1, 1], [], []>} : vector<256x256xf32>, vector<256x128xf32>, vector<256x128xf32> -> vector<256x128xf32>
    %51 = vector.broadcast %6 : vector<1x128xf32> to vector<256x128xf32>
    %52 = arith.addf %50, %51 : vector<256x128xf32>
    %cst_20 = arith.constant dense<0.000000e+00> : vector<256xf32>
    %53 = vector.multi_reduction <add>, %52, %cst_20 [1] : vector<256x128xf32> to vector<256xf32>
    %54 = vector.shape_cast %53 : vector<256xf32> to vector<256x1xf32>
    %55 = arith.mulf %52, %52 : vector<256x128xf32>
    %cst_21 = arith.constant dense<0.000000e+00> : vector<256xf32>
    %56 = vector.multi_reduction <add>, %55, %cst_21 [1] : vector<256x128xf32> to vector<256xf32>
    %57 = vector.shape_cast %56 : vector<256xf32> to vector<256x1xf32>
    %cst_22 = arith.constant 3.125000e-02 : f32
    %58 = vector.broadcast %cst_22 : f32 to vector<256x1xf32>
    %59 = arith.mulf %54, %58 : vector<256x1xf32>
    %cst_23 = arith.constant 3.125000e-02 : f32
    %60 = vector.broadcast %cst_23 : f32 to vector<256x1xf32>
    %61 = arith.mulf %57, %60 : vector<256x1xf32>
    %62 = arith.mulf %59, %59 : vector<256x1xf32>
    %63 = arith.subf %61, %62 : vector<256x1xf32>
    %cst_24 = arith.constant 9.99999974E-6 : f32
    %64 = vector.broadcast %cst_24 : f32 to vector<256x1xf32>
    %65 = arith.addf %63, %64 : vector<256x1xf32>
    %66 = math.rsqrt %65 : vector<256x1xf32>
    %67 = vector.broadcast %59 : vector<256x1xf32> to vector<256x128xf32>
    %68 = arith.subf %52, %67 : vector<256x128xf32>
    %69 = vector.broadcast %66 : vector<256x1xf32> to vector<256x128xf32>
    %70 = arith.mulf %68, %69 : vector<256x128xf32>
    %71 = vector.broadcast %7 : vector<1x128xf32> to vector<256x128xf32>
    %72 = arith.mulf %70, %71 : vector<256x128xf32>
    %73 = vector.broadcast %8 : vector<1x128xf32> to vector<256x128xf32>
    %74 = arith.addf %72, %73 : vector<256x128xf32>
    %cst_25 = arith.constant 5.000000e-01 : f32
    %75 = vector.broadcast %cst_25 : f32 to vector<256x128xf32>
    %76 = arith.mulf %75, %74 : vector<256x128xf32>
    %cst_26 = arith.constant 0.707106769 : f32
    %77 = vector.broadcast %cst_26 : f32 to vector<256x128xf32>
    %78 = arith.mulf %74, %77 : vector<256x128xf32>
    %79 = math.erf %78 : vector<256x128xf32>
    %cst_27 = arith.constant 1.000000e+00 : f32
    %80 = vector.broadcast %cst_27 : f32 to vector<256x128xf32>
    %81 = arith.addf %80, %79 : vector<256x128xf32>
    %82 = arith.mulf %76, %81 : vector<256x128xf32>
    %83 = vector.shape_cast %82 : vector<256x128xf32> to vector<32x8x128xf32>
    %cst_28 = arith.constant dense<0.000000e+00> : vector<32x128xf32>
    %84 = vector.multi_reduction <add>, %83, %cst_28 [1] : vector<32x8x128xf32> to vector<32x128xf32>
    %cst_29 = arith.constant 8.000000e+00 : f32
    %85 = vector.broadcast %cst_29 : f32 to vector<32x128xf32>
    %86 = arith.divf %84, %85 : vector<32x128xf32>
    %c0_30 = arith.constant 0 : index
    %c0_31 = arith.constant 0 : index
    %87 = vector.load %arg6[%c0_30, %c0_31] : memref<128x128xf32, #tpu.memory_space<vmem>>, vector<128x128xf32>
    %cst_32 = arith.constant dense<0.000000e+00> : vector<32x128xf32>
    %88 = tpu.matmul %86, %87, %cst_32 {dimension_numbers = #tpu.dot_dimension_numbers<[1], [0], [0], [1], [0, 0, 1, 1], [], []>} : vector<32x128xf32>, vector<128x128xf32>, vector<32x128xf32> -> vector<32x128xf32>
    %89 = vector.broadcast %9 : vector<1x128xf32> to vector<32x128xf32>
    %90 = arith.addf %88, %89 : vector<32x128xf32>
    %cst_33 = arith.constant dense<0.000000e+00> : vector<32xf32>
    %91 = vector.multi_reduction <add>, %90, %cst_33 [1] : vector<32x128xf32> to vector<32xf32>
    %92 = vector.shape_cast %91 : vector<32xf32> to vector<32x1xf32>
    %93 = arith.mulf %90, %90 : vector<32x128xf32>
    %cst_34 = arith.constant dense<0.000000e+00> : vector<32xf32>
    %94 = vector.multi_reduction <add>, %93, %cst_34 [1] : vector<32x128xf32> to vector<32xf32>
    %95 = vector.shape_cast %94 : vector<32xf32> to vector<32x1xf32>
    %cst_35 = arith.constant 3.125000e-02 : f32
    %96 = vector.broadcast %cst_35 : f32 to vector<32x1xf32>
    %97 = arith.mulf %92, %96 : vector<32x1xf32>
    %cst_36 = arith.constant 3.125000e-02 : f32
    %98 = vector.broadcast %cst_36 : f32 to vector<32x1xf32>
    %99 = arith.mulf %95, %98 : vector<32x1xf32>
    %100 = arith.mulf %97, %97 : vector<32x1xf32>
    %101 = arith.subf %99, %100 : vector<32x1xf32>
    %cst_37 = arith.constant 9.99999974E-6 : f32
    %102 = vector.broadcast %cst_37 : f32 to vector<32x1xf32>
    %103 = arith.addf %101, %102 : vector<32x1xf32>
    %104 = math.rsqrt %103 : vector<32x1xf32>
    %105 = vector.broadcast %97 : vector<32x1xf32> to vector<32x128xf32>
    %106 = arith.subf %90, %105 : vector<32x128xf32>
    %107 = vector.broadcast %104 : vector<32x1xf32> to vector<32x128xf32>
    %108 = arith.mulf %106, %107 : vector<32x128xf32>
    %109 = vector.broadcast %10 : vector<1x128xf32> to vector<32x128xf32>
    %110 = arith.mulf %108, %109 : vector<32x128xf32>
    %111 = vector.broadcast %11 : vector<1x128xf32> to vector<32x128xf32>
    %112 = arith.addf %110, %111 : vector<32x128xf32>
    %cst_38 = arith.constant 0.000000e+00 : f32
    %113 = vector.broadcast %cst_38 : f32 to vector<32x128xf32>
    %114 = arith.maximumf %112, %113 : vector<32x128xf32>
    %c0_39 = arith.constant 0 : index
    %c0_40 = arith.constant 0 : index
    %115 = vector.load %arg7[%c0_39, %c0_40] : memref<128x128xf32, #tpu.memory_space<vmem>>, vector<128x128xf32>
    %cst_41 = arith.constant dense<0.000000e+00> : vector<32x128xf32>
    %116 = tpu.matmul %114, %115, %cst_41 {dimension_numbers = #tpu.dot_dimension_numbers<[1], [0], [0], [1], [0, 0, 1, 1], [], []>} : vector<32x128xf32>, vector<128x128xf32>, vector<32x128xf32> -> vector<32x128xf32>
    %117 = vector.broadcast %12 : vector<1x128xf32> to vector<32x128xf32>
    %118 = arith.addf %116, %117 : vector<32x128xf32>
    %c0_42 = arith.constant 0 : index
    %c0_43 = arith.constant 0 : index
    %119 = vector.load %arg8[%c0_42, %c0_43] : memref<32x128xf32, #tpu.memory_space<vmem>>, vector<32x128xf32>
    tpu.vector_store %arg8[%c0_42, %c0_43], %118 {strides = array<i32>} : memref<32x128xf32, #tpu.memory_space<vmem>>, vector<32x128xf32>,
    return
  }
  func.func @transform_0(%arg0: i32) -> (i32, i32) {
    %c0_i32 = arith.constant 0 : i32
    %c0_i32_0 = arith.constant 0 : i32
    return %arg0, %c0_i32 : i32, i32
  }
  func.func @transform_1(%arg0: i32) -> (i32, i32) {
    %c0_i32 = arith.constant 0 : i32
    %c0_i32_0 = arith.constant 0 : i32
    return %arg0, %c0_i32 : i32, i32
  }
  func.func @transform_2(%arg0: i32) -> (i32, i32) {
    %c0_i32 = arith.constant 0 : i32
    %c0_i32_0 = arith.constant 0 : i32
    %c0_i32_1 = arith.constant 0 : i32
    return %c0_i32, %c0_i32_0 : i32, i32
  }
  func.func @transform_3(%arg0: i32) -> (i32, i32) {
    %c0_i32 = arith.constant 0 : i32
    %c0_i32_0 = arith.constant 0 : i32
    %c0_i32_1 = arith.constant 0 : i32
    return %c0_i32, %c0_i32_0 : i32, i32
  }
  func.func @transform_4(%arg0: i32) -> (i32, i32) {
    %c0_i32 = arith.constant 0 : i32
    %c0_i32_0 = arith.constant 0 : i32
    %c0_i32_1 = arith.constant 0 : i32
    return %c0_i32, %c0_i32_0 : i32, i32
  }
  func.func @transform_5(%arg0: i32) -> (i32, i32) {
    %c0_i32 = arith.constant 0 : i32
    %c0_i32_0 = arith.constant 0 : i32
    %c0_i32_1 = arith.constant 0 : i32
    return %c0_i32, %c0_i32_0 : i32, i32
  }
  func.func @transform_6(%arg0: i32) -> (i32, i32) {
    %c0_i32 = arith.constant 0 : i32
    %c0_i32_0 = arith.constant 0 : i32
    %c0_i32_1 = arith.constant 0 : i32
    return %c0_i32, %c0_i32_0 : i32, i32
  }
  func.func @transform_7(%arg0: i32) -> (i32, i32) {
    %c0_i32 = arith.constant 0 : i32
    %c0_i32_0 = arith.constant 0 : i32
    return %arg0, %c0_i32 : i32, i32
  }
}

</mosaic_0001>

<bundles_post_ra>
// kernel: tpu_custom_call.1
= control target key start
LH: loop header
LB: loop body
LE: loop exit
PB: predicated region body
PF: predicated region fallthrough
CT: control target
= control target key end

     0   :  { %12 = vsyncpa [#allocation3], 0  ;;  %s5547_s0 = inlined_call_operand.hbm [shape: f32[256,256], index: 0, kind: input, shape index: {}]   ;;  %s5548_s1 = inlined_call_operand.vmem [shape: f32[256,16], index: 1, kind: input, shape index: {}]   ;;  %s5549_s2 = inlined_call_operand.vmem [shape: f32[16,128], index: 2, kind: input, shape index: {}]   ;;  %s5550_s3 = inlined_call_operand.vmem [shape: f32[16,128], index: 3, kind: input, shape index: {}]   ;;  %s5551_s4 = inlined_call_operand.vmem [shape: f32[128,128], index: 4, kind: input, shape index: {}]   ;;  %s5552_s5 = inlined_call_operand.vmem [shape: f32[128,128], index: 5, kind: input, shape index: {}]   ;;  %s5553_s6 = inlined_call_operand.hbm [shape: f32[128,128], index: 6, kind: input, shape index: {}]   ;;  %s5554_s7 = inlined_call_operand.hbm [shape: f32[32,128], index: 7, kind: output, shape index: {}]  }
   0x1   :  { %13 = vsyncpa [#allocation6], 0 }
   0x2   :  { %14 = vsyncpa [#allocation4], 0  ;;  %s3838_s24 = smov [#allocation2]  }
   0x3   :  { %s20_s25 = sshll.u32 %s3838_s24, 4  ;;  %s21_s25 = int_to_ptr.vmem [resolvable:$true] %s20_s25 }
   0x4   :  { %s3780_s26 = scalar_lea.vmem %s21_s25, 8192  ;;  %p3785_p1 = scmp.lt.s32.totalorder %s21_s25, %s21_s25 }
   0x5   :  { %p3781_p0 = scmp.ne.s32.totalorder %s21_s25, %s3780_s26  ;;  %p3786_p2 = scmp.lt.s32.totalorder %s3780_s26, %s3780_s26 }
   0x7   :  { %p3787_p3 = por %p3786_p2, %p3785_p1 }
   0x9   :  { %p3788_p4 = pnand %p3787_p3, %p3781_p0 }
   0xb   :  { %3791 = shalt.err (!%p3788_p4)
}
   0xc   :  { %s3839_s27 = smov 256   ;;  %s3840_s28 = smov 16  }
   0xd   :  { %26 = dma.hbm_to_vmem [thread:$0]  %s5547_s0, 8192, %s21_s25, [#allocation3], %s3839_s27, %s3839_s27, %s3840_s28  }
   0xe   :  { %s3841_s8 = smov [#allocation5]  }
   0xf   :  { %s42_s9 = sshll.u32 %s3841_s8, 4  ;;  %s43_s9 = int_to_ptr.vmem [resolvable:$true] %s42_s9 }
  0x10   :  { %s3800_s10 = scalar_lea.vmem %s43_s9, 2048  ;;  %p3805_p6 = scmp.lt.s32.totalorder %s43_s9, %s43_s9 }
  0x11   :  { %p3801_p5 = scmp.ne.s32.totalorder %s43_s9, %s3800_s10  ;;  %p3806_p7 = scmp.lt.s32.totalorder %s3800_s10, %s3800_s10 }
  0x13   :  { %p3807_p8 = por %p3806_p7, %p3805_p6 }
  0x15   :  { %p3808_p9 = pnand %p3807_p8, %p3801_p5 }
  0x17   :  { %3811 = shalt.err (!%p3808_p9)
}
  0x18   :  { %s3842_s11 = smov 128   ;;  %s3843_s12 = smov 8  }
  0x19   :  { %48 = dma.hbm_to_vmem [thread:$0]  %s5553_s6, 2048, %s43_s9, [#allocation6], %s3842_s11, %s3842_s11, %s3843_s12  }
  0x1a   :  { %3832 = dma.done.wait [#allocation3], 8192  }
  0x1b   :  { %3833 = vsyncadd [#allocation3], 4294959104 }
  0x1c   :  { %3834 = dma.done.wait [#allocation6], 2048  }
  0x1d   :  { %3835 = vsyncadd [#allocation6], 4294965248  ;;  %v3844_v0 = vmov 0.0   ;;  %v134_v1 = vld [vmem:[%s5548_s1 + $0x78] sm:$0xff]  ;;  %v133_v2 = vld [vmem:[%s5548_s1 + $0x70] sm:$0xff]  ;;  %vm384_vm0 = vcmask 130048  }
  0x1e   :  { %153 = vmatprep.subr.mxu0 %v3844_v0  ;;  %v132_v3 = vld [vmem:[%s5548_s1 + $0x68] sm:$0xff]  ;;  %v131_v4 = vld [vmem:[%s5548_s1 + $0x60] sm:$0xff]  ;;  %v130_v5 = vld [vmem:[%s5548_s1 + $0x58] sm:$0xff]  ;;  %vm2749_vm1 = vcmask 1041409   ;;  %vm2751_vm2 = vcmask 1042434   ;;  %vm2753_vm3 = vcmask 1043459  }
  0x1f   :  { %154 = vmatpush1.msra.mxu0 %v134_v1  ;;  %v129_v6 = vld [vmem:[%s5548_s1 + $0x50] sm:$0xff]  ;;  %v128_v7 = vld [vmem:[%s5548_s1 + $0x48] sm:$0xff]  ;;  %v127_v9 = vld [vmem:[%s5548_s1 + $0x40] sm:$0xff]  ;;  %vm2755_vm4 = vcmask 1044484   ;;  %vm2757_vm5 = vcmask 1045509   ;;  %vm2759_vm6 = vcmask 1046534  }
  0x20   :  { %155 = vmatprep.subr.mxu0 %v3844_v0  ;;  %v56_v8 = vld [vmem:[#allocation2 + $0x8] sm:$0xff]  ;;  %v126_v10 = vld [vmem:[%s5548_s1 + $0x38] sm:$0xff]  ;;  %v125_v11 = vld [vmem:[%s5548_s1 + $0x30] sm:$0xff]  ;;  %vm2761_vm7 = vcmask 1047559  }
  0x21   :  { %156 = vmatpush1.msra.mxu0 %v133_v2  ;;  %217 = vmatprep.mubr.f32.mxu0 %v56_v8  ;;  %v124_v12 = vld [vmem:[%s5548_s1 + $0x28] sm:$0xff]  ;;  %v123_v13 = vld [vmem:[%s5548_s1 + $0x20] sm:$0xff]  ;;  %v122_v14 = vld [vmem:[%s5548_s1 + $0x18] sm:$0xff] }
  0x22   :  { %157 = vmatprep.subr.mxu0 %v3844_v0  ;;  %v121_v15 = vld [vmem:[%s5548_s1 + $0x10] sm:$0xff]  ;;  %v120_v16 = vld [vmem:[%s5548_s1 + $0x8] sm:$0xff]  ;;  %v119_v17 = vld [vmem:[%s5548_s1] sm:$0xff] }
  0x23   :  { %158 = vmatpush1.msra.mxu0 %v132_v3  ;;  %v150_v18 = vld [vmem:[%s5548_s1 + $0xf8] sm:$0xff]  ;;  %v149_v19 = vld [vmem:[%s5548_s1 + $0xf0] sm:$0xff]  ;;  %v148_v20 = vld [vmem:[%s5548_s1 + $0xe8] sm:$0xff] }
  0x24   :  { %159 = vmatprep.subr.mxu0 %v3844_v0  ;;  %v147_v21 = vld [vmem:[%s5548_s1 + $0xe0] sm:$0xff]  ;;  %v146_v22 = vld [vmem:[%s5548_s1 + $0xd8] sm:$0xff]  ;;  %v145_v23 = vld [vmem:[%s5548_s1 + $0xd0] sm:$0xff] }
  0x25   :  { %160 = vmatpush1.msra.mxu0 %v131_v4  ;;  %v144_v24 = vld [vmem:[%s5548_s1 + $0xc8] sm:$0xff]  ;;  %v143_v25 = vld [vmem:[%s5548_s1 + $0xc0] sm:$0xff]  ;;  %v142_v26 = vld [vmem:[%s5548_s1 + $0xb8] sm:$0xff] }
  0x26   :  { %161 = vmatprep.subr.mxu0 %v3844_v0  ;;  %v141_v27 = vld [vmem:[%s5548_s1 + $0xb0] sm:$0xff]  ;;  %v140_v28 = vld [vmem:[%s5548_s1 + $0xa8] sm:$0xff]  ;;  %v139_v29 = vld [vmem:[%s5548_s1 + $0xa0] sm:$0xff] }
  0x27   :  { %162 = vmatpush1.msra.mxu0 %v130_v5  ;;  %v138_v30 = vld [vmem:[%s5548_s1 + $0x98] sm:$0xff]  ;;  %v137_v31 = vld [vmem:[%s5548_s1 + $0x90] sm:$0xff]  ;;  %v136_v32 = vld [vmem:[%s5548_s1 + $0x88] sm:$0xff] }
  0x28   :  { %163 = vmatprep.subr.mxu0 %v3844_v0  ;;  %v135_v33 = vld [vmem:[%s5548_s1 + $0x80] sm:$0xff]  ;;  %v58_v35 = vld [vmem:[#allocation2 + $0x18] sm:$0xff]  ;;  %v57_v36 = vld [vmem:[#allocation2 + $0x10] sm:$0xff] }
  0x29   :  { %164 = vmatpush1.msra.mxu0 %v129_v6  ;;  %v55_v34 = vld [vmem:[#allocation2] sm:$0xff]  ;;  %v60_v37 = vld [vmem:[#allocation2 + $0x28] sm:$0xff]  ;;  %v62_v39 = vld [vmem:[#allocation2 + $0x38] sm:$0xff] }
  0x2a   :  { %165 = vmatprep.subr.mxu0 %v3844_v0  ;;  %v59_v38 = vld [vmem:[#allocation2 + $0x20] sm:$0xff]  ;;  %v61_v40 = vld [vmem:[#allocation2 + $0x30] sm:$0xff]  ;;  %v64_v41 = vld [vmem:[#allocation2 + $0x48] sm:$0xff] }
  0x2b   :  { %166 = vmatpush1.msra.mxu0 %v128_v7  ;;  %v63_v42 = vld [vmem:[#allocation2 + $0x40] sm:$0xff]  ;;  %v66_v43 = vld [vmem:[#allocation2 + $0x58] sm:$0xff]  ;;  %v65_v44 = vld [vmem:[#allocation2 + $0x50] sm:$0xff] }
  0x2c   :  { %167 = vmatprep.subr.mxu0 %v3844_v0  ;;  %v68_v45 = vld [vmem:[#allocation2 + $0x68] sm:$0xff]  ;;  %v67_v46 = vld [vmem:[#allocation2 + $0x60] sm:$0xff]  ;;  %v70_v47 = vld [vmem:[#allocation2 + $0x78] sm:$0xff] }
  0x2d   :  { %168 = vmatpush1.msra.mxu0 %v127_v9  ;;  %v69_v48 = vld [vmem:[#allocation2 + $0x70] sm:$0xff]  ;;  %v72_v49 = vld [vmem:[#allocation2 + $0x88] sm:$0xff]  ;;  %v71_v50 = vld [vmem:[#allocation2 + $0x80] sm:$0xff] }
  0x2e   :  { %169 = vmatprep.subr.mxu0 %v3844_v0  ;;  %v74_v51 = vld [vmem:[#allocation2 + $0x98] sm:$0xff]  ;;  %v73_v52 = vld [vmem:[#allocation2 + $0x90] sm:$0xff]  ;;  %v76_v53 = vld [vmem:[#allocation2 + $0xa8] sm:$0xff] }
  0x2f   :  { %170 = vmatpush1.msra.mxu0 %v126_v10  ;;  %v75_v54 = vld [vmem:[#allocation2 + $0xa0] sm:$0xff]  ;;  %v78_v55 = vld [vmem:[#allocation2 + $0xb8] sm:$0xff]  ;;  %v77_v56 = vld [vmem:[#allocation2 + $0xb0] sm:$0xff] }
  0x30   :  { %171 = vmatprep.subr.mxu0 %v3844_v0  ;;  %v80_v57 = vld [vmem:[#allocation2 + $0xc8] sm:$0xff]  ;;  %v79_v58 = vld [vmem:[#allocation2 + $0xc0] sm:$0xff]  ;;  %v82_v59 = vld [vmem:[#allocation2 + $0xd8] sm:$0xff] }
  0x31   :  { %172 = vmatpush1.msra.mxu0 %v125_v11  ;;  %v81_v60 = vld [vmem:[#allocation2 + $0xd0] sm:$0xff]  ;;  %v84_v61 = vld [vmem:[#allocation2 + $0xe8] sm:$0xff]  ;;  %v83_v62 = vld [vmem:[#allocation2 + $0xe0] sm:$0xff] }
  0x32   :  { %173 = vmatprep.subr.mxu0 %v3844_v0  ;;  %v86_v63 = vld [vmem:[#allocation2 + $0xf8] sm:$0xff]  ;;  %v85_v1 = vld [vmem:[#allocation2 + $0xf0] sm:$0xff]  ;;  %v88_v2 = vld [vmem:[#allocation2 + $0x108] sm:$0xff] }
  0x33   :  { %174 = vmatpush1.msra.mxu0 %v124_v12  ;;  %v87_v3 = vld [vmem:[#allocation2 + $0x100] sm:$0xff]  ;;  %v90_v4 = vld [vmem:[#allocation2 + $0x118] sm:$0xff]  ;;  %v379_v5 = vld [vmem:[%s5550_s3 + $0x8] sm:$0xff] }
  0x34   :  { %175 = vmatprep.subr.mxu0 %v3844_v0  ;;  %v89_v6 = vld [vmem:[#allocation2 + $0x110] sm:$0xff]  ;;  %3226 = vmatprep.subr.mxu1 %v379_v5  ;;  %v92_v7 = vld [vmem:[#allocation2 + $0x128] sm:$0xff]  ;;  %v378_v8 = vld [vmem:[%s5550_s3] sm:$0xff] }
  0x35   :  { %176 = vmatpush1.msra.mxu0 %v123_v13  ;;  %3227 = vmatpush3.msra.mxu1 %v379_v5  ;;  %v91_v9 = vld [vmem:[#allocation2 + $0x120] sm:$0xff]  ;;  %v94_v10 = vld [vmem:[#allocation2 + $0x138] sm:$0xff]  ;;  %v93_v11 = vld [vmem:[#allocation2 + $0x130] sm:$0xff] }
  0x36   :  { %177 = vmatprep.subr.mxu0 %v3844_v0  ;;  %3228 = vmatprep.subr.mxu1 %v378_v8  ;;  %v96_v12 = vld [vmem:[#allocation2 + $0x148] sm:$0xff]  ;;  %v95_v13 = vld [vmem:[#allocation2 + $0x140] sm:$0xff] }
  0x37   :  { %178 = vmatpush1.msra.mxu0 %v122_v14  ;;  %3229 = vmatpush3.msra.mxu1 %v378_v8  ;;  %v98_v14 = vld [vmem:[#allocation2 + $0x158] sm:$0xff] }
  0x38   :  { %179 = vmatprep.subr.mxu0 %v3844_v0 }
  0x39   :  { %180 = vmatpush1.msra.mxu0 %v121_v15  ;;  %v97_v15 = vld [vmem:[#allocation2 + $0x150] sm:$0xff] }
  0x3a   :  { %181 = vmatprep.subr.mxu0 %v3844_v0 }
  0x3b   :  { %182 = vmatpush1.msra.mxu0 %v120_v16  ;;  %v100_v16 = vld [vmem:[#allocation2 + $0x168] sm:$0xff] }
  0x3c   :  { %183 = vmatprep.subr.mxu0 %v3844_v0 }
  0x3d   :  { %184 = vmatpush1.msra.mxu0 %v119_v17  ;;  %v99_v17 = vld [vmem:[#allocation2 + $0x160] sm:$0xff] }
  0x3e   :  { %185 = vmatprep.subr.mxu0 %v3844_v0 }
  0x3f   :  { %186 = vmatpush2.msra.mxu0 %v150_v18  ;;  %v102_v18 = vld [vmem:[#allocation2 + $0x178] sm:$0xff] }
  0x40   :  { %187 = vmatprep.subr.mxu0 %v3844_v0 }
  0x41   :  { %188 = vmatpush2.msra.mxu0 %v149_v19  ;;  %v101_v19 = vld [vmem:[#allocation2 + $0x170] sm:$0xff] }
  0x42   :  { %189 = vmatprep.subr.mxu0 %v3844_v0 }
  0x43   :  { %190 = vmatpush2.msra.mxu0 %v148_v20  ;;  %v104_v20 = vld [vmem:[#allocation2 + $0x188] sm:$0xff] }
  0x44   :  { %191 = vmatprep.subr.mxu0 %v3844_v0 }
  0x45   :  { %192 = vmatpush2.msra.mxu0 %v147_v21  ;;  %v103_v21 = vld [vmem:[#allocation2 + $0x180] sm:$0xff] }
  0x46   :  { %193 = vmatprep.subr.mxu0 %v3844_v0 }
  0x47   :  { %194 = vmatpush2.msra.mxu0 %v146_v22  ;;  %v106_v22 = vld [vmem:[#allocation2 + $0x198] sm:$0xff] }
  0x48   :  { %195 = vmatprep.subr.mxu0 %v3844_v0 }
  0x49   :  { %196 = vmatpush2.msra.mxu0 %v145_v23  ;;  %v105_v23 = vld [vmem:[#allocation2 + $0x190] sm:$0xff] }
  0x4a   :  { %197 = vmatprep.subr.mxu0 %v3844_v0 }
  0x4b   :  { %198 = vmatpush2.msra.mxu0 %v144_v24  ;;  %v108_v24 = vld [vmem:[#allocation2 + $0x1a8] sm:$0xff] }
  0x4c   :  { %199 = vmatprep.subr.mxu0 %v3844_v0 }
  0x4d   :  { %200 = vmatpush2.msra.mxu0 %v143_v25  ;;  %v107_v25 = vld [vmem:[#allocation2 + $0x1a0] sm:$0xff] }
  0x4e   :  { %201 = vmatprep.subr.mxu0 %v3844_v0 }
  0x4f   :  { %202 = vmatpush2.msra.mxu0 %v142_v26  ;;  %v110_v26 = vld [vmem:[#allocation2 + $0x1b8] sm:$0xff] }
  0x50   :  { %203 = vmatprep.subr.mxu0 %v3844_v0 }
  0x51   :  { %204 = vmatpush2.msra.mxu0 %v141_v27  ;;  %v109_v27 = vld [vmem:[#allocation2 + $0x1b0] sm:$0xff] }
  0x52   :  { %205 = vmatprep.subr.mxu0 %v3844_v0 }
  0x53   :  { %206 = vmatpush2.msra.mxu0 %v140_v28  ;;  %v112_v28 = vld [vmem:[#allocation2 + $0x1c8] sm:$0xff] }
  0x54   :  { %207 = vmatprep.subr.mxu0 %v3844_v0 }
  0x55   :  { %208 = vmatpush2.msra.mxu0 %v139_v29  ;;  %v111_v29 = vld [vmem:[#allocation2 + $0x1c0] sm:$0xff] }
  0x56   :  { %209 = vmatprep.subr.mxu0 %v3844_v0 }
  0x57   :  { %210 = vmatpush2.msra.mxu0 %v138_v30  ;;  %v114_v30 = vld [vmem:[#allocation2 + $0x1d8] sm:$0xff] }
  0x58   :  { %211 = vmatprep.subr.mxu0 %v3844_v0 }
  0x59   :  { %212 = vmatpush2.msra.mxu0 %v137_v31  ;;  %v113_v31 = vld [vmem:[#allocation2 + $0x1d0] sm:$0xff] }
  0x5a   :  { %213 = vmatprep.subr.mxu0 %v3844_v0 }
  0x5b   :  { %214 = vmatpush2.msra.mxu0 %v136_v32  ;;  %v116_v32 = vld [vmem:[#allocation2 + $0x1e8] sm:$0xff] }
  0x5c   :  { %215 = vmatprep.subr.mxu0 %v3844_v0 }
  0x5d   :  { %216 = vmatpush2.msra.mxu0 %v135_v33  ;;  %v115_v33 = vld [vmem:[#allocation2 + $0x1e0] sm:$0xff] }
  0x5e   :  { %218 = vmatmul.mubr.f32.vlgmr.msra.gmra.mxu0 %v55_v34  ;;  %v118_v34 = vld [vmem:[#allocation2 + $0x1f8] sm:$0xff] }
  0x5f   :  { %222 = vmatprep.mubr.f32.mxu0 %v58_v35  ;;  %v117_v35 = vld [vmem:[#allocation2 + $0x1f0] sm:$0xff] }
  0x62   :  { %223 = vmatmul.mubr.f32.gmra.mxu0 %v57_v36 }
  0x63   :  { %227 = vmatprep.mubr.f32.mxu0 %v60_v37 }
  0x66   :  { %228 = vmatmul.mubr.f32.gmra.mxu0 %v59_v38 }
  0x67   :  { %232 = vmatprep.mubr.f32.mxu0 %v62_v39 }
  0x6a   :  { %233 = vmatmul.mubr.f32.gmra.mxu0 %v61_v40 }
  0x6b   :  { %237 = vmatprep.mubr.f32.mxu0 %v64_v41 }
  0x6e   :  { %238 = vmatmul.mubr.f32.gmra.mxu0 %v63_v42 }
  0x6f   :  { %242 = vmatprep.mubr.f32.mxu0 %v66_v43 }
  0x72   :  { %243 = vmatmul.mubr.f32.gmra.mxu0 %v65_v44 }
  0x73   :  { %247 = vmatprep.mubr.f32.mxu0 %v68_v45 }
  0x76   :  { %248 = vmatmul.mubr.f32.gmra.mxu0 %v67_v46 }
  0x77   :  { %252 = vmatprep.mubr.f32.mxu0 %v70_v47 }
  0x7a   :  { %253 = vmatmul.mubr.f32.gmra.mxu0 %v69_v48 }
  0x7b   :  { %257 = vmatprep.mubr.f32.mxu0 %v72_v49 }
  0x7e   :  { %258 = vmatmul.mubr.f32.gmra.mxu0 %v71_v50 }
  0x7f   :  { %262 = vmatprep.mubr.f32.mxu0 %v74_v51 }
  0x82   :  { %263 = vmatmul.mubr.f32.gmra.mxu0 %v73_v52 }
  0x83   :  { %267 = vmatprep.mubr.f32.mxu0 %v76_v53 }
  0x86   :  { %268 = vmatmul.mubr.f32.gmra.mxu0 %v75_v54 }
  0x87   :  { %272 = vmatprep.mubr.f32.mxu0 %v78_v55 }
  0x8a   :  { %273 = vmatmul.mubr.f32.gmra.mxu0 %v77_v56 }
  0x8b   :  { %277 = vmatprep.mubr.f32.mxu0 %v80_v57 }
  0x8e   :  { %278 = vmatmul.mubr.f32.gmra.mxu0 %v79_v58 }
  0x8f   :  { %282 = vmatprep.mubr.f32.mxu0 %v82_v59 }
  0x92   :  { %283 = vmatmul.mubr.f32.gmra.mxu0 %v81_v60 }
  0x93   :  { %287 = vmatprep.mubr.f32.mxu0 %v84_v61 }
  0x96   :  { %288 = vmatmul.mubr.f32.gmra.mxu0 %v83_v62 }
  0x97   :  { %292 = vmatprep.mubr.f32.mxu0 %v86_v63 }
  0x9a   :  { %293 = vmatmul.mubr.f32.gmra.mxu0 %v85_v1 }
  0x9b   :  { %297 = vmatprep.mubr.f32.mxu0 %v88_v2 }
  0x9e   :  { %298 = vmatmul.mubr.f32.gmra.mxu0 %v87_v3 }
  0x9f   :  { %302 = vmatprep.mubr.f32.mxu0 %v90_v4 }
  0xa2   :  { %303 = vmatmul.mubr.f32.gmra.mxu0 %v89_v6 }
  0xa3   :  { %307 = vmatprep.mubr.f32.mxu0 %v92_v7 }
  0xa6   :  { %308 = vmatmul.mubr.f32.gmra.mxu0 %v91_v9 }
  0xa7   :  { %312 = vmatprep.mubr.f32.mxu0 %v94_v10 }
  0xaa   :  { %313 = vmatmul.mubr.f32.gmra.mxu0 %v93_v11 }
  0xab   :  { %317 = vmatprep.mubr.f32.mxu0 %v96_v12 }
  0xae   :  { %318 = vmatmul.mubr.f32.gmra.mxu0 %v95_v13 }
  0xaf   :  { %322 = vmatprep.mubr.f32.mxu0 %v98_v14 }
  0xb2   :  { %323 = vmatmul.mubr.f32.gmra.mxu0 %v97_v15 }
  0xb3   :  { %327 = vmatprep.mubr.f32.mxu0 %v100_v16 }
  0xb6   :  { %328 = vmatmul.mubr.f32.gmra.mxu0 %v99_v17 }
  0xb7   :  { %332 = vmatprep.mubr.f32.mxu0 %v102_v18 }
  0xba   :  { %333 = vmatmul.mubr.f32.gmra.mxu0 %v101_v19 }
  0xbb   :  { %337 = vmatprep.mubr.f32.mxu0 %v104_v20 }
  0xbe   :  { %338 = vmatmul.mubr.f32.gmra.mxu0 %v103_v21 }
  0xbf   :  { %342 = vmatprep.mubr.f32.mxu0 %v106_v22 }
  0xc2   :  { %343 = vmatmul.mubr.f32.gmra.mxu0 %v105_v23 }
  0xc3   :  { %347 = vmatprep.mubr.f32.mxu0 %v108_v24 }
  0xc6   :  { %348 = vmatmul.mubr.f32.gmra.mxu0 %v107_v25 }
  0xc7   :  { %352 = vmatprep.mubr.f32.mxu0 %v110_v26 }
  0xca   :  { %353 = vmatmul.mubr.f32.gmra.mxu0 %v109_v27 }
  0xcb   :  { %357 = vmatprep.mubr.f32.mxu0 %v112_v28 }
  0xce   :  { %358 = vmatmul.mubr.f32.gmra.mxu0 %v111_v29 }
  0xcf   :  { %362 = vmatprep.mubr.f32.mxu0 %v114_v30 }
  0xd2   :  { %363 = vmatmul.mubr.f32.gmra.mxu0 %v113_v31 }
  0xd3   :  { %367 = vmatprep.mubr.f32.mxu0 %v116_v32 }
  0xd6   :  { %368 = vmatmul.mubr.f32.gmra.mxu0 %v115_v33 }
  0xd7   :  { %372 = vmatprep.mubr.f32.mxu0 %v118_v34 }
  0xda   :  { %373 = vmatmul.mubr.f32.gmra.mxu0 %v117_v35 }
 0x11e   :  { %v219_v36 = vpop.f32.mrf.mxu0 }
 0x11f   :  { %3230 = vmatprep.mubr.msk.f32.mxu1 %vm384_vm0, %v219_v36 }
 0x120   :  { %v221_v37 = vpop.f32.mrf.mxu0 }
 0x121   :  { %v380_v37 = vlaneseq }
 0x122   :  { %v224_v38 = vpop.f32.mrf.mxu0 }
 0x123   :  { %3231 = vmatmul.mubr.msk.f32.vlgmr.msra.gmra.mxu1 %vm384_vm0, %v224_v38  ;;  %v4061_v38 = vshrl.u32 %v380_v37, 7 }
 0x124   :  { %v226_v39 = vpop.f32.mrf.mxu0 }
 0x125   :  { %5560 = vst [vmem:[#allocation11_spill] sm:$0xff] %v4061_v38  ;;  %v5556_v39 = vsub.s32 0, %v4061_v38 }
 0x126   :  { %v229_v40 = vpop.f32.mrf.mxu0 }
 0x127   :  { %3233 = vmatprep.mubr.msk.f32.mxu1 %vm384_vm0, %v229_v40  ;;  %v4067_v40 = vld [vmem:[%s5549_s2] sm:$0xff] }
 0x128   :  { %v231_v41 = vpop.f32.mrf.mxu0 }
 0x129   :  { %v4072_v41 = vrot.slane %v4067_v40, %v5556_v39 }
 0x12a   :  { %v234_v42 = vpop.f32.mrf.mxu0 }
 0x12b   :  { %3234 = vmatmul.mubr.msk.f32.gmra.mxu1 %vm384_vm0, %v234_v42 }
 0x12c   :  { %v236_v43 = vpop.f32.mrf.mxu0 }
 0x12e   :  { %v239_v44 = vpop.f32.mrf.mxu0 }
 0x12f   :  { %3236 = vmatprep.mubr.msk.f32.mxu1 %vm384_vm0, %v239_v44 }
 0x130   :  { %v241_v45 = vpop.f32.mrf.mxu0 }
 0x132   :  { %v244_v46 = vpop.f32.mrf.mxu0 }
 0x133   :  { %3237 = vmatmul.mubr.msk.f32.gmra.mxu1 %vm384_vm0, %v244_v46 }
 0x134   :  { %v246_v47 = vpop.f32.mrf.mxu0 }
 0x136   :  { %v249_v48 = vpop.f32.mrf.mxu0 }
 0x137   :  { %3239 = vmatprep.mubr.msk.f32.mxu1 %vm384_vm0, %v249_v48 }
 0x138   :  { %v251_v49 = vpop.f32.mrf.mxu0 }
 0x13a   :  { %v254_v50 = vpop.f32.mrf.mxu0 }
 0x13b   :  { %3240 = vmatmul.mubr.msk.f32.gmra.mxu1 %vm384_vm0, %v254_v50 }
 0x13c   :  { %v256_v51 = vpop.f32.mrf.mxu0 }
 0x13e   :  { %v259_v52 = vpop.f32.mrf.mxu0 }
 0x13f   :  { %3242 = vmatprep.mubr.msk.f32.mxu1 %vm384_vm0, %v259_v52 }
 0x140   :  { %v261_v53 = vpop.f32.mrf.mxu0 }
 0x142   :  { %v264_v54 = vpop.f32.mrf.mxu0 }
 0x143   :  { %3243 = vmatmul.mubr.msk.f32.gmra.mxu1 %vm384_vm0, %v264_v54 }
 0x144   :  { %v266_v55 = vpop.f32.mrf.mxu0 }
 0x146   :  { %v269_v56 = vpop.f32.mrf.mxu0 }
 0x147   :  { %3245 = vmatprep.mubr.msk.f32.mxu1 %vm384_vm0, %v269_v56 }
 0x148   :  { %v271_v57 = vpop.f32.mrf.mxu0 }
 0x14a   :  { %v274_v58 = vpop.f32.mrf.mxu0 }
 0x14b   :  { %3246 = vmatmul.mubr.msk.f32.gmra.mxu1 %vm384_vm0, %v274_v58 }
 0x14c   :  { %v276_v59 = vpop.f32.mrf.mxu0 }
 0x14e   :  { %v279_v60 = vpop.f32.mrf.mxu0 }
 0x14f   :  { %3248 = vmatprep.mubr.msk.f32.mxu1 %vm384_vm0, %v279_v60 }
 0x150   :  { %v281_v61 = vpop.f32.mrf.mxu0 }
 0x152   :  { %v284_v62 = vpop.f32.mrf.mxu0 }
 0x153   :  { %3249 = vmatmul.mubr.msk.f32.gmra.mxu1 %vm384_vm0, %v284_v62 }
 0x154   :  { %v286_v63 = vpop.f32.mrf.mxu0 }
 0x156   :  { %v289_v1 = vpop.f32.mrf.mxu0 }
 0x157   :  { %3251 = vmatprep.mubr.msk.f32.mxu1 %vm384_vm0, %v289_v1 }
 0x158   :  { %v291_v2 = vpop.f32.mrf.mxu0 }
 0x15a   :  { %v294_v3 = vpop.f32.mrf.mxu0 }
 0x15b   :  { %3252 = vmatmul.mubr.msk.f32.gmra.mxu1 %vm384_vm0, %v294_v3 }
 0x15c   :  { %v296_v4 = vpop.f32.mrf.mxu0 }
 0x15e   :  { %v299_v5 = vpop.f32.mrf.mxu0 }
 0x15f   :  { %3254 = vmatprep.mubr.msk.f32.mxu1 %vm384_vm0, %v299_v5  ;;  %v1369_v5 = vld [vmem:[%s5551_s4 + $0x78] sm:$0xff] }
 0x160   :  { %v301_v6 = vpop.f32.mrf.mxu0  ;;  %3278 = vmatprep.subr.mxu1 %v1369_v5 }
 0x161   :  { %3279 = vmatpush3.msra.mxu1 %v1369_v5 }
 0x162   :  { %v304_v7 = vpop.f32.mrf.mxu0 }
 0x163   :  { %3255 = vmatmul.mubr.msk.f32.gmra.mxu1 %vm384_vm0, %v304_v7 }
 0x164   :  { %v306_v8 = vpop.f32.mrf.mxu0 }
 0x165   :  { %v1368_v8 = vld [vmem:[%s5551_s4 + $0x70] sm:$0xff] }
 0x166   :  { %v309_v9 = vpop.f32.mrf.mxu0  ;;  %3280 = vmatprep.subr.mxu1 %v1368_v8 }
 0x167   :  { %3257 = vmatprep.mubr.msk.f32.mxu1 %vm384_vm0, %v309_v9  ;;  %v1367_v9 = vld [vmem:[%s5551_s4 + $0x68] sm:$0xff]  ;;  %3281 = vmatpush3.msra.mxu1 %v1368_v8 }
 0x168   :  { %v311_v10 = vpop.f32.mrf.mxu0  ;;  %3282 = vmatprep.subr.mxu1 %v1367_v9 }
 0x169   :  { %3283 = vmatpush3.msra.mxu1 %v1367_v9 }
 0x16a   :  { %v314_v11 = vpop.f32.mrf.mxu0 }
 0x16b   :  { %3258 = vmatmul.mubr.msk.f32.gmra.mxu1 %vm384_vm0, %v314_v11 }
 0x16c   :  { %v316_v12 = vpop.f32.mrf.mxu0 }
 0x16e   :  { %v319_v13 = vpop.f32.mrf.mxu0 }
 0x16f   :  { %3260 = vmatprep.mubr.msk.f32.mxu1 %vm384_vm0, %v319_v13  ;;  %v1366_v13 = vld [vmem:[%s5551_s4 + $0x60] sm:$0xff] }
 0x170   :  { %v321_v14 = vpop.f32.mrf.mxu0  ;;  %3284 = vmatprep.subr.mxu1 %v1366_v13 }
 0x171   :  { %3285 = vmatpush3.msra.mxu1 %v1366_v13 }
 0x172   :  { %v324_v15 = vpop.f32.mrf.mxu0 }
 0x173   :  { %3261 = vmatmul.mubr.msk.f32.gmra.mxu1 %vm384_vm0, %v324_v15 }
 0x174   :  { %v326_v16 = vpop.f32.mrf.mxu0 }
 0x176   :  { %v329_v17 = vpop.f32.mrf.mxu0 }
 0x177   :  { %3263 = vmatprep.mubr.msk.f32.mxu1 %vm384_vm0, %v329_v17  ;;  %v1365_v17 = vld [vmem:[%s5551_s4 + $0x58] sm:$0xff] }
 0x178   :  { %v331_v18 = vpop.f32.mrf.mxu0  ;;  %3286 = vmatprep.subr.mxu1 %v1365_v17 }
 0x179   :  { %v1364_v18 = vld [vmem:[%s5551_s4 + $0x50] sm:$0xff]  ;;  %3287 = vmatpush3.msra.mxu1 %v1365_v17 }
 0x17a   :  { %v334_v19 = vpop.f32.mrf.mxu0  ;;  %3288 = vmatprep.subr.mxu1 %v1364_v18 }
 0x17b   :  { %3264 = vmatmul.mubr.msk.f32.gmra.mxu1 %vm384_vm0, %v334_v19 }
 0x17c   :  { %v336_v20 = vpop.f32.mrf.mxu0  ;;  %3289 = vmatpush3.msra.mxu1 %v1364_v18 }
 0x17e   :  { %v339_v21 = vpop.f32.mrf.mxu0 }
 0x17f   :  { %3266 = vmatprep.mubr.msk.f32.mxu1 %vm384_vm0, %v339_v21 }
 0x180   :  { %v341_v22 = vpop.f32.mrf.mxu0 }
 0x181   :  { %v1363_v22 = vld [vmem:[%s5551_s4 + $0x48] sm:$0xff] }
 0x182   :  { %v344_v23 = vpop.f32.mrf.mxu0  ;;  %3290 = vmatprep.subr.mxu1 %v1363_v22 }
 0x183   :  { %3267 = vmatmul.mubr.msk.f32.gmra.mxu1 %vm384_vm0, %v344_v23 }
 0x184   :  { %v346_v24 = vpop.f32.mrf.mxu0  ;;  %3291 = vmatpush3.msra.mxu1 %v1363_v22 }
 0x186   :  { %v349_v25 = vpop.f32.mrf.mxu0 }
 0x187   :  { %3269 = vmatprep.mubr.msk.f32.mxu1 %vm384_vm0, %v349_v25 }
 0x188   :  { %v351_v26 = vpop.f32.mrf.mxu0 }
 0x189   :  { %v1362_v26 = vld [vmem:[%s5551_s4 + $0x40] sm:$0xff] }
 0x18a   :  { %v354_v27 = vpop.f32.mrf.mxu0  ;;  %3292 = vmatprep.subr.mxu1 %v1362_v26 }
 0x18b   :  { %3270 = vmatmul.mubr.msk.f32.gmra.mxu1 %vm384_vm0, %v354_v27  ;;  %v1361_v27 = vld [vmem:[%s5551_s4 + $0x38] sm:$0xff] }
 0x18c   :  { %v356_v28 = vpop.f32.mrf.mxu0  ;;  %3293 = vmatpush3.msra.mxu1 %v1362_v26 }
 0x18d   :  { %3294 = vmatprep.subr.mxu1 %v1361_v27 }
 0x18e   :  { %v359_v29 = vpop.f32.mrf.mxu0  ;;  %3295 = vmatpush3.msra.mxu1 %v1361_v27 }
 0x18f   :  { %3272 = vmatprep.mubr.msk.f32.mxu1 %vm384_vm0, %v359_v29 }
 0x190   :  { %v361_v30 = vpop.f32.mrf.mxu0 }
 0x192   :  { %v364_v31 = vpop.f32.mrf.mxu0 }
 0x193   :  { %3273 = vmatmul.mubr.msk.f32.gmra.mxu1 %vm384_vm0, %v364_v31  ;;  %v1360_v31 = vld [vmem:[%s5551_s4 + $0x30] sm:$0xff] }
 0x194   :  { %v366_v32 = vpop.f32.mrf.mxu0  ;;  %3296 = vmatprep.subr.mxu1 %v1360_v31 }
 0x195   :  { %3297 = vmatpush3.msra.mxu1 %v1360_v31 }
 0x196   :  { %v369_v33 = vpop.f32.mrf.mxu0 }
 0x197   :  { %3275 = vmatprep.mubr.msk.f32.mxu1 %vm384_vm0, %v369_v33 }
 0x198   :  { %v371_v34 = vpop.f32.mrf.mxu0 }
 0x19a   :  { %v374_v35 = vpop.f32.mrf.mxu0 }
 0x19b   :  { %3276 = vmatmul.mubr.msk.f32.gmra.mxu1 %vm384_vm0, %v374_v35  ;;  %v1359_v35 = vld [vmem:[%s5551_s4 + $0x28] sm:$0xff] }
 0x19c   :  { %v376_v36 = vpop.f32.mrf.mxu0  ;;  %3298 = vmatprep.subr.mxu1 %v1359_v35 }
 0x19d   :  { %v1358_v36 = vld [vmem:[%s5551_s4 + $0x20] sm:$0xff]  ;;  %3299 = vmatpush3.msra.mxu1 %v1359_v35 }
 0x19e   :  { %3300 = vmatprep.subr.mxu1 %v1358_v36 }
 0x19f   :  { %3301 = vmatpush3.msra.mxu1 %v1358_v36 }
 0x1e3   :  { %v3232_v42 = vpop.f32.mrf.mxu1 }
 0x1e4   :  { %v4075_v43 = vadd.f32 %v3232_v42, %v4072_v41 }
 0x1e5   :  { %v547_v44 = vpop.f32.mrf.mxu1 }
 0x1e6   :  { %v4078_v45 = vadd.f32 %v547_v44, %v4072_v41  ;;  %708 = vadd.xlane.f32.xlu0 %v4075_v43  ;;  %v771_v46 = vmul.f32 %v4075_v43, %v4075_v43 }
 0x1e8   :  { %804 = vadd.xlane.f32.xlu1 %v771_v46  ;;  %v770_v47 = vmul.f32 %v4078_v45, %v4078_v45  ;;  %v1357_v46 = vld [vmem:[%s5551_s4 + $0x18] sm:$0xff] }
 0x1e9   :  { %3302 = vmatprep.subr.mxu1 %v1357_v46 }
 0x1ea   :  { %706 = vadd.xlane.f32.xlu0 %v4078_v45  ;;  %3303 = vmatpush3.msra.mxu1 %v1357_v46 }
 0x1eb   :  { %v3235_v48 = vpop.f32.mrf.mxu1 }
 0x1ec   :  { %802 = vadd.xlane.f32.xlu1 %v770_v47  ;;  %v4087_v50 = vadd.f32 %v3235_v48, %v4072_v41 }
 0x1ed   :  { %v557_v49 = vpop.f32.mrf.mxu1 }
 0x1ee   :  { %v4090_v51 = vadd.f32 %v557_v49, %v4072_v41  ;;  %v773_v52 = vmul.f32 %v4087_v50, %v4087_v50 }
 0x1f0   :  { %712 = vadd.xlane.f32.xlu1 %v4087_v50  ;;  %710 = vadd.xlane.f32.xlu0 %v4090_v51  ;;  %v772_v53 = vmul.f32 %v4090_v51, %v4090_v51 }
 0x1f3   :  { %v3238_v54 = vpop.f32.mrf.mxu1 }
 0x1f4   :  { %808 = vadd.xlane.f32.xlu1 %v773_v52  ;;  %806 = vadd.xlane.f32.xlu0 %v772_v53  ;;  %v4099_v56 = vadd.f32 %v3238_v54, %v4072_v41  ;;  %v1356_v52 = vld [vmem:[%s5551_s4 + $0x10] sm:$0xff]  ;;  %v1355_v53 = vld [vmem:[%s5551_s4 + $0x8] sm:$0xff] }
 0x1f5   :  { %v567_v55 = vpop.f32.mrf.mxu1  ;;  %3304 = vmatprep.subr.mxu1 %v1356_v52 }
 0x1f6   :  { %v4102_v57 = vadd.f32 %v567_v55, %v4072_v41  ;;  %v775_v58 = vmul.f32 %v4099_v56, %v4099_v56  ;;  %3305 = vmatpush3.msra.mxu1 %v1356_v52 }
 0x1f7   :  { %3306 = vmatprep.subr.mxu1 %v1355_v53 }
 0x1f8   :  { %716 = vadd.xlane.f32.xlu1 %v4099_v56  ;;  %714 = vadd.xlane.f32.xlu0 %v4102_v57  ;;  %v774_v59 = vmul.f32 %v4102_v57, %v4102_v57 }
 0x1f9   :  { %3307 = vmatpush3.msra.mxu1 %v1355_v53 }
 0x1fb   :  { %v3241_v60 = vpop.f32.mrf.mxu1 }
 0x1fc   :  { %812 = vadd.xlane.f32.xlu1 %v775_v58  ;;  %810 = vadd.xlane.f32.xlu0 %v774_v59  ;;  %v4111_v62 = vadd.f32 %v3241_v60, %v4072_v41  ;;  %v1354_v59 = vld [vmem:[%s5551_s4] sm:$0xff] }
 0x1fd   :  { %v577_v61 = vpop.f32.mrf.mxu1  ;;  %3308 = vmatprep.subr.mxu1 %v1354_v59 }
 0x1fe   :  { %v4114_v63 = vadd.f32 %v577_v61, %v4072_v41  ;;  %v777_v1 = vmul.f32 %v4111_v62, %v4111_v62  ;;  %3309 = vmatpush3.msra.mxu1 %v1354_v59 }
 0x1ff   :  { %1599 = vmatprep.subr.mxu1 %v3844_v0 }
 0x200   :  { %720 = vadd.xlane.f32.xlu1 %v4111_v62  ;;  %718 = vadd.xlane.f32.xlu0 %v4114_v63  ;;  %v776_v2 = vmul.f32 %v4114_v63, %v4114_v63 }
 0x203   :  { %v3244_v3 = vpop.f32.mrf.mxu1 }
 0x204   :  { %816 = vadd.xlane.f32.xlu1 %v777_v1  ;;  %814 = vadd.xlane.f32.xlu0 %v776_v2  ;;  %v4126_v6 = vadd.f32 %v3244_v3, %v4072_v41 }
 0x205   :  { %v587_v4 = vpop.f32.mrf.mxu1 }
 0x206   :  { %v4129_v7 = vadd.f32 %v587_v4, %v4072_v41  ;;  %v779_v10 = vmul.f32 %v4126_v6, %v4126_v6 }
 0x208   :  { %724 = vadd.xlane.f32.xlu1 %v4126_v6  ;;  %722 = vadd.xlane.f32.xlu0 %v4129_v7  ;;  %v778_v11 = vmul.f32 %v4129_v7, %v4129_v7 }
 0x20b   :  { %v3247_v12 = vpop.f32.mrf.mxu1 }
 0x20c   :  { %820 = vadd.xlane.f32.xlu1 %v779_v10  ;;  %818 = vadd.xlane.f32.xlu0 %v778_v11  ;;  %v4147_v15 = vadd.f32 %v3247_v12, %v4072_v41 }
 0x20d   :  { %v597_v14 = vpop.f32.mrf.mxu1 }
 0x20e   :  { %v4150_v16 = vadd.f32 %v597_v14, %v4072_v41  ;;  %v781_v19 = vmul.f32 %v4147_v15, %v4147_v15 }
 0x210   :  { %728 = vadd.xlane.f32.xlu1 %v4147_v15  ;;  %726 = vadd.xlane.f32.xlu0 %v4150_v16  ;;  %v780_v20 = vmul.f32 %v4150_v16, %v4150_v16 }
 0x213   :  { %v3250_v21 = vpop.f32.mrf.mxu1 }
 0x214   :  { %824 = vadd.xlane.f32.xlu1 %v781_v19  ;;  %822 = vadd.xlane.f32.xlu0 %v780_v20  ;;  %v4168_v24 = vadd.f32 %v3250_v21, %v4072_v41 }
 0x215   :  { %v607_v23 = vpop.f32.mrf.mxu1 }
 0x216   :  { %v4171_v25 = vadd.f32 %v607_v23, %v4072_v41  ;;  %v783_v28 = vmul.f32 %v4168_v24, %v4168_v24 }
 0x218   :  { %732 = vadd.xlane.f32.xlu1 %v4168_v24  ;;  %730 = vadd.xlane.f32.xlu0 %v4171_v25  ;;  %v782_v29 = vmul.f32 %v4171_v25, %v4171_v25 }
 0x21b   :  { %v3253_v30 = vpop.f32.mrf.mxu1 }
 0x21c   :  { %828 = vadd.xlane.f32.xlu1 %v783_v28  ;;  %826 = vadd.xlane.f32.xlu0 %v782_v29  ;;  %v4189_v33 = vadd.f32 %v3253_v30, %v4072_v41 }
 0x21d   :  { %v617_v32 = vpop.f32.mrf.mxu1 }
 0x21e   :  { %v4192_v34 = vadd.f32 %v617_v32, %v4072_v41  ;;  %v785_v37 = vmul.f32 %v4189_v33, %v4189_v33 }
 0x220   :  { %736 = vadd.xlane.f32.xlu1 %v4189_v33  ;;  %734 = vadd.xlane.f32.xlu0 %v4192_v34  ;;  %v784_v42 = vmul.f32 %v4192_v34, %v4192_v34 }
 0x223   :  { %v3256_v44 = vpop.f32.mrf.mxu1 }
 0x224   :  { %832 = vadd.xlane.f32.xlu1 %v785_v37  ;;  %830 = vadd.xlane.f32.xlu0 %v784_v42  ;;  %v4210_v48 = vadd.f32 %v3256_v44, %v4072_v41 }
 0x225   :  { %v627_v47 = vpop.f32.mrf.mxu1 }
 0x226   :  { %v4213_v49 = vadd.f32 %v627_v47, %v4072_v41  ;;  %v787_v54 = vmul.f32 %v4210_v48, %v4210_v48 }
 0x228   :  { %740 = vadd.xlane.f32.xlu1 %v4210_v48  ;;  %738 = vadd.xlane.f32.xlu0 %v4213_v49  ;;  %v786_v55 = vmul.f32 %v4213_v49, %v4213_v49 }
 0x22b   :  { %v3259_v58 = vpop.f32.mrf.mxu1 }
 0x22c   :  { %836 = vadd.xlane.f32.xlu1 %v787_v54  ;;  %834 = vadd.xlane.f32.xlu0 %v786_v55  ;;  %v4231_v61 = vadd.f32 %v3259_v58, %v4072_v41 }
 0x22d   :  { %v637_v60 = vpop.f32.mrf.mxu1 }
 0x22e   :  { %v4234_v1 = vadd.f32 %v637_v60, %v4072_v41  ;;  %v789_v2 = vmul.f32 %v4231_v61, %v4231_v61 }
 0x230   :  { %744 = vadd.xlane.f32.xlu1 %v4231_v61  ;;  %742 = vadd.xlane.f32.xlu0 %v4234_v1  ;;  %v788_v3 = vmul.f32 %v4234_v1, %v4234_v1 }
 0x233   :  { %v3262_v4 = vpop.f32.mrf.mxu1 }
 0x234   :  { %840 = vadd.xlane.f32.xlu1 %v789_v2  ;;  %838 = vadd.xlane.f32.xlu0 %v788_v3  ;;  %v4244_v8 = vadd.f32 %v3262_v4, %v4072_v41 }
 0x235   :  { %v647_v5 = vpop.f32.mrf.mxu1 }
 0x236   :  { %v4247_v9 = vadd.f32 %v647_v5, %v4072_v41  ;;  %v791_v10 = vmul.f32 %v4244_v8, %v4244_v8 }
 0x238   :  { %748 = vadd.xlane.f32.xlu1 %v4244_v8  ;;  %746 = vadd.xlane.f32.xlu0 %v4247_v9  ;;  %v790_v11 = vmul.f32 %v4247_v9, %v4247_v9 }
 0x23b   :  { %v3265_v12 = vpop.f32.mrf.mxu1 }
 0x23c   :  { %844 = vadd.xlane.f32.xlu1 %v791_v10  ;;  %842 = vadd.xlane.f32.xlu0 %v790_v11  ;;  %v4256_v14 = vadd.f32 %v3265_v12, %v4072_v41 }
 0x23d   :  { %v657_v13 = vpop.f32.mrf.mxu1 }
 0x23e   :  { %v4259_v17 = vadd.f32 %v657_v13, %v4072_v41  ;;  %v793_v18 = vmul.f32 %v4256_v14, %v4256_v14 }
 0x240   :  { %752 = vadd.xlane.f32.xlu1 %v4256_v14  ;;  %750 = vadd.xlane.f32.xlu0 %v4259_v17  ;;  %v792_v19 = vmul.f32 %v4259_v17, %v4259_v17 }
 0x243   :  { %v3268_v20 = vpop.f32.mrf.mxu1 }
 0x244   :  { %848 = vadd.xlane.f32.xlu1 %v793_v18  ;;  %846 = vadd.xlane.f32.xlu0 %v792_v19  ;;  %v4268_v22 = vadd.f32 %v3268_v20, %v4072_v41 }
 0x245   :  { %v667_v21 = vpop.f32.mrf.mxu1 }
 0x246   :  { %v4271_v23 = vadd.f32 %v667_v21, %v4072_v41  ;;  %v795_v26 = vmul.f32 %v4268_v22, %v4268_v22 }
 0x248   :  { %756 = vadd.xlane.f32.xlu1 %v4268_v22  ;;  %754 = vadd.xlane.f32.xlu0 %v4271_v23  ;;  %v794_v27 = vmul.f32 %v4271_v23, %v4271_v23 }
 0x24b   :  { %v3271_v28 = vpop.f32.mrf.mxu1 }
 0x24c   :  { %852 = vadd.xlane.f32.xlu1 %v795_v26  ;;  %850 = vadd.xlane.f32.xlu0 %v794_v27  ;;  %v4280_v30 = vadd.f32 %v3271_v28, %v4072_v41 }
 0x24d   :  { %v677_v29 = vpop.f32.mrf.mxu1 }
 0x24e   :  { %v4283_v31 = vadd.f32 %v677_v29, %v4072_v41  ;;  %v797_v32 = vmul.f32 %v4280_v30, %v4280_v30 }
 0x250   :  { %760 = vadd.xlane.f32.xlu1 %v4280_v30  ;;  %758 = vadd.xlane.f32.xlu0 %v4283_v31  ;;  %v796_v35 = vmul.f32 %v4283_v31, %v4283_v31 }
 0x253   :  { %v3274_v36 = vpop.f32.mrf.mxu1 }
 0x254   :  { %856 = vadd.xlane.f32.xlu1 %v797_v32  ;;  %854 = vadd.xlane.f32.xlu0 %v796_v35  ;;  %v4292_v42 = vadd.f32 %v3274_v36, %v4072_v41 }
 0x255   :  { %v687_v37 = vpop.f32.mrf.mxu1 }
 0x256   :  { %v4295_v44 = vadd.f32 %v687_v37, %v4072_v41  ;;  %v799_v46 = vmul.f32 %v4292_v42, %v4292_v42 }
 0x258   :  { %764 = vadd.xlane.f32.xlu1 %v4292_v42  ;;  %762 = vadd.xlane.f32.xlu0 %v4295_v44  ;;  %v798_v47 = vmul.f32 %v4295_v44, %v4295_v44 }
 0x25b   :  { %v3277_v52 = vpop.f32.mrf.mxu1 }
 0x25c   :  { %860 = vadd.xlane.f32.xlu1 %v799_v46  ;;  %858 = vadd.xlane.f32.xlu0 %v798_v47  ;;  %v4304_v54 = vadd.f32 %v3277_v52, %v4072_v41 }
 0x25d   :  { %v697_v53 = vpop.f32.mrf.mxu1 }
 0x25e   :  { %v4307_v55 = vadd.f32 %v697_v53, %v4072_v41  ;;  %v801_v58 = vmul.f32 %v4304_v54, %v4304_v54 }
 0x260   :  { %768 = vadd.xlane.f32.xlu1 %v4304_v54  ;;  %766 = vadd.xlane.f32.xlu0 %v4307_v55  ;;  %v800_v59 = vmul.f32 %v4307_v55, %v4307_v55 }
 0x264   :  { %864 = vadd.xlane.f32.xlu1 %v801_v58  ;;  %862 = vadd.xlane.f32.xlu0 %v800_v59  ;;  %v5555_v58 = vsub.s32 1, %v4061_v38 }
 0x26f   :  { %v709_v60 = vpop.xlane.xlu0 %708 }
 0x270   :  { %v867_v2 = vmul.f32 0.03125, %v709_v60 }
 0x271   :  { %v805_v3 = vpop.xlane.xlu1 %804 }
 0x272   :  { %v931_v4 = vmul.f32 %v867_v2, %v867_v2  ;;  %v899_v5 = vmul.f32 0.03125, %v805_v3 }
 0x273   :  { %v707_v10 = vpop.xlane.xlu0 %706 }
 0x274   :  { %v963_v41 = vsub.f32 %v899_v5, %v931_v4  ;;  %v866_v11 = vmul.f32 0.03125, %v707_v10 }
 0x275   :  { %v803_v12 = vpop.xlane.xlu1 %802 }
 0x276   :  { %v995_v13 = vadd.f32 1e-05, %v963_v41  ;;  %v930_v18 = vmul.f32 %v866_v11, %v866_v11  ;;  %v898_v19 = vmul.f32 0.03125, %v803_v12  ;;  %v1160_v41 = vsub.s32 2, %v4061_v38 }
 0x277   :  { %v1059_v12 = vsub.f32 %v4075_v43, %v867_v2 }
 0x278   :  { %3442 = vrsqrt.f32 %v995_v13  ;;  %v962_v20 = vsub.f32 %v898_v19, %v930_v18  ;;  %v4333_v13 = vrot.slane %v4067_v40, %v5555_v58  ;;  %v4340_v43 = vrot.slane %v4067_v40, %v1160_v41 }
 0x279   :  { %v713_v21 = vpop.xlane.xlu1 %712  ;;  %v711_v26 = vpop.xlane.xlu0 %710 }
 0x27a   :  { %v994_v27 = vadd.f32 1e-05, %v962_v20  ;;  %v4315_v28 = vmul.f32 0.03125, %v713_v21  ;;  %v4317_v29 = vmul.f32 0.03125, %v711_v26 }
 0x27c   :  { %3444 = vrsqrt.f32 %v994_v27  ;;  %v933_v36 = vmul.f32 %v4315_v28, %v4315_v28  ;;  %v932_v37 = vmul.f32 %v4317_v29, %v4317_v29 }
 0x27d   :  { %v809_v32 = vpop.xlane.xlu1 %808  ;;  %v807_v35 = vpop.xlane.xlu0 %806 }
 0x27e   :  { %v901_v46 = vmul.f32 0.03125, %v809_v32  ;;  %v900_v47 = vmul.f32 0.03125, %v807_v35 }
 0x280   :  { %v965_v52 = vsub.f32 %v901_v46, %v933_v36  ;;  %v964_v53 = vsub.f32 %v900_v47, %v932_v37  ;;  %v1058_v47 = vsub.f32 %v4078_v45, %v866_v11 }
 0x281   :  { %v717_v59 = vpop.xlane.xlu1 %716  ;;  %v715_v60 = vpop.xlane.xlu0 %714 }
 0x282   :  { %v997_v3 = vadd.f32 1e-05, %v965_v52  ;;  %v996_v4 = vadd.f32 1e-05, %v964_v53  ;;  %v4324_v5 = vmul.f32 0.03125, %v717_v59  ;;  %v4326_v10 = vmul.f32 0.03125, %v715_v60 }
 0x284   :  { %3446 = vrsqrt.f32 %v997_v3  ;;  %v935_v19 = vmul.f32 %v4324_v5, %v4324_v5  ;;  %v934_v27 = vmul.f32 %v4326_v10, %v4326_v10 }
 0x285   :  { %v3443_v18 = vpop.eup %3442  ;;  %3448 = vrsqrt.f32 %v996_v4  ;;  %v813_v20 = vpop.xlane.xlu1 %812 }
 0x286   :  { %v811_v21 = vpop.xlane.xlu0 %810  ;;  %v1091_v26 = vmul.f32 %v3443_v18, %v1059_v12  ;;  %v903_v32 = vmul.f32 0.03125, %v813_v20 }
 0x287   :  { %v902_v35 = vmul.f32 0.03125, %v811_v21 }
 0x288   :  { %v967_v2 = vsub.f32 %v903_v32, %v935_v19  ;;  %v1127_v37 = vmul.f32 %v4333_v13, %v1091_v26 }
 0x289   :  { %v966_v36 = vsub.f32 %v902_v35, %v934_v27  ;;  %v3445_v46 = vpop.eup %3444  ;;  %v721_v52 = vpop.xlane.xlu1 %720 }
 0x28a   :  { %v719_v53 = vpop.xlane.xlu0 %718  ;;  %v999_v59 = vadd.f32 1e-05, %v967_v2  ;;  %v4344_v3 = vmul.f32 0.03125, %v721_v52  ;;  %v1090_v12 = vmul.f32 %v3445_v46, %v1058_v47  ;;  %v4349_v18 = vadd.f32 %v4340_v43, %v1127_v37 }
 0x28b   :  { %v998_v60 = vadd.f32 1e-05, %v966_v36  ;;  %v4346_v4 = vmul.f32 0.03125, %v719_v53  ;;  %v1061_v36 = vsub.f32 %v4087_v50, %v4315_v28  ;;  %v1060_v37 = vsub.f32 %v4090_v51, %v4317_v29 }
 0x28c   :  { %3450 = vrsqrt.f32 %v999_v59  ;;  %v937_v40 = vmul.f32 %v4344_v3, %v4344_v3  ;;  %v1126_v45 = vmul.f32 %v4333_v13, %v1090_v12  ;;  %v1227_v26 = vmul.f32 0.70710677, %v4349_v18 }
 0x28d   :  { %3452 = vrsqrt.f32 %v998_v60  ;;  %v817_v41 = vpop.xlane.xlu1 %816  ;;  %v936_v11 = vmul.f32 %v4346_v4, %v4346_v4 }
 0x28e   :  { %v815_v19 = vpop.xlane.xlu0 %814  ;;  %v905_v20 = vmul.f32 0.03125, %v817_v41  ;;  %v4358_v27 = vadd.f32 %v4340_v43, %v1126_v45  ;;  %3454 = verf.f32 %v1227_v26 }
 0x28f   :  { %v904_v21 = vmul.f32 0.03125, %v815_v19 }
 0x290   :  { %v969_v32 = vsub.f32 %v905_v20, %v937_v40  ;;  %v1226_v52 = vmul.f32 0.70710677, %v4358_v27 }
 0x291   :  { %v968_v35 = vsub.f32 %v904_v21, %v936_v11  ;;  %v3447_v2 = vpop.eup %3446  ;;  %v725_v46 = vpop.xlane.xlu1 %724 }
 0x292   :  { %v723_v47 = vpop.xlane.xlu0 %722  ;;  %v3449_v53 = vpop.eup %3448  ;;  %v1001_v59 = vadd.f32 1e-05, %v969_v32  ;;  %v4365_v12 = vmul.f32 0.03125, %v725_v46  ;;  %3456 = verf.f32 %v1226_v52  ;;  %v1093_v19 = vmul.f32 %v3447_v2, %v1061_v36 }
 0x293   :  { %v1000_v60 = vadd.f32 1e-05, %v968_v35  ;;  %v4367_v41 = vmul.f32 0.03125, %v723_v47  ;;  %v1092_v40 = vmul.f32 %v3449_v53, %v1060_v37  ;;  %v1063_v37 = vsub.f32 %v4099_v56, %v4324_v5 }
 0x294   :  { %3458 = vrsqrt.f32 %v1001_v59  ;;  %v1129_v29 = vmul.f32 %v4333_v13, %v1093_v19  ;;  %v939_v45 = vmul.f32 %v4365_v12, %v4365_v12  ;;  %v1062_v46 = vsub.f32 %v4102_v57, %v4326_v10 }
 0x295   :  { %3460 = vrsqrt.f32 %v1000_v60  ;;  %v821_v50 = vpop.xlane.xlu1 %820  ;;  %v1128_v51 = vmul.f32 %v4333_v13, %v1092_v40  ;;  %v938_v11 = vmul.f32 %v4367_v41, %v4367_v41 }
 0x296   :  { %v819_v28 = vpop.xlane.xlu0 %818  ;;  %v907_v20 = vmul.f32 0.03125, %v821_v50  ;;  %v4379_v32 = vadd.f32 %v4340_v43, %v1129_v29 }
 0x297   :  { %v906_v21 = vmul.f32 0.03125, %v819_v28  ;;  %v4376_v26 = vadd.f32 %v4340_v43, %v1128_v51 }
 0x298   :  { %v971_v35 = vsub.f32 %v907_v20, %v939_v45  ;;  %v1229_v59 = vmul.f32 0.70710677, %v4379_v32 }
 0x299   :  { %v970_v2 = vsub.f32 %v906_v21, %v938_v11  ;;  %v3451_v36 = vpop.eup %3450  ;;  %v729_v47 = vpop.xlane.xlu1 %728  ;;  %v1228_v53 = vmul.f32 0.70710677, %v4376_v26 }
 0x29a   :  { %v727_v52 = vpop.xlane.xlu0 %726  ;;  %v3453_v60 = vpop.eup %3452  ;;  %v1003_v40 = vadd.f32 1e-05, %v971_v35  ;;  %v4387_v50 = vmul.f32 0.03125, %v729_v47  ;;  %v1095_v29 = vmul.f32 %v3451_v36, %v1063_v37  ;;  %v1064_v47 = vsub.f32 %v4114_v63, %v4346_v4 }
 0x29b   :  { %v1002_v19 = vadd.f32 1e-05, %v970_v2  ;;  %v4389_v28 = vmul.f32 0.03125, %v727_v52  ;;  %3462 = verf.f32 %v1228_v53  ;;  %v1094_v51 = vmul.f32 %v3453_v60, %v1062_v46  ;;  %v3455_v56 = vpop.eup %3454 }
 0x29c   :  { %3464 = vrsqrt.f32 %v1003_v40  ;;  %v941_v57 = vmul.f32 %v4387_v50, %v4387_v50  ;;  %v1131_v11 = vmul.f32 %v4333_v13, %v1095_v29  ;;  %v1065_v2 = vsub.f32 %v4111_v62, %v4344_v3 }
 0x29d   :  { %3466 = vrsqrt.f32 %v1002_v19  ;;  %v825_v5 = vpop.xlane.xlu1 %824  ;;  %v1130_v45 = vmul.f32 %v4333_v13, %v1094_v51  ;;  %v940_v20 = vmul.f32 %v4389_v28, %v4389_v28  ;;  %v1291_v60 = vadd.f32 1.0, %v3455_v56 }
 0x29e   :  { %v823_v10 = vpop.xlane.xlu0 %822  ;;  %v909_v21 = vmul.f32 0.03125, %v825_v5  ;;  %3468 = verf.f32 %v1229_v59  ;;  %v4403_v37 = vadd.f32 %v4340_v43, %v1131_v11  ;;  %v1194_v59 = vmul.f32 0.5, %v4358_v27 }
 0x29f   :  { %v908_v35 = vmul.f32 0.03125, %v823_v10  ;;  %v4400_v36 = vadd.f32 %v4340_v43, %v1130_v45  ;;  %v3457_v46 = vpop.eup %3456  ;;  %v1195_v62 = vmul.f32 0.5, %v4349_v18 }
 0x2a0   :  { %v973_v52 = vsub.f32 %v909_v21, %v941_v57  ;;  %v1290_v29 = vadd.f32 1.0, %v3457_v46  ;;  %v1231_v4 = vmul.f32 0.70710677, %v4403_v37 }
 0x2a1   :  { %v972_v53 = vsub.f32 %v908_v35, %v940_v20  ;;  %v3459_v40 = vpop.eup %3458  ;;  %v733_v19 = vpop.xlane.xlu1 %732  ;;  %v1230_v3 = vmul.f32 0.70710677, %v4400_v36  ;;  %v1323_v57 = vmul.f32 %v1291_v60, %v1195_v62 }
 0x2a2   :  { %v731_v51 = vpop.xlane.xlu0 %730  ;;  %v3461_v5 = vpop.eup %3460  ;;  %v1005_v10 = vadd.f32 1e-05, %v973_v52  ;;  %v4410_v11 = vmul.f32 0.03125, %v733_v19  ;;  %v1322_v63 = vmul.f32 %v1290_v29, %v1194_v59  ;;  %v1097_v35 = vmul.f32 %v3459_v40, %v1065_v2 }
 0x2a3   :  { %v1004_v45 = vadd.f32 1e-05, %v972_v53  ;;  %v4412_v58 = vmul.f32 0.03125, %v731_v51  ;;  %3470 = verf.f32 %v1230_v3  ;;  %v1096_v56 = vmul.f32 %v3461_v5, %v1064_v47 }
 0x2a4   :  { %3472 = vrsqrt.f32 %v1005_v10  ;;  %v943_v27 = vmul.f32 %v4410_v11, %v4410_v11  ;;  %3310 = vmatprep.mubr.f32.mxu1 %v1322_v63  ;;  %v1133_v60 = vmul.f32 %v4333_v13, %v1097_v35  ;;  %v1196_v2 = vmul.f32 0.5, %v4376_v26 }
 0x2a5   :  { %v829_v18 = vpop.xlane.xlu1 %828  ;;  %v1132_v21 = vmul.f32 %v4333_v13, %v1096_v56  ;;  %v942_v46 = vmul.f32 %v4412_v58, %v4412_v58  ;;  %3311 = vmatmul.mubr.f32.vlgmr.msra.gmra.mxu1 %v1323_v57  ;;  %3474 = verf.f32 %v1231_v4  ;;  %v1066_v63 = vsub.f32 %v4129_v7, %v4367_v41 }
 0x2a6   :  { %v827_v20 = vpop.xlane.xlu0 %826  ;;  %v911_v52 = vmul.f32 0.03125, %v829_v18  ;;  %3476 = vrsqrt.f32 %v1004_v45  ;;  %v4427_v10 = vadd.f32 %v4340_v43, %v1133_v60 }
 0x2a7   :  { %v910_v53 = vmul.f32 0.03125, %v827_v20  ;;  %v4421_v47 = vadd.f32 %v4340_v43, %v1132_v21  ;;  %v1067_v21 = vsub.f32 %v4126_v6, %v4365_v12 }
 0x2a8   :  { %v3463_v19 = vpop.eup %3462  ;;  %v975_v51 = vsub.f32 %v911_v52, %v943_v27  ;;  %v1233_v26 = vmul.f32 0.70710677, %v4427_v10 }
 0x2a9   :  { %v974_v59 = vsub.f32 %v910_v53, %v942_v46  ;;  %v3465_v29 = vpop.eup %3464  ;;  %v737_v62 = vpop.xlane.xlu1 %736  ;;  %v1292_v40 = vadd.f32 1.0, %v3463_v19  ;;  %v1232_v5 = vmul.f32 0.70710677, %v4421_v47  ;;  %v1197_v46 = vmul.f32 0.5, %v4379_v32 }
 0x2aa   :  { %v735_v3 = vpop.xlane.xlu0 %734  ;;  %v3467_v45 = vpop.eup %3466  ;;  %v4431_v56 = vmul.f32 0.03125, %v737_v62  ;;  %v1007_v18 = vadd.f32 1e-05, %v975_v51 }
 0x2ab   :  { %v1006_v4 = vadd.f32 1e-05, %v974_v59  ;;  %v4433_v57 = vmul.f32 0.03125, %v735_v3  ;;  %v3469_v27 = vpop.eup %3468  ;;  %v1324_v20 = vmul.f32 %v1292_v40, %v1196_v2  ;;  %3478 = verf.f32 %v1232_v5 }
 0x2ac   :  { %v945_v35 = vmul.f32 %v4431_v56, %v4431_v56  ;;  %v1293_v53 = vadd.f32 1.0, %v3469_v27  ;;  %v1098_v60 = vmul.f32 %v3467_v45, %v1066_v63  ;;  %v1099_v59 = vmul.f32 %v3465_v29, %v1067_v21 }
 0x2ad   :  { %3480 = vrsqrt.f32 %v1006_v4  ;;  %v944_v7 = vmul.f32 %v4433_v57, %v4433_v57  ;;  %3313 = vmatprep.mubr.f32.mxu1 %v1324_v20  ;;  %v833_v41 = vpop.xlane.xlu1 %832  ;;  %v1198_v4 = vmul.f32 0.5, %v4400_v36  ;;  %v1069_v36 = vsub.f32 %v4147_v15, %v4387_v50 }
 0x2ae   :  { %v831_v52 = vpop.xlane.xlu0 %830  ;;  %v913_v19 = vmul.f32 0.03125, %v833_v41  ;;  %3482 = verf.f32 %v1233_v26  ;;  %v1325_v6 = vmul.f32 %v1293_v53, %v1197_v46  ;;  %v1134_v12 = vmul.f32 %v4333_v13, %v1098_v60 }
 0x2af   :  { %v912_v51 = vmul.f32 0.03125, %v831_v52  ;;  %3484 = vrsqrt.f32 %v1007_v18  ;;  %v1135_v2 = vmul.f32 %v4333_v13, %v1099_v59  ;;  %v1068_v52 = vsub.f32 %v4150_v16, %v4389_v28 }
 0x2b0   :  { %v3471_v62 = vpop.eup %3470  ;;  %v977_v3 = vsub.f32 %v913_v19, %v945_v35  ;;  %3314 = vmatmul.mubr.f32.gmra.mxu1 %v1325_v6  ;;  %v4447_v45 = vadd.f32 %v4340_v43, %v1134_v12  ;;  %v1199_v53 = vmul.f32 0.5, %v4403_v37 }
 0x2b1   :  { %v976_v32 = vsub.f32 %v912_v51, %v944_v7  ;;  %v741_v40 = vpop.xlane.xlu1 %740  ;;  %v1294_v27 = vadd.f32 1.0, %v3471_v62  ;;  %v3473_v63 = vpop.eup %3472  ;;  %v4455_v7 = vadd.f32 %v4340_v43, %v1135_v2 }
 0x2b2   :  { %v739_v5 = vpop.xlane.xlu0 %738  ;;  %v4449_v18 = vmul.f32 0.03125, %v741_v40  ;;  %v3475_v26 = vpop.eup %3474  ;;  %v1009_v21 = vadd.f32 1e-05, %v977_v3  ;;  %v1234_v46 = vmul.f32 0.70710677, %v4447_v45  ;;  %v1101_v28 = vmul.f32 %v3473_v63, %v1069_v36 }
 0x2b3   :  { %v1008_v29 = vadd.f32 1e-05, %v976_v32  ;;  %v4451_v20 = vmul.f32 0.03125, %v739_v5  ;;  %v1326_v35 = vmul.f32 %v1294_v27, %v1198_v4  ;;  %v3477_v41 = vpop.eup %3476  ;;  %v1295_v6 = vadd.f32 1.0, %v3475_v26 }
 0x2b4   :  { %v947_v60 = vmul.f32 %v4449_v18, %v4449_v18  ;;  %v1235_v15 = vmul.f32 0.70710677, %v4455_v7  ;;  %v1100_v50 = vmul.f32 %v3477_v41, %v1068_v52  ;;  %v1070_v3 = vsub.f32 %v4171_v25, %v4412_v58 }
 0x2b5   :  { %3486 = vrsqrt.f32 %v1008_v29  ;;  %v946_v19 = vmul.f32 %v4451_v20, %v4451_v20  ;;  %3316 = vmatprep.mubr.f32.mxu1 %v1326_v35  ;;  %v837_v51 = vpop.xlane.xlu1 %836  ;;  %v1327_v16 = vmul.f32 %v1295_v6, %v1199_v53  ;;  %v1200_v4 = vmul.f32 0.5, %v4421_v47 }
 0x2b6   :  { %v835_v59 = vpop.xlane.xlu0 %834  ;;  %v915_v12 = vmul.f32 0.03125, %v837_v51  ;;  %3488 = verf.f32 %v1234_v46  ;;  %v1136_v29 = vmul.f32 %v4333_v13, %v1100_v50  ;;  %v1137_v26 = vmul.f32 %v4333_v13, %v1101_v28 }
 0x2b7   :  { %v914_v62 = vmul.f32 0.03125, %v835_v59  ;;  %3490 = vrsqrt.f32 %v1009_v21  ;;  %3317 = vmatmul.mubr.f32.gmra.mxu1 %v1327_v16  ;;  %v1201_v6 = vmul.f32 0.5, %v4427_v10  ;;  %v1072_v10 = vsub.f32 %v4192_v34, %v4433_v57 }
 0x2b8   :  { %v3479_v37 = vpop.eup %3478  ;;  %v979_v32 = vsub.f32 %v915_v12, %v947_v60  ;;  %3492 = verf.f32 %v1235_v15  ;;  %v4477_v36 = vadd.f32 %v4340_v43, %v1136_v29  ;;  %v4480_v52 = vadd.f32 %v4340_v43, %v1137_v26 }
 0x2b9   :  { %v978_v2 = vsub.f32 %v914_v62, %v946_v19  ;;  %v745_v40 = vpop.xlane.xlu1 %744  ;;  %v1296_v27 = vadd.f32 1.0, %v3479_v37  ;;  %v1071_v60 = vsub.f32 %v4168_v24, %v4410_v11 }
 0x2ba   :  { %v743_v5 = vpop.xlane.xlu0 %742  ;;  %v3481_v21 = vpop.eup %3480  ;;  %v1011_v35 = vadd.f32 1e-05, %v979_v32  ;;  %v4472_v46 = vmul.f32 0.03125, %v745_v40  ;;  %v1236_v50 = vmul.f32 0.70710677, %v4477_v36 }
 0x2bb   :  { %v1010_v63 = vadd.f32 1e-05, %v978_v2  ;;  %v4474_v41 = vmul.f32 0.03125, %v743_v5  ;;  %v3483_v25 = vpop.eup %3482  ;;  %v1328_v58 = vmul.f32 %v1296_v27, %v1200_v4  ;;  %v1102_v47 = vmul.f32 %v3481_v21, %v1070_v3 }
 0x2bc   :  { %v3485_v53 = vpop.eup %3484  ;;  %3494 = vrsqrt.f32 %v1011_v35  ;;  %v949_v19 = vmul.f32 %v4472_v46, %v4472_v46  ;;  %v1297_v12 = vadd.f32 1.0, %v3483_v25  ;;  %v1237_v24 = vmul.f32 0.70710677, %v4480_v52 }
 0x2bd   :  { %3496 = vrsqrt.f32 %v1010_v63  ;;  %3319 = vmatprep.mubr.f32.mxu1 %v1328_v58  ;;  %v841_v51 = vpop.xlane.xlu1 %840  ;;  %v948_v62 = vmul.f32 %v4474_v41, %v4474_v41  ;;  %v1138_v11 = vmul.f32 %v4333_v13, %v1102_v47  ;;  %v1103_v37 = vmul.f32 %v3485_v53, %v1071_v60 }
 0x2be   :  { %v839_v59 = vpop.xlane.xlu0 %838  ;;  %v917_v15 = vmul.f32 0.03125, %v841_v51  ;;  %v1329_v28 = vmul.f32 %v1297_v12, %v1201_v6  ;;  %3498 = verf.f32 %v1236_v50  ;;  %v1073_v47 = vsub.f32 %v4189_v33, %v4431_v56 }
 0x2bf   :  { %v916_v16 = vmul.f32 0.03125, %v839_v59  ;;  %3500 = verf.f32 %v1237_v24  ;;  %v4495_v5 = vadd.f32 %v4340_v43, %v1138_v11  ;;  %v1139_v4 = vmul.f32 %v4333_v13, %v1103_v37 }
 0x2c0   :  { %v981_v3 = vsub.f32 %v917_v15, %v949_v19  ;;  %3320 = vmatmul.mubr.f32.gmra.mxu1 %v1329_v28  ;;  %v1202_v53 = vmul.f32 0.5, %v4447_v45  ;;  %v1203_v60 = vmul.f32 0.5, %v4455_v7 }
 0x2c1   :  { %v980_v32 = vsub.f32 %v916_v16, %v948_v62  ;;  %v749_v2 = vpop.xlane.xlu1 %748  ;;  %v1238_v25 = vmul.f32 0.70710677, %v4495_v5  ;;  %v4504_v34 = vadd.f32 %v4340_v43, %v1139_v4 }
 0x2c2   :  { %v747_v40 = vpop.xlane.xlu0 %746  ;;  %v3487_v27 = vpop.eup %3486  ;;  %v1013_v29 = vadd.f32 1e-05, %v981_v3  ;;  %v4498_v21 = vmul.f32 0.03125, %v749_v2  ;;  %v1074_v3 = vsub.f32 %v4213_v49, %v4451_v20 }
 0x2c3   :  { %v1012_v26 = vadd.f32 1e-05, %v980_v32  ;;  %v4500_v35 = vmul.f32 0.03125, %v747_v40  ;;  %v3489_v63 = vpop.eup %3488  ;;  %v1104_v57 = vmul.f32 %v3487_v27, %v1072_v10  ;;  %v1239_v56 = vmul.f32 0.70710677, %v4504_v34 }
 0x2c4   :  { %v3491_v58 = vpop.eup %3490  ;;  %3502 = vrsqrt.f32 %v1013_v29  ;;  %v951_v51 = vmul.f32 %v4498_v21, %v4498_v21  ;;  %v1298_v6 = vadd.f32 1.0, %v3489_v63 }
 0x2c5   :  { %v3493_v19 = vpop.eup %3492  ;;  %3504 = vrsqrt.f32 %v1012_v26  ;;  %v950_v59 = vmul.f32 %v4500_v35, %v4500_v35  ;;  %v845_v12 = vpop.xlane.xlu1 %844  ;;  %v1140_v45 = vmul.f32 %v4333_v13, %v1104_v57  ;;  %v1105_v7 = vmul.f32 %v3491_v58, %v1073_v47 }
 0x2c6   :  { %v843_v62 = vpop.xlane.xlu0 %842  ;;  %v919_v15 = vmul.f32 0.03125, %v845_v12  ;;  %v1299_v50 = vadd.f32 1.0, %v3493_v19  ;;  %3506 = verf.f32 %v1238_v25  ;;  %v1330_v33 = vmul.f32 %v1298_v6, %v1202_v53 }
 0x2c7   :  { %v918_v16 = vmul.f32 0.03125, %v843_v62  ;;  %3508 = verf.f32 %v1239_v56  ;;  %v4519_v2 = vadd.f32 %v4340_v43, %v1140_v45  ;;  %v1141_v40 = vmul.f32 %v4333_v13, %v1105_v7 }
 0x2c8   :  { %v983_v28 = vsub.f32 %v919_v15, %v951_v51  ;;  %v1331_v11 = vmul.f32 %v1299_v50, %v1203_v60  ;;  %3322 = vmatprep.mubr.f32.mxu1 %v1330_v33  ;;  %v1075_v25 = vsub.f32 %v4210_v48, %v4449_v18  ;;  %v1204_v58 = vmul.f32 0.5, %v4477_v36 }
 0x2c9   :  { %v982_v24 = vsub.f32 %v918_v16, %v950_v59  ;;  %v3495_v37 = vpop.eup %3494  ;;  %v753_v32 = vpop.xlane.xlu1 %752  ;;  %v1240_v63 = vmul.f32 0.70710677, %v4519_v2  ;;  %v4528_v49 = vadd.f32 %v4340_v43, %v1141_v40  ;;  %v1205_v47 = vmul.f32 0.5, %v4480_v52 }
 0x2ca   :  { %v751_v10 = vpop.xlane.xlu0 %750  ;;  %v3497_v4 = vpop.eup %3496  ;;  %3323 = vmatmul.mubr.f32.gmra.mxu1 %v1331_v11  ;;  %v4522_v29 = vmul.f32 0.03125, %v753_v32  ;;  %v1015_v57 = vadd.f32 1e-05, %v983_v28  ;;  %v1107_v15 = vmul.f32 %v3495_v37, %v1075_v25  ;;  %v1076_v45 = vsub.f32 %v4234_v1, %v4474_v41 }
 0x2cb   :  { %v1014_v27 = vadd.f32 1e-05, %v982_v24  ;;  %v4524_v26 = vmul.f32 0.03125, %v751_v10  ;;  %v1106_v20 = vmul.f32 %v3497_v4, %v1074_v3  ;;  %v3499_v53 = vpop.eup %3498  ;;  %v1241_v6 = vmul.f32 0.70710677, %v4528_v49 }
 0x2cc   :  { %v953_v60 = vmul.f32 %v4522_v29, %v4522_v29  ;;  %v3501_v12 = vpop.eup %3500  ;;  %v1300_v62 = vadd.f32 1.0, %v3499_v53  ;;  %v1143_v3 = vmul.f32 %v4333_v13, %v1107_v15  ;;  %v1206_v25 = vmul.f32 0.5, %v4495_v5 }
 0x2cd   :  { %3510 = vrsqrt.f32 %v1014_v27  ;;  %v952_v19 = vmul.f32 %v4524_v26, %v4524_v26  ;;  %v849_v51 = vpop.xlane.xlu1 %848  ;;  %v1301_v36 = vadd.f32 1.0, %v3501_v12  ;;  %v1142_v52 = vmul.f32 %v4333_v13, %v1106_v20 }
 0x2ce   :  { %v847_v59 = vpop.xlane.xlu0 %846  ;;  %v921_v48 = vmul.f32 0.03125, %v849_v51  ;;  %3512 = verf.f32 %v1240_v63  ;;  %v1332_v16 = vmul.f32 %v1300_v62, %v1204_v58  ;;  %v4552_v41 = vadd.f32 %v4340_v43, %v1143_v3 }
 0x2cf   :  { %v920_v18 = vmul.f32 0.03125, %v847_v59  ;;  %3514 = verf.f32 %v1241_v6  ;;  %v1333_v7 = vmul.f32 %v1301_v36, %v1205_v47  ;;  %v4543_v11 = vadd.f32 %v4340_v43, %v1142_v52 }
 0x2d0   :  { %3516 = vrsqrt.f32 %v1015_v57  ;;  %v985_v50 = vsub.f32 %v921_v48, %v953_v60  ;;  %3325 = vmatprep.mubr.f32.mxu1 %v1332_v16  ;;  %v1077_v20 = vsub.f32 %v4231_v61, %v4472_v46  ;;  %v1207_v57 = vmul.f32 0.5, %v4504_v34 }
 0x2d1   :  { %v984_v33 = vsub.f32 %v920_v18, %v952_v19  ;;  %v3503_v56 = vpop.eup %3502  ;;  %v757_v28 = vpop.xlane.xlu1 %756  ;;  %3326 = vmatmul.mubr.f32.gmra.mxu1 %v1333_v7  ;;  %v1242_v1 = vmul.f32 0.70710677, %v4543_v11  ;;  %v1243_v61 = vmul.f32 0.70710677, %v4552_v41  ;;  %v1078_v18 = vsub.f32 %v4247_v9, %v4500_v35 }
 0x2d2   :  { %v755_v24 = vpop.xlane.xlu0 %754  ;;  %v3505_v32 = vpop.eup %3504  ;;  %v1017_v10 = vadd.f32 1e-05, %v985_v50  ;;  %v4546_v40 = vmul.f32 0.03125, %v757_v28  ;;  %v1109_v12 = vmul.f32 %v3503_v56, %v1077_v20 }
 0x2d3   :  { %v1016_v37 = vadd.f32 1e-05, %v984_v33  ;;  %v4548_v4 = vmul.f32 0.03125, %v755_v24  ;;  %v3507_v27 = vpop.eup %3506  ;;  %v1108_v63 = vmul.f32 %v3505_v32, %v1076_v45  ;;  %v1079_v32 = vsub.f32 %v4244_v8, %v4498_v21 }
 0x2d4   :  { %3518 = vrsqrt.f32 %v1017_v10  ;;  %v955_v58 = vmul.f32 %v4546_v40, %v4546_v40  ;;  %v1302_v53 = vadd.f32 1.0, %v3507_v27  ;;  %v3509_v51 = vpop.eup %3508  ;;  %v1145_v50 = vmul.f32 %v4333_v13, %v1109_v12 }
 0x2d5   :  { %3520 = vrsqrt.f32 %v1016_v37  ;;  %v954_v47 = vmul.f32 %v4548_v4, %v4548_v4  ;;  %v853_v60 = vpop.xlane.xlu1 %852  ;;  %v1303_v5 = vadd.f32 1.0, %v3509_v51  ;;  %v1144_v34 = vmul.f32 %v4333_v13, %v1108_v63 }
 0x2d6   :  { %v851_v19 = vpop.xlane.xlu0 %850  ;;  %v923_v59 = vmul.f32 0.03125, %v853_v60  ;;  %3522 = verf.f32 %v1242_v1  ;;  %v1334_v46 = vmul.f32 %v1302_v53, %v1206_v25  ;;  %v4576_v9 = vadd.f32 %v4340_v43, %v1145_v50 }
 0x2d7   :  { %v922_v6 = vmul.f32 0.03125, %v851_v19  ;;  %3524 = verf.f32 %v1243_v61  ;;  %v1335_v36 = vmul.f32 %v1303_v5, %v1207_v57  ;;  %v4567_v16 = vadd.f32 %v4340_v43, %v1144_v34 }
 0x2d8   :  { %v987_v62 = vsub.f32 %v923_v59, %v955_v58  ;;  %3328 = vmatprep.mubr.f32.mxu1 %v1334_v46  ;;  %v1208_v37 = vmul.f32 0.5, %v4519_v2  ;;  %v1209_v27 = vmul.f32 0.5, %v4528_v49  ;;  %v1245_v2 = vmul.f32 0.70710677, %v4576_v9 }
 0x2d9   :  { %v986_v48 = vsub.f32 %v922_v6, %v954_v47  ;;  %v761_v52 = vpop.xlane.xlu1 %760  ;;  %3329 = vmatmul.mubr.f32.gmra.mxu1 %v1335_v36  ;;  %v1244_v24 = vmul.f32 0.70710677, %v4567_v16  ;;  %v1080_v61 = vsub.f32 %v4259_v17, %v4524_v26 }
 0x2da   :  { %v759_v15 = vpop.xlane.xlu0 %758  ;;  %v3511_v33 = vpop.eup %3510  ;;  %v4570_v7 = vmul.f32 0.03125, %v761_v52  ;;  %v1019_v10 = vadd.f32 1e-05, %v987_v62 }
 0x2db   :  { %v1018_v45 = vadd.f32 1e-05, %v986_v48  ;;  %v4572_v56 = vmul.f32 0.03125, %v759_v15  ;;  %v3513_v28 = vpop.eup %3512  ;;  %v1110_v35 = vmul.f32 %v3511_v33, %v1078_v18  ;;  %v1081_v15 = vsub.f32 %v4256_v14, %v4522_v29 }
 0x2dc   :  { %v3515_v3 = vpop.eup %3514  ;;  %v957_v63 = vmul.f32 %v4570_v7, %v4570_v7  ;;  %v1304_v20 = vadd.f32 1.0, %v3513_v28  ;;  %v1211_v28 = vmul.f32 0.5, %v4552_v41 }
 0x2dd   :  { %v3517_v1 = vpop.eup %3516  ;;  %3526 = vrsqrt.f32 %v1018_v45  ;;  %v857_v25 = vpop.xlane.xlu1 %856  ;;  %v1305_v58 = vadd.f32 1.0, %v3515_v3  ;;  %v956_v47 = vmul.f32 %v4572_v56, %v4572_v56  ;;  %v1146_v49 = vmul.f32 %v4333_v13, %v1110_v35 }
 0x2de   :  { %v855_v57 = vpop.xlane.xlu0 %854  ;;  %v925_v53 = vmul.f32 0.03125, %v857_v25  ;;  %3528 = verf.f32 %v1244_v24  ;;  %v1336_v8 = vmul.f32 %v1304_v20, %v1208_v37  ;;  %v1111_v59 = vmul.f32 %v3517_v1, %v1079_v32 }
 0x2df   :  { %v924_v60 = vmul.f32 0.03125, %v855_v57  ;;  %v1337_v21 = vmul.f32 %v1305_v58, %v1209_v27  ;;  %3530 = vrsqrt.f32 %v1019_v10  ;;  %v4591_v34 = vadd.f32 %v4340_v43, %v1146_v49 }
 0x2e0   :  { %v989_v19 = vsub.f32 %v925_v53, %v957_v63  ;;  %3331 = vmatprep.mubr.f32.mxu1 %v1336_v8  ;;  %3532 = verf.f32 %v1245_v2  ;;  %v1147_v26 = vmul.f32 %v4333_v13, %v1111_v59  ;;  %v1210_v45 = vmul.f32 0.5, %v4543_v11 }
 0x2e1   :  { %v988_v51 = vsub.f32 %v924_v60, %v956_v47  ;;  %v3519_v6 = vpop.eup %3518  ;;  %v765_v46 = vpop.xlane.xlu1 %764  ;;  %3332 = vmatmul.mubr.f32.gmra.mxu1 %v1337_v21  ;;  %v1246_v17 = vmul.f32 0.70710677, %v4591_v34  ;;  %v1082_v58 = vsub.f32 %v4271_v23, %v4548_v4 }
 0x2e2   :  { %v763_v5 = vpop.xlane.xlu0 %762  ;;  %v3521_v12 = vpop.eup %3520  ;;  %v1021_v62 = vadd.f32 1e-05, %v989_v19  ;;  %v4593_v18 = vmul.f32 0.03125, %v765_v46  ;;  %v4608_v32 = vadd.f32 %v4340_v43, %v1147_v26  ;;  %v1113_v57 = vmul.f32 %v3519_v6, %v1081_v15 }
 0x2e3   :  { %v1020_v48 = vadd.f32 1e-05, %v988_v51  ;;  %v4595_v36 = vmul.f32 0.03125, %v763_v5  ;;  %v3523_v52 = vpop.eup %3522  ;;  %v1112_v50 = vmul.f32 %v3521_v12, %v1080_v61  ;;  %v1083_v6 = vsub.f32 %v4268_v22, %v4546_v40 }
 0x2e4   :  { %3534 = vrsqrt.f32 %v1021_v62  ;;  %v959_v33 = vmul.f32 %v4593_v18, %v4593_v18  ;;  %v3525_v24 = vpop.eup %3524  ;;  %v1306_v3 = vadd.f32 1.0, %v3523_v52  ;;  %v1247_v11 = vmul.f32 0.70710677, %v4608_v32 }
 0x2e5   :  { %3536 = vrsqrt.f32 %v1020_v48  ;;  %v958_v35 = vmul.f32 %v4595_v36, %v4595_v36  ;;  %v861_v14 = vpop.xlane.xlu1 %860  ;;  %v1307_v27 = vadd.f32 1.0, %v3525_v24  ;;  %v1148_v41 = vmul.f32 %v4333_v13, %v1112_v50 }
 0x2e6   :  { %v859_v29 = vpop.xlane.xlu0 %858  ;;  %v927_v10 = vmul.f32 0.03125, %v861_v14  ;;  %3538 = verf.f32 %v1246_v17  ;;  %v1338_v1 = vmul.f32 %v1306_v3, %v1210_v45  ;;  %v1149_v23 = vmul.f32 %v4333_v13, %v1113_v57 }
 0x2e7   :  { %v926_v37 = vmul.f32 0.03125, %v859_v29  ;;  %v1339_v25 = vmul.f32 %v1307_v27, %v1211_v28  ;;  %3540 = verf.f32 %v1247_v11  ;;  %v4615_v60 = vadd.f32 %v4340_v43, %v1148_v41 }
 0x2e8   :  { %v991_v63 = vsub.f32 %v927_v10, %v959_v33  ;;  %3334 = vmatprep.mubr.f32.mxu1 %v1338_v1  ;;  %v1212_v46 = vmul.f32 0.5, %v4567_v16  ;;  %v4631_v15 = vadd.f32 %v4340_v43, %v1149_v23  ;;  %v1213_v16 = vmul.f32 0.5, %v4576_v9 }
 0x2e9   :  { %v990_v20 = vsub.f32 %v926_v37, %v958_v35  ;;  %v769_v47 = vpop.xlane.xlu1 %768  ;;  %3335 = vmatmul.mubr.f32.gmra.mxu1 %v1339_v25  ;;  %v1248_v59 = vmul.f32 0.70710677, %v4615_v60  ;;  %v1085_v29 = vsub.f32 %v4280_v30, %v4570_v7  ;;  %v1084_v10 = vsub.f32 %v4283_v31, %v4572_v56 }
 0x2ea   :  { %v767_v53 = vpop.xlane.xlu0 %766  ;;  %v3527_v8 = vpop.eup %3526  ;;  %v1023_v21 = vadd.f32 1e-05, %v991_v63  ;;  %v4617_v49 = vmul.f32 0.03125, %v769_v47  ;;  %v1249_v45 = vmul.f32 0.70710677, %v4631_v15  ;;  %v1214_v30 = vmul.f32 0.5, %v4591_v34 }
 0x2eb   :  { %v1022_v2 = vadd.f32 1e-05, %v990_v20  ;;  %v4619_v19 = vmul.f32 0.03125, %v767_v53  ;;  %v3529_v51 = vpop.eup %3528  ;;  %v1114_v4 = vmul.f32 %v3527_v8, %v1082_v58  ;;  %v1215_v8 = vmul.f32 0.5, %v4608_v32 }
 0x2ec   :  { %3542 = vrsqrt.f32 %v1023_v21  ;;  %v961_v61 = vmul.f32 %v4617_v49, %v4617_v49  ;;  %v3531_v5 = vpop.eup %3530  ;;  %v1308_v62 = vadd.f32 1.0, %v3529_v51  ;;  %v1087_v34 = vsub.f32 %v4292_v42, %v4593_v18 }
 0x2ed   :  { %3544 = vrsqrt.f32 %v1022_v2  ;;  %v960_v12 = vmul.f32 %v4619_v19, %v4619_v19  ;;  %v865_v48 = vpop.xlane.xlu1 %864  ;;  %v3533_v17 = vpop.eup %3532  ;;  %v1150_v40 = vmul.f32 %v4333_v13, %v1114_v4  ;;  %v1115_v3 = vmul.f32 %v3531_v5, %v1083_v6 }
 0x2ee   :  { %v863_v52 = vpop.xlane.xlu0 %862  ;;  %v929_v26 = vmul.f32 0.03125, %v865_v48  ;;  %3546 = verf.f32 %v1248_v59  ;;  %v1340_v50 = vmul.f32 %v1308_v62, %v1212_v46  ;;  %v1309_v33 = vadd.f32 1.0, %v3533_v17 }
 0x2ef   :  { %v928_v22 = vmul.f32 0.03125, %v863_v52  ;;  %v4637_v35 = vadd.f32 %v4340_v43, %v1150_v40  ;;  %3548 = verf.f32 %v1249_v45  ;;  %v1151_v11 = vmul.f32 %v4333_v13, %v1115_v3 }
 0x2f0   :  { %v993_v28 = vsub.f32 %v929_v26, %v961_v61  ;;  %3337 = vmatprep.mubr.f32.mxu1 %v1340_v50  ;;  %v1341_v37 = vmul.f32 %v1309_v33, %v1213_v16  ;;  %v1086_v23 = vsub.f32 %v4295_v44, %v4595_v36  ;;  %v1216_v62 = vmul.f32 0.5, %v4615_v60 }
 0x2f1   :  { %v992_v24 = vsub.f32 %v928_v22, %v960_v12  ;;  %v3535_v14 = vpop.eup %3534  ;;  %v1250_v63 = vmul.f32 0.70710677, %v4637_v35  ;;  %v1187_v31 = vadd.f32 %v4340_v43, %v1151_v11  ;;  %v1217_v36 = vmul.f32 0.5, %v4631_v15 }
 0x2f2   :  { %v3537_v9 = vpop.eup %3536  ;;  %v1025_v27 = vadd.f32 1e-05, %v993_v28  ;;  %3338 = vmatmul.mubr.f32.gmra.mxu1 %v1341_v37  ;;  %v1117_v25 = vmul.f32 %v3535_v14, %v1085_v29  ;;  %v1089_v40 = vsub.f32 %v4304_v54, %v4617_v49  ;;  %v1088_v16 = vsub.f32 %v4307_v55, %v4619_v19 }
 0x2f3   :  { %v1024_v1 = vadd.f32 1e-05, %v992_v24  ;;  %v3539_v41 = vpop.eup %3538  ;;  %v1116_v20 = vmul.f32 %v3537_v9, %v1084_v10  ;;  %v1251_v53 = vmul.f32 0.70710677, %v1187_v31  ;;  %v1218_v14 = vmul.f32 0.5, %v4637_v35 }
 0x2f4   :  { %3550 = vrsqrt.f32 %v1025_v27  ;;  %v1310_v7 = vadd.f32 1.0, %v3539_v41  ;;  %v1153_v57 = vmul.f32 %v4333_v13, %v1117_v25  ;;  %v3541_v58 = vpop.eup %3540  ;;  %v1219_v9 = vmul.f32 0.5, %v1187_v31 }
 0x2f5   :  { %3552 = vrsqrt.f32 %v1024_v1  ;;  %v1152_v56 = vmul.f32 %v4333_v13, %v1116_v20  ;;  %v1311_v21 = vadd.f32 1.0, %v3541_v58 }
 0x2f6   :  { %v1342_v47 = vmul.f32 %v1310_v7, %v1214_v30  ;;  %3554 = verf.f32 %v1250_v63  ;;  %v1189_v51 = vadd.f32 %v4340_v43, %v1153_v57 }
 0x2f7   :  { %v1188_v2 = vadd.f32 %v4340_v43, %v1152_v56  ;;  %3556 = verf.f32 %v1251_v53  ;;  %v1343_v4 = vmul.f32 %v1311_v21, %v1215_v8 }
 0x2f8   :  { %3340 = vmatprep.mubr.f32.mxu1 %v1342_v47  ;;  %v1253_v46 = vmul.f32 0.70710677, %v1189_v51  ;;  %v1221_v30 = vmul.f32 0.5, %v1189_v51 }
 0x2f9   :  { %v3543_v59 = vpop.eup %3542  ;;  %v1252_v6 = vmul.f32 0.70710677, %v1188_v2  ;;  %3341 = vmatmul.mubr.f32.gmra.mxu1 %v1343_v4  ;;  %v1220_v20 = vmul.f32 0.5, %v1188_v2 }
 0x2fa   :  { %v3545_v61 = vpop.eup %3544  ;;  %v1119_v5 = vmul.f32 %v3543_v59, %v1087_v34 }
 0x2fb   :  { %v3547_v32 = vpop.eup %3546  ;;  %3558 = verf.f32 %v1252_v6  ;;  %v1118_v12 = vmul.f32 %v3545_v61, %v1086_v23 }
 0x2fc   :  { %v1312_v48 = vadd.f32 1.0, %v3547_v32  ;;  %3560 = verf.f32 %v1253_v46  ;;  %v1155_v42 = vmul.f32 %v4333_v13, %v1119_v5  ;;  %v3549_v52 = vpop.eup %3548  ;;  %v3706_v46 = vld [vmem:[#allocation2 + $0x8] sm:$0xff] }
 0x2fd   :  { %v1154_v18 = vmul.f32 %v4333_v13, %v1118_v12  ;;  %v1313_v26 = vadd.f32 1.0, %v3549_v52 }
 0x2fe   :  { %v1344_v17 = vmul.f32 %v1312_v48, %v1216_v62  ;;  %v1191_v44 = vadd.f32 %v4340_v43, %v1155_v42 }
 0x2ff   :  { %v1190_v22 = vadd.f32 %v4340_v43, %v1154_v18  ;;  %v1345_v33 = vmul.f32 %v1313_v26, %v1217_v36 }
 0x300   :  { %3343 = vmatprep.mubr.f32.mxu1 %v1344_v17  ;;  %v1255_v60 = vmul.f32 0.70710677, %v1191_v44 }
 0x301   :  { %v3551_v50 = vpop.eup %3550  ;;  %v1254_v45 = vmul.f32 0.70710677, %v1190_v22  ;;  %3344 = vmatmul.mubr.f32.gmra.mxu1 %v1345_v33  ;;  %v1222_v47 = vmul.f32 0.5, %v1190_v22 }
 0x302   :  { %v3553_v28 = vpop.eup %3552  ;;  %3562 = verf.f32 %v1255_v60  ;;  %v1121_v24 = vmul.f32 %v3551_v50, %v1089_v40 }
 0x303   :  { %v3555_v3 = vpop.eup %3554  ;;  %3564 = verf.f32 %v1254_v45  ;;  %v1120_v15 = vmul.f32 %v3553_v28, %v1088_v16 }
 0x304   :  { %v1314_v29 = vadd.f32 1.0, %v3555_v3  ;;  %v1157_v54 = vmul.f32 %v4333_v13, %v1121_v24  ;;  %v3557_v49 = vpop.eup %3556 }
 0x305   :  { %v1156_v10 = vmul.f32 %v4333_v13, %v1120_v15  ;;  %v1315_v55 = vadd.f32 1.0, %v3557_v49 }
 0x306   :  { %v1346_v37 = vmul.f32 %v1314_v29, %v1218_v14  ;;  %v1193_v19 = vadd.f32 %v4340_v43, %v1157_v54 }
 0x307   :  { %v1192_v27 = vadd.f32 %v4340_v43, %v1156_v10  ;;  %v1347_v11 = vmul.f32 %v1315_v55, %v1219_v9  ;;  %v1223_v43 = vmul.f32 0.5, %v1191_v44 }
 0x308   :  { %v3559_v1 = vpop.eup %3558  ;;  %3346 = vmatprep.mubr.f32.mxu1 %v1346_v37  ;;  %v1257_v41 = vmul.f32 0.70710677, %v1193_v19  ;;  %v1225_v51 = vmul.f32 0.5, %v1193_v19 }
 0x309   :  { %v3561_v63 = vpop.eup %3560  ;;  %v1316_v35 = vadd.f32 1.0, %v3559_v1  ;;  %v1256_v25 = vmul.f32 0.70710677, %v1192_v27  ;;  %3347 = vmatmul.mubr.f32.gmra.mxu1 %v1347_v11  ;;  %v1224_v23 = vmul.f32 0.5, %v1192_v27  ;;  %v3707_v27 = vld [vmem:[#allocation2] sm:$0xff]  ;;  %v3708_v1 = vld [vmem:[#allocation2 + $0x18] sm:$0xff] }
 0x30a   :  { %v1317_v7 = vadd.f32 1.0, %v3561_v63  ;;  %3566 = verf.f32 %v1257_v41  ;;  %v3709_v11 = vld [vmem:[#allocation2 + $0x10] sm:$0xff]  ;;  %v3710_v41 = vld [vmem:[#allocation2 + $0x28] sm:$0xff]  ;;  %v3711_v63 = vld [vmem:[#allocation2 + $0x20] sm:$0xff] }
 0x30b   :  { %v1348_v13 = vmul.f32 %v1316_v35, %v1220_v20  ;;  %3568 = verf.f32 %v1256_v25  ;;  %v3712_v20 = vld [vmem:[#allocation2 + $0x38] sm:$0xff]  ;;  %v3713_v35 = vld [vmem:[#allocation2 + $0x30] sm:$0xff]  ;;  %v3714_v25 = vld [vmem:[#allocation2 + $0x48] sm:$0xff] }
 0x30c   :  { %v1349_v31 = vmul.f32 %v1317_v7, %v1221_v30  ;;  %v3715_v30 = vld [vmem:[#allocation2 + $0x40] sm:$0xff]  ;;  %v3717_v7 = vld [vmem:[#allocation2 + $0x50] sm:$0xff] }
 0x30d   :  { %3349 = vmatprep.mubr.f32.mxu1 %v1348_v13  ;;  %v3718_v13 = vld [vmem:[#allocation2 + $0x68] sm:$0xff] }
 0x30e   :  { %3350 = vmatmul.mubr.f32.gmra.mxu1 %v1349_v31  ;;  %v3719_v31 = vld [vmem:[#allocation2 + $0x60] sm:$0xff] }
 0x30f   :  { %v3563_v56 = vpop.eup %3562 }
 0x310   :  { %v3565_v57 = vpop.eup %3564  ;;  %v1319_v58 = vadd.f32 1.0, %v3563_v56  ;;  %v3720_v56 = vld [vmem:[#allocation2 + $0x78] sm:$0xff] }
 0x311   :  { %v1318_v53 = vadd.f32 1.0, %v3565_v57  ;;  %v3721_v57 = vld [vmem:[#allocation2 + $0x70] sm:$0xff] }
 0x312   :  { %v1351_v8 = vmul.f32 %v1319_v58, %v1223_v43  ;;  %v3722_v43 = vld [vmem:[#allocation2 + $0x88] sm:$0xff]  ;;  %v3723_v58 = vld [vmem:[#allocation2 + $0x80] sm:$0xff] }
 0x313   :  { %v1350_v21 = vmul.f32 %v1318_v53, %v1222_v47  ;;  %v3724_v47 = vld [vmem:[#allocation2 + $0x98] sm:$0xff]  ;;  %v3725_v53 = vld [vmem:[#allocation2 + $0x90] sm:$0xff] }
 0x315   :  { %3352 = vmatprep.mubr.f32.mxu1 %v1350_v21  ;;  %v3727_v21 = vld [vmem:[#allocation2 + $0xa0] sm:$0xff] }
 0x316   :  { %3353 = vmatmul.mubr.f32.gmra.mxu1 %v1351_v8  ;;  %v3726_v8 = vld [vmem:[#allocation2 + $0xa8] sm:$0xff] }
 0x317   :  { %v3567_v2 = vpop.eup %3566 }
 0x318   :  { %v3569_v34 = vpop.eup %3568  ;;  %v1321_v59 = vadd.f32 1.0, %v3567_v2  ;;  %v3728_v2 = vld [vmem:[#allocation2 + $0xb8] sm:$0xff] }
 0x319   :  { %v1320_v4 = vadd.f32 1.0, %v3569_v34  ;;  %v3729_v34 = vld [vmem:[#allocation2 + $0xb0] sm:$0xff] }
 0x31a   :  { %v1353_v6 = vmul.f32 %v1321_v59, %v1225_v51  ;;  %v3730_v51 = vld [vmem:[#allocation2 + $0xc8] sm:$0xff]  ;;  %v3731_v59 = vld [vmem:[#allocation2 + $0xc0] sm:$0xff] }
 0x31b   :  { %v1352_v61 = vmul.f32 %v1320_v4, %v1224_v23  ;;  %v3732_v23 = vld [vmem:[#allocation2 + $0xd8] sm:$0xff]  ;;  %v3733_v4 = vld [vmem:[#allocation2 + $0xd0] sm:$0xff] }
 0x31d   :  { %3355 = vmatprep.mubr.f32.mxu1 %v1352_v61  ;;  %v3735_v61 = vld [vmem:[#allocation2 + $0xe0] sm:$0xff] }
 0x31e   :  { %3356 = vmatmul.mubr.f32.gmra.mxu1 %v1353_v6  ;;  %v3734_v6 = vld [vmem:[#allocation2 + $0xe8] sm:$0xff] }
 0x31f   :  { %1663 = vmatprep.mubr.f32.mxu1 %v3706_v46  ;;  %v3736_v46 = vld [vmem:[#allocation2 + $0xf8] sm:$0xff] }
 0x365   :  { %v3312_v5 = vpop.f32.mrf.mxu1 }
 0x367   :  { %v1436_v32 = vpop.f32.mrf.mxu1 }
 0x370   :  { %v3315_v12 = vpop.f32.mrf.mxu1 }
 0x372   :  { %v1446_v62 = vpop.f32.mrf.mxu1 }
 0x377   :  { %v3318_v48 = vpop.f32.mrf.mxu1 }
 0x379   :  { %v1456_v42 = vpop.f32.mrf.mxu1 }
 0x380   :  { %v3321_v18 = vpop.f32.mrf.mxu1 }
 0x382   :  { %v1466_v52 = vpop.f32.mrf.mxu1 }
 0x38a   :  { %v3324_v17 = vpop.f32.mrf.mxu1 }
 0x38c   :  { %v1476_v44 = vpop.f32.mrf.mxu1 }
 0x391   :  { %v3327_v36 = vpop.f32.mrf.mxu1 }
 0x393   :  { %v1486_v26 = vpop.f32.mrf.mxu1 }
 0x399   :  { %v3330_v22 = vpop.f32.mrf.mxu1 }
 0x39b   :  { %v1496_v40 = vpop.f32.mrf.mxu1 }
 0x3a1   :  { %v3333_v60 = vpop.f32.mrf.mxu1 }
 0x3a2   :  { %1600 = vmatpush1.msra.mxu1 %v3333_v60  ;;  %v3751_v60 = vld [vmem:[#allocation2 + $0x160] sm:$0xff] }
 0x3a3   :  { %v1506_v50 = vpop.f32.mrf.mxu1  ;;  %1601 = vmatprep.subr.mxu1 %v3844_v0 }
 0x3a4   :  { %1602 = vmatpush1.msra.mxu1 %v1506_v50  ;;  %v3752_v50 = vld [vmem:[#allocation2 + $0x178] sm:$0xff] }
 0x3a5   :  { %1603 = vmatprep.subr.mxu1 %v3844_v0 }
 0x3a6   :  { %1604 = vmatpush1.msra.mxu1 %v3330_v22  ;;  %v3749_v22 = vld [vmem:[#allocation2 + $0x150] sm:$0xff] }
 0x3a7   :  { %1605 = vmatprep.subr.mxu1 %v3844_v0 }
 0x3a8   :  { %1606 = vmatpush1.msra.mxu1 %v1496_v40  ;;  %v3750_v40 = vld [vmem:[#allocation2 + $0x168] sm:$0xff] }
 0x3a9   :  { %1607 = vmatprep.subr.mxu1 %v3844_v0  ;;  %v3336_v16 = vpop.f32.mrf.mxu1 }
 0x3aa   :  { %1608 = vmatpush1.msra.mxu1 %v3327_v36  ;;  %v3747_v36 = vld [vmem:[#allocation2 + $0x140] sm:$0xff] }
 0x3ab   :  { %1609 = vmatprep.subr.mxu1 %v3844_v0  ;;  %v1516_v33 = vpop.f32.mrf.mxu1 }
 0x3ac   :  { %1610 = vmatpush1.msra.mxu1 %v1486_v26  ;;  %v3748_v26 = vld [vmem:[#allocation2 + $0x158] sm:$0xff] }
 0x3ad   :  { %1611 = vmatprep.subr.mxu1 %v3844_v0 }
 0x3ae   :  { %1612 = vmatpush1.msra.mxu1 %v3324_v17  ;;  %v3745_v17 = vld [vmem:[#allocation2 + $0x130] sm:$0xff] }
 0x3af   :  { %1613 = vmatprep.subr.mxu1 %v3844_v0 }
 0x3b0   :  { %1614 = vmatpush1.msra.mxu1 %v1476_v44  ;;  %v3746_v44 = vld [vmem:[#allocation2 + $0x148] sm:$0xff] }
 0x3b1   :  { %1615 = vmatprep.subr.mxu1 %v3844_v0 }
 0x3b2   :  { %1616 = vmatpush1.msra.mxu1 %v3321_v18  ;;  %v3339_v45 = vpop.f32.mrf.mxu1  ;;  %v3743_v18 = vld [vmem:[#allocation2 + $0x120] sm:$0xff] }
 0x3b3   :  { %1617 = vmatprep.subr.mxu1 %v3844_v0 }
 0x3b4   :  { %1618 = vmatpush1.msra.mxu1 %v1466_v52  ;;  %v1526_v28 = vpop.f32.mrf.mxu1  ;;  %v3744_v52 = vld [vmem:[#allocation2 + $0x138] sm:$0xff] }
 0x3b5   :  { %1619 = vmatprep.subr.mxu1 %v3844_v0 }
 0x3b6   :  { %1620 = vmatpush1.msra.mxu1 %v3318_v48  ;;  %v3741_v48 = vld [vmem:[#allocation2 + $0x110] sm:$0xff] }
 0x3b7   :  { %1621 = vmatprep.subr.mxu1 %v3844_v0 }
 0x3b8   :  { %1622 = vmatpush1.msra.mxu1 %v1456_v42  ;;  %v3742_v42 = vld [vmem:[#allocation2 + $0x128] sm:$0xff] }
 0x3b9   :  { %1623 = vmatprep.subr.mxu1 %v3844_v0  ;;  %v3342_v24 = vpop.f32.mrf.mxu1 }
 0x3ba   :  { %1624 = vmatpush1.msra.mxu1 %v3315_v12  ;;  %v3739_v12 = vld [vmem:[#allocation2 + $0x100] sm:$0xff] }
 0x3bb   :  { %1625 = vmatprep.subr.mxu1 %v3844_v0  ;;  %v1536_v3 = vpop.f32.mrf.mxu1 }
 0x3bc   :  { %1626 = vmatpush1.msra.mxu1 %v1446_v62  ;;  %v3740_v62 = vld [vmem:[#allocation2 + $0x118] sm:$0xff] }
 0x3bd   :  { %1627 = vmatprep.subr.mxu1 %v3844_v0 }
 0x3be   :  { %1628 = vmatpush1.msra.mxu1 %v3312_v5  ;;  %v3737_v5 = vld [vmem:[#allocation2 + $0xf0] sm:$0xff] }
 0x3bf   :  { %1629 = vmatprep.subr.mxu1 %v3844_v0 }
 0x3c0   :  { %1630 = vmatpush1.msra.mxu1 %v1436_v32  ;;  %v3738_v32 = vld [vmem:[#allocation2 + $0x108] sm:$0xff] }
 0x3c1   :  { %1631 = vmatprep.subr.mxu1 %v3844_v0  ;;  %v3345_v15 = vpop.f32.mrf.mxu1 }
 0x3c3   :  { %v1546_v14 = vpop.f32.mrf.mxu1 }
 0x3c9   :  { %v3348_v29 = vpop.f32.mrf.mxu1 }
 0x3cb   :  { %v1556_v54 = vpop.f32.mrf.mxu1 }
 0x3ce   :  { %v3351_v49 = vpop.f32.mrf.mxu1 }
 0x3d0   :  { %v1566_v10 = vpop.f32.mrf.mxu1 }
 0x3d6   :  { %v3354_v37 = vpop.f32.mrf.mxu1 }
 0x3d8   :  { %v1576_v9 = vpop.f32.mrf.mxu1 }
 0x3de   :  { %v3357_v55 = vpop.f32.mrf.mxu1 }
 0x3df   :  { %1632 = vmatpush2.msra.mxu1 %v3357_v55  ;;  %v3767_v55 = vld [vmem:[#allocation2 + $0x1e0] sm:$0xff] }
 0x3e0   :  { %v1586_v19 = vpop.f32.mrf.mxu1  ;;  %1633 = vmatprep.subr.mxu1 %v3844_v0 }
 0x3e1   :  { %1634 = vmatpush2.msra.mxu1 %v1586_v19  ;;  %v3768_v19 = vld [vmem:[#allocation2 + $0x1f8] sm:$0xff] }
 0x3e2   :  { %1635 = vmatprep.subr.mxu1 %v3844_v0 }
 0x3e3   :  { %1636 = vmatpush2.msra.mxu1 %v3354_v37  ;;  %v3765_v37 = vld [vmem:[#allocation2 + $0x1d0] sm:$0xff] }
 0x3e4   :  { %1637 = vmatprep.subr.mxu1 %v3844_v0 }
 0x3e5   :  { %1638 = vmatpush2.msra.mxu1 %v1576_v9  ;;  %v3766_v9 = vld [vmem:[#allocation2 + $0x1e8] sm:$0xff] }
 0x3e6   :  { %1639 = vmatprep.subr.mxu1 %v3844_v0 }
 0x3e7   :  { %1640 = vmatpush2.msra.mxu1 %v3351_v49  ;;  %v3763_v49 = vld [vmem:[#allocation2 + $0x1c0] sm:$0xff] }
 0x3e8   :  { %1641 = vmatprep.subr.mxu1 %v3844_v0 }
 0x3e9   :  { %1642 = vmatpush2.msra.mxu1 %v1566_v10  ;;  %v3764_v10 = vld [vmem:[#allocation2 + $0x1d8] sm:$0xff] }
 0x3ea   :  { %1643 = vmatprep.subr.mxu1 %v3844_v0 }
 0x3eb   :  { %1644 = vmatpush2.msra.mxu1 %v3348_v29  ;;  %v3761_v29 = vld [vmem:[#allocation2 + $0x1b0] sm:$0xff] }
 0x3ec   :  { %1645 = vmatprep.subr.mxu1 %v3844_v0 }
 0x3ed   :  { %1646 = vmatpush2.msra.mxu1 %v1556_v54  ;;  %v3762_v54 = vld [vmem:[#allocation2 + $0x1c8] sm:$0xff] }
 0x3ee   :  { %1647 = vmatprep.subr.mxu1 %v3844_v0 }
 0x3ef   :  { %1648 = vmatpush2.msra.mxu1 %v3345_v15  ;;  %v3759_v15 = vld [vmem:[#allocation2 + $0x1a0] sm:$0xff] }
 0x3f0   :  { %1649 = vmatprep.subr.mxu1 %v3844_v0 }
 0x3f1   :  { %1650 = vmatpush2.msra.mxu1 %v1546_v14  ;;  %v3760_v14 = vld [vmem:[#allocation2 + $0x1b8] sm:$0xff] }
 0x3f2   :  { %1651 = vmatprep.subr.mxu1 %v3844_v0 }
 0x3f3   :  { %1652 = vmatpush2.msra.mxu1 %v3342_v24  ;;  %v3757_v24 = vld [vmem:[#allocation2 + $0x190] sm:$0xff] }
 0x3f4   :  { %1653 = vmatprep.subr.mxu1 %v3844_v0 }
 0x3f5   :  { %1654 = vmatpush2.msra.mxu1 %v1536_v3  ;;  %v3758_v3 = vld [vmem:[#allocation2 + $0x1a8] sm:$0xff] }
 0x3f6   :  { %1655 = vmatprep.subr.mxu1 %v3844_v0 }
 0x3f7   :  { %1656 = vmatpush2.msra.mxu1 %v3339_v45  ;;  %v3755_v45 = vld [vmem:[#allocation2 + $0x180] sm:$0xff] }
 0x3f8   :  { %1657 = vmatprep.subr.mxu1 %v3844_v0 }
 0x3f9   :  { %1658 = vmatpush2.msra.mxu1 %v1526_v28  ;;  %v3756_v28 = vld [vmem:[#allocation2 + $0x198] sm:$0xff] }
 0x3fa   :  { %1659 = vmatprep.subr.mxu1 %v3844_v0 }
 0x3fb   :  { %1660 = vmatpush2.msra.mxu1 %v3336_v16  ;;  %v3753_v16 = vld [vmem:[#allocation2 + $0x170] sm:$0xff] }
 0x3fc   :  { %1661 = vmatprep.subr.mxu1 %v3844_v0  ;;  %v3716_v0 = vld [vmem:[#allocation2 + $0x58] sm:$0xff] }
 0x3fd   :  { %1662 = vmatpush2.msra.mxu1 %v1516_v33  ;;  %v3754_v33 = vld [vmem:[#allocation2 + $0x188] sm:$0xff] }
 0x3fe   :  { %1664 = vmatmul.mubr.f32.vlgmr.msra.gmra.mxu1 %v3707_v27  ;;  %v3769_v27 = vld [vmem:[#allocation2 + $0x1f0] sm:$0xff] }
 0x3ff   :  { %1668 = vmatprep.mubr.f32.mxu1 %v3708_v1  ;;  %v1597_v1 = vsub.s32 3, %v4061_v38 }
 0x402   :  { %1669 = vmatmul.mubr.f32.gmra.mxu1 %v3709_v11  ;;  %v4706_v11 = vld [vmem:[%s5549_s2] sm:$0xff] }
 0x403   :  { %1673 = vmatprep.mubr.f32.mxu1 %v3710_v41  ;;  %v4709_v41 = vrot.slane %v4706_v11, %v1597_v1 }
 0x406   :  { %1674 = vmatmul.mubr.f32.gmra.mxu1 %v3711_v63 }
 0x407   :  { %1678 = vmatprep.mubr.f32.mxu1 %v3712_v20 }
 0x40a   :  { %1679 = vmatmul.mubr.f32.gmra.mxu1 %v3713_v35 }
 0x40b   :  { %1683 = vmatprep.mubr.f32.mxu1 %v3714_v25 }
 0x40e   :  { %1684 = vmatmul.mubr.f32.gmra.mxu1 %v3715_v30 }
 0x40f   :  { %1688 = vmatprep.mubr.f32.mxu1 %v3716_v0 }
 0x412   :  { %1689 = vmatmul.mubr.f32.gmra.mxu1 %v3717_v7 }
 0x413   :  { %1693 = vmatprep.mubr.f32.mxu1 %v3718_v13 }
 0x416   :  { %1694 = vmatmul.mubr.f32.gmra.mxu1 %v3719_v31 }
 0x417   :  { %1698 = vmatprep.mubr.f32.mxu1 %v3720_v56 }
 0x41a   :  { %1699 = vmatmul.mubr.f32.gmra.mxu1 %v3721_v57 }
 0x41b   :  { %1703 = vmatprep.mubr.f32.mxu1 %v3722_v43 }
 0x41e   :  { %1704 = vmatmul.mubr.f32.gmra.mxu1 %v3723_v58 }
 0x41f   :  { %1708 = vmatprep.mubr.f32.mxu1 %v3724_v47 }
 0x422   :  { %1709 = vmatmul.mubr.f32.gmra.mxu1 %v3725_v53 }
 0x423   :  { %1713 = vmatprep.mubr.f32.mxu1 %v3726_v8 }
 0x426   :  { %1714 = vmatmul.mubr.f32.gmra.mxu1 %v3727_v21 }
 0x427   :  { %1718 = vmatprep.mubr.f32.mxu1 %v3728_v2 }
 0x42a   :  { %1719 = vmatmul.mubr.f32.gmra.mxu1 %v3729_v34 }
 0x42b   :  { %1723 = vmatprep.mubr.f32.mxu1 %v3730_v51 }
 0x42e   :  { %1724 = vmatmul.mubr.f32.gmra.mxu1 %v3731_v59 }
 0x42f   :  { %1728 = vmatprep.mubr.f32.mxu1 %v3732_v23 }
 0x432   :  { %1729 = vmatmul.mubr.f32.gmra.mxu1 %v3733_v4 }
 0x433   :  { %1733 = vmatprep.mubr.f32.mxu1 %v3734_v6 }
 0x436   :  { %1734 = vmatmul.mubr.f32.gmra.mxu1 %v3735_v61 }
 0x437   :  { %1738 = vmatprep.mubr.f32.mxu1 %v3736_v46 }
 0x43a   :  { %1739 = vmatmul.mubr.f32.gmra.mxu1 %v3737_v5 }
 0x43b   :  { %1743 = vmatprep.mubr.f32.mxu1 %v3738_v32 }
 0x43e   :  { %1744 = vmatmul.mubr.f32.gmra.mxu1 %v3739_v12 }
 0x43f   :  { %1748 = vmatprep.mubr.f32.mxu1 %v3740_v62 }
 0x442   :  { %1749 = vmatmul.mubr.f32.gmra.mxu1 %v3741_v48 }
 0x443   :  { %1753 = vmatprep.mubr.f32.mxu1 %v3742_v42 }
 0x446   :  { %1754 = vmatmul.mubr.f32.gmra.mxu1 %v3743_v18 }
 0x447   :  { %1758 = vmatprep.mubr.f32.mxu1 %v3744_v52 }
 0x44a   :  { %1759 = vmatmul.mubr.f32.gmra.mxu1 %v3745_v17 }
 0x44b   :  { %1763 = vmatprep.mubr.f32.mxu1 %v3746_v44 }
 0x44e   :  { %1764 = vmatmul.mubr.f32.gmra.mxu1 %v3747_v36 }
 0x44f   :  { %1768 = vmatprep.mubr.f32.mxu1 %v3748_v26 }
 0x452   :  { %1769 = vmatmul.mubr.f32.gmra.mxu1 %v3749_v22 }
 0x453   :  { %1773 = vmatprep.mubr.f32.mxu1 %v3750_v40 }
 0x456   :  { %1774 = vmatmul.mubr.f32.gmra.mxu1 %v3751_v60 }
 0x457   :  { %1778 = vmatprep.mubr.f32.mxu1 %v3752_v50 }
 0x45a   :  { %1779 = vmatmul.mubr.f32.gmra.mxu1 %v3753_v16 }
 0x45b   :  { %1783 = vmatprep.mubr.f32.mxu1 %v3754_v33 }
 0x45e   :  { %1784 = vmatmul.mubr.f32.gmra.mxu1 %v3755_v45 }
 0x45f   :  { %1788 = vmatprep.mubr.f32.mxu1 %v3756_v28 }
 0x462   :  { %1789 = vmatmul.mubr.f32.gmra.mxu1 %v3757_v24 }
 0x463   :  { %1793 = vmatprep.mubr.f32.mxu1 %v3758_v3 }
 0x466   :  { %1794 = vmatmul.mubr.f32.gmra.mxu1 %v3759_v15 }
 0x467   :  { %1798 = vmatprep.mubr.f32.mxu1 %v3760_v14 }
 0x46a   :  { %1799 = vmatmul.mubr.f32.gmra.mxu1 %v3761_v29 }
 0x46b   :  { %1803 = vmatprep.mubr.f32.mxu1 %v3762_v54 }
 0x46e   :  { %1804 = vmatmul.mubr.f32.gmra.mxu1 %v3763_v49 }
 0x46f   :  { %1808 = vmatprep.mubr.f32.mxu1 %v3764_v10 }
 0x472   :  { %1809 = vmatmul.mubr.f32.gmra.mxu1 %v3765_v37 }
 0x473   :  { %1813 = vmatprep.mubr.f32.mxu1 %v3766_v9 }
 0x476   :  { %1814 = vmatmul.mubr.f32.gmra.mxu1 %v3767_v55 }
 0x477   :  { %1818 = vmatprep.mubr.f32.mxu1 %v3768_v19 }
 0x47a   :  { %1819 = vmatmul.mubr.f32.gmra.mxu1 %v3769_v27 }
 0x4be   :  { %v1665_v63 = vpop.f32.mrf.mxu1 }
 0x4bf   :  { %v4712_v20 = vadd.f32 %v1665_v63, %v4709_v41 }
 0x4c0   :  { %v1667_v35 = vpop.f32.mrf.mxu1 }
 0x4c1   :  { %1824 = vadd.xlane.f32.xlu0 %v4712_v20  ;;  %v1888_v25 = vmul.f32 %v4712_v20, %v4712_v20 }
 0x4c2   :  { %v1670_v30 = vpop.f32.mrf.mxu1 }
 0x4c3   :  { %v4718_v0 = vadd.f32 %v1670_v30, %v4709_v41  ;;  %1920 = vadd.xlane.f32.xlu1 %v1888_v25 }
 0x4c4   :  { %v1672_v7 = vpop.f32.mrf.mxu1 }
 0x4c5   :  { %v1889_v13 = vmul.f32 %v4718_v0, %v4718_v0 }
 0x4c6   :  { %v1675_v31 = vpop.f32.mrf.mxu1 }
 0x4c7   :  { %v4723_v56 = vadd.f32 %v1675_v31, %v4709_v41  ;;  %1922 = vadd.xlane.f32.xlu0 %v1889_v13  ;;  %1826 = vadd.xlane.f32.xlu1 %v4718_v0 }
 0x4c8   :  { %v1677_v57 = vpop.f32.mrf.mxu1 }
 0x4c9   :  { %v1890_v43 = vmul.f32 %v4723_v56, %v4723_v56 }
 0x4ca   :  { %v1680_v58 = vpop.f32.mrf.mxu1 }
 0x4cb   :  { %v4729_v47 = vadd.f32 %v1680_v58, %v4709_v41  ;;  %1828 = vadd.xlane.f32.xlu0 %v4723_v56  ;;  %1924 = vadd.xlane.f32.xlu1 %v1890_v43 }
 0x4cc   :  { %v1682_v53 = vpop.f32.mrf.mxu1 }
 0x4cd   :  { %v1891_v8 = vmul.f32 %v4729_v47, %v4729_v47 }
 0x4ce   :  { %v1685_v21 = vpop.f32.mrf.mxu1 }
 0x4cf   :  { %1830 = vadd.xlane.f32.xlu1 %v4729_v47  ;;  %1926 = vadd.xlane.f32.xlu0 %v1891_v8  ;;  %v4736_v34 = vadd.f32 %v1685_v21, %v4709_v41 }
 0x4d0   :  { %v1687_v2 = vpop.f32.mrf.mxu1 }
 0x4d1   :  { %v1892_v4 = vmul.f32 %v4736_v34, %v4736_v34 }
 0x4d2   :  { %v1690_v51 = vpop.f32.mrf.mxu1 }
 0x4d3   :  { %v4739_v59 = vadd.f32 %v1690_v51, %v4709_v41  ;;  %1832 = vadd.xlane.f32.xlu1 %v4736_v34 }
 0x4d4   :  { %v1692_v23 = vpop.f32.mrf.mxu1 }
 0x4d5   :  { %1834 = vadd.xlane.f32.xlu0 %v4739_v59  ;;  %v1893_v5 = vmul.f32 %v4739_v59, %v4739_v59 }
 0x4d6   :  { %v1695_v6 = vpop.f32.mrf.mxu1 }
 0x4d7   :  { %v4746_v61 = vadd.f32 %v1695_v6, %v4709_v41  ;;  %1928 = vadd.xlane.f32.xlu1 %v1892_v4 }
 0x4d8   :  { %v1697_v46 = vpop.f32.mrf.mxu1 }
 0x4d9   :  { %1836 = vadd.xlane.f32.xlu0 %v4746_v61  ;;  %v1894_v12 = vmul.f32 %v4746_v61, %v4746_v61 }
 0x4da   :  { %v1700_v32 = vpop.f32.mrf.mxu1 }
 0x4db   :  { %1930 = vadd.xlane.f32.xlu1 %v1893_v5  ;;  %v4754_v48 = vadd.f32 %v1700_v32, %v4709_v41 }
 0x4dc   :  { %v1702_v62 = vpop.f32.mrf.mxu1 }
 0x4dd   :  { %1932 = vadd.xlane.f32.xlu0 %v1894_v12  ;;  %v1895_v44 = vmul.f32 %v4754_v48, %v4754_v48 }
 0x4de   :  { %v1705_v42 = vpop.f32.mrf.mxu1 }
 0x4df   :  { %v4757_v18 = vadd.f32 %v1705_v42, %v4709_v41  ;;  %1838 = vadd.xlane.f32.xlu1 %v4754_v48 }
 0x4e0   :  { %v1707_v52 = vpop.f32.mrf.mxu1 }
 0x4e1   :  { %v1896_v17 = vmul.f32 %v4757_v18, %v4757_v18 }
 0x4e2   :  { %v1710_v36 = vpop.f32.mrf.mxu1 }
 0x4e3   :  { %1936 = vadd.xlane.f32.xlu0 %v1896_v17  ;;  %1934 = vadd.xlane.f32.xlu1 %v1895_v44  ;;  %v4765_v22 = vadd.f32 %v1710_v36, %v4709_v41 }
 0x4e4   :  { %v1712_v26 = vpop.f32.mrf.mxu1 }
 0x4e5   :  { %v1897_v16 = vmul.f32 %v4765_v22, %v4765_v22 }
 0x4e6   :  { %v1715_v40 = vpop.f32.mrf.mxu1 }
 0x4e7   :  { %1842 = vadd.xlane.f32.xlu0 %v4765_v22  ;;  %1840 = vadd.xlane.f32.xlu1 %v4757_v18  ;;  %v4770_v50 = vadd.f32 %v1715_v40, %v4709_v41 }
 0x4e8   :  { %v1717_v60 = vpop.f32.mrf.mxu1 }
 0x4e9   :  { %v1898_v24 = vmul.f32 %v4770_v50, %v4770_v50 }
 0x4ea   :  { %v1720_v33 = vpop.f32.mrf.mxu1 }
 0x4eb   :  { %1844 = vadd.xlane.f32.xlu0 %v4770_v50  ;;  %1938 = vadd.xlane.f32.xlu1 %v1897_v16  ;;  %v4776_v28 = vadd.f32 %v1720_v33, %v4709_v41 }
 0x4ec   :  { %v1722_v45 = vpop.f32.mrf.mxu1 }
 0x4ed   :  { %v1899_v29 = vmul.f32 %v4776_v28, %v4776_v28 }
 0x4ee   :  { %v1725_v3 = vpop.f32.mrf.mxu1 }
 0x4ef   :  { %1846 = vadd.xlane.f32.xlu0 %v4776_v28  ;;  %1940 = vadd.xlane.f32.xlu1 %v1898_v24  ;;  %v4782_v14 = vadd.f32 %v1725_v3, %v4709_v41 }
 0x4f0   :  { %v1727_v15 = vpop.f32.mrf.mxu1 }
 0x4f1   :  { %v1900_v37 = vmul.f32 %v4782_v14, %v4782_v14 }
 0x4f2   :  { %v1730_v54 = vpop.f32.mrf.mxu1 }
 0x4f3   :  { %1942 = vadd.xlane.f32.xlu0 %v1899_v29  ;;  %1848 = vadd.xlane.f32.xlu1 %v4782_v14  ;;  %v4788_v10 = vadd.f32 %v1730_v54, %v4709_v41 }
 0x4f4   :  { %v1732_v49 = vpop.f32.mrf.mxu1 }
 0x4f5   :  { %v1901_v27 = vmul.f32 %v4788_v10, %v4788_v10 }
 0x4f6   :  { %v1735_v9 = vpop.f32.mrf.mxu1 }
 0x4f7   :  { %1944 = vadd.xlane.f32.xlu0 %v1900_v37  ;;  %1850 = vadd.xlane.f32.xlu1 %v4788_v10  ;;  %v4794_v19 = vadd.f32 %v1735_v9, %v4709_v41 }
 0x4f8   :  { %v1737_v55 = vpop.f32.mrf.mxu1 }
 0x4f9   :  { %v1902_v25 = vmul.f32 %v4794_v19, %v4794_v19 }
 0x4fa   :  { %v1740_v1 = vpop.f32.mrf.mxu1 }
 0x4fb   :  { %1852 = vadd.xlane.f32.xlu0 %v4794_v19  ;;  %1946 = vadd.xlane.f32.xlu1 %v1901_v27  ;;  %v4800_v35 = vadd.f32 %v1740_v1, %v4709_v41 }
 0x4fc   :  { %v1742_v63 = vpop.f32.mrf.mxu1 }
 0x4fd   :  { %v1903_v31 = vmul.f32 %v4800_v35, %v4800_v35 }
 0x4fe   :  { %v1745_v30 = vpop.f32.mrf.mxu1 }
 0x4ff   :  { %1948 = vadd.xlane.f32.xlu0 %v1902_v25  ;;  %1854 = vadd.xlane.f32.xlu1 %v4800_v35  ;;  %v4806_v13 = vadd.f32 %v1745_v30, %v4709_v41 }
 0x500   :  { %v1747_v7 = vpop.f32.mrf.mxu1 }
 0x501   :  { %v1904_v8 = vmul.f32 %v4806_v13, %v4806_v13 }
 0x502   :  { %v1750_v57 = vpop.f32.mrf.mxu1 }
 0x503   :  { %v4811_v43 = vadd.f32 %v1750_v57, %v4709_v41  ;;  %1856 = vadd.xlane.f32.xlu0 %v4806_v13  ;;  %1950 = vadd.xlane.f32.xlu1 %v1903_v31 }
 0x504   :  { %v1752_v58 = vpop.f32.mrf.mxu1 }
 0x505   :  { %v1905_v53 = vmul.f32 %v4811_v43, %v4811_v43  ;;  %v2712_v58 = vld [vmem:[%s5552_s5 + $0x78] sm:$0xff] }
 0x506   :  { %v1755_v21 = vpop.f32.mrf.mxu1  ;;  %3358 = vmatprep.subr.mxu0 %v2712_v58 }
 0x507   :  { %1954 = vadd.xlane.f32.xlu0 %v1905_v53  ;;  %1952 = vadd.xlane.f32.xlu1 %v1904_v8  ;;  %v4819_v51 = vadd.f32 %v1755_v21, %v4709_v41  ;;  %v2711_v53 = vld [vmem:[%s5552_s5 + $0x70] sm:$0xff] }
 0x508   :  { %v1757_v2 = vpop.f32.mrf.mxu1  ;;  %3359 = vmatpush3.msra.mxu0 %v2712_v58 }
 0x509   :  { %v1906_v46 = vmul.f32 %v4819_v51, %v4819_v51  ;;  %3360 = vmatprep.subr.mxu0 %v2711_v53 }
 0x50a   :  { %v1760_v23 = vpop.f32.mrf.mxu1  ;;  %3361 = vmatpush3.msra.mxu0 %v2711_v53 }
 0x50b   :  { %1860 = vadd.xlane.f32.xlu0 %v4819_v51  ;;  %1858 = vadd.xlane.f32.xlu1 %v4811_v43  ;;  %v4824_v6 = vadd.f32 %v1760_v23, %v4709_v41 }
 0x50c   :  { %v1762_v4 = vpop.f32.mrf.mxu1 }
 0x50d   :  { %v1907_v62 = vmul.f32 %v4824_v6, %v4824_v6 }
 0x50e   :  { %v1765_v5 = vpop.f32.mrf.mxu1 }
 0x50f   :  { %1956 = vadd.xlane.f32.xlu0 %v1906_v46  ;;  %1862 = vadd.xlane.f32.xlu1 %v4824_v6  ;;  %v4830_v12 = vadd.f32 %v1765_v5, %v4709_v41  ;;  %v2710_v5 = vld [vmem:[%s5552_s5 + $0x68] sm:$0xff] }
 0x510   :  { %v1767_v32 = vpop.f32.mrf.mxu1  ;;  %3362 = vmatprep.subr.mxu0 %v2710_v5 }
 0x511   :  { %v1908_v44 = vmul.f32 %v4830_v12, %v4830_v12  ;;  %3363 = vmatpush3.msra.mxu0 %v2710_v5 }
 0x512   :  { %v1770_v42 = vpop.f32.mrf.mxu1 }
 0x513   :  { %1864 = vadd.xlane.f32.xlu0 %v4830_v12  ;;  %1958 = vadd.xlane.f32.xlu1 %v1907_v62  ;;  %v4836_v17 = vadd.f32 %v1770_v42, %v4709_v41  ;;  %v2709_v42 = vld [vmem:[%s5552_s5 + $0x60] sm:$0xff] }
 0x514   :  { %v1772_v52 = vpop.f32.mrf.mxu1  ;;  %3364 = vmatprep.subr.mxu0 %v2709_v42 }
 0x515   :  { %v1909_v60 = vmul.f32 %v4836_v17, %v4836_v17  ;;  %3365 = vmatpush3.msra.mxu0 %v2709_v42 }
 0x516   :  { %v1775_v36 = vpop.f32.mrf.mxu1 }
 0x517   :  { %1960 = vadd.xlane.f32.xlu0 %v1908_v44  ;;  %1866 = vadd.xlane.f32.xlu1 %v4836_v17  ;;  %v4842_v40 = vadd.f32 %v1775_v36, %v4709_v41  ;;  %v2708_v36 = vld [vmem:[%s5552_s5 + $0x58] sm:$0xff] }
 0x518   :  { %v1777_v26 = vpop.f32.mrf.mxu1  ;;  %3366 = vmatprep.subr.mxu0 %v2708_v36 }
 0x519   :  { %v1910_v24 = vmul.f32 %v4842_v40, %v4842_v40  ;;  %3367 = vmatpush3.msra.mxu0 %v2708_v36 }
 0x51a   :  { %v1780_v16 = vpop.f32.mrf.mxu1 }
 0x51b   :  { %1962 = vadd.xlane.f32.xlu0 %v1909_v60  ;;  %1868 = vadd.xlane.f32.xlu1 %v4842_v40  ;;  %v4848_v45 = vadd.f32 %v1780_v16, %v4709_v41 }
 0x51c   :  { %v1782_v33 = vpop.f32.mrf.mxu1 }
 0x51d   :  { %v1911_v29 = vmul.f32 %v4848_v45, %v4848_v45 }
 0x51e   :  { %v1785_v3 = vpop.f32.mrf.mxu1 }
 0x51f   :  { %1870 = vadd.xlane.f32.xlu0 %v4848_v45  ;;  %1964 = vadd.xlane.f32.xlu1 %v1910_v24  ;;  %v4859_v9 = vadd.f32 %v1785_v3, %v4709_v41 }
 0x520   :  { %v1787_v15 = vpop.f32.mrf.mxu1 }
 0x521   :  { %v1912_v25 = vmul.f32 %v4859_v9, %v4859_v9 }
 0x522   :  { %v1790_v54 = vpop.f32.mrf.mxu1 }
 0x523   :  { %v4856_v49 = vadd.f32 %v1790_v54, %v4709_v41  ;;  %1966 = vadd.xlane.f32.xlu1 %v1911_v29 }
 0x524   :  { %v1792_v37 = vpop.f32.mrf.mxu1 }
 0x525   :  { %1874 = vadd.xlane.f32.xlu0 %v4856_v49  ;;  %v1913_v27 = vmul.f32 %v4856_v49, %v4856_v49 }
 0x526   :  { %v1795_v55 = vpop.f32.mrf.mxu1 }
 0x527   :  { %1872 = vadd.xlane.f32.xlu1 %v4859_v9  ;;  %v4866_v63 = vadd.f32 %v1795_v55, %v4709_v41 }
 0x528   :  { %v1797_v1 = vpop.f32.mrf.mxu1 }
 0x529   :  { %1970 = vadd.xlane.f32.xlu0 %v1913_v27  ;;  %v1914_v21 = vmul.f32 %v4866_v63, %v4866_v63 }
 0x52a   :  { %v1800_v30 = vpop.f32.mrf.mxu1 }
 0x52b   :  { %1968 = vadd.xlane.f32.xlu1 %v1912_v25  ;;  %v4871_v7 = vadd.f32 %v1800_v30, %v4709_v41 }
 0x52c   :  { %v1802_v31 = vpop.f32.mrf.mxu1 }
 0x52d   :  { %1876 = vadd.xlane.f32.xlu0 %v4866_v63  ;;  %v1915_v2 = vmul.f32 %v4871_v7, %v4871_v7 }
 0x52e   :  { %v1805_v57 = vpop.f32.mrf.mxu1 }
 0x52f   :  { %1878 = vadd.xlane.f32.xlu1 %v4871_v7  ;;  %v4882_v8 = vadd.f32 %v1805_v57, %v4709_v41  ;;  %v2707_v57 = vld [vmem:[%s5552_s5 + $0x50] sm:$0xff] }
 0x530   :  { %v1807_v23 = vpop.f32.mrf.mxu1  ;;  %3368 = vmatprep.subr.mxu0 %v2707_v57 }
 0x531   :  { %1972 = vadd.xlane.f32.xlu0 %v1914_v21  ;;  %v1916_v46 = vmul.f32 %v4882_v8, %v4882_v8  ;;  %3369 = vmatpush3.msra.mxu0 %v2707_v57 }
 0x532   :  { %v1810_v4 = vpop.f32.mrf.mxu1 }
 0x533   :  { %1974 = vadd.xlane.f32.xlu1 %v1915_v2  ;;  %v4894_v62 = vadd.f32 %v1810_v4, %v4709_v41 }
 0x534   :  { %v1812_v32 = vpop.f32.mrf.mxu1 }
 0x535   :  { %1880 = vadd.xlane.f32.xlu0 %v4882_v8  ;;  %v1917_v33 = vmul.f32 %v4894_v62, %v4894_v62 }
 0x536   :  { %v1815_v52 = vpop.f32.mrf.mxu1 }
 0x537   :  { %1976 = vadd.xlane.f32.xlu1 %v1916_v46  ;;  %v4901_v44 = vadd.f32 %v1815_v52, %v4709_v41 }
 0x538   :  { %v1817_v26 = vpop.f32.mrf.mxu1 }
 0x539   :  { %1882 = vadd.xlane.f32.xlu0 %v4894_v62  ;;  %v1918_v15 = vmul.f32 %v4901_v44, %v4901_v44 }
 0x53a   :  { %v1820_v60 = vpop.f32.mrf.mxu1 }
 0x53b   :  { %1884 = vadd.xlane.f32.xlu1 %v4901_v44  ;;  %v4909_v16 = vadd.f32 %v1820_v60, %v4709_v41  ;;  %v2242_v60 = vsub.s32 4, %v4061_v38 }
 0x53c   :  { %v1822_v24 = vpop.f32.mrf.mxu1 }
 0x53d   :  { %1978 = vadd.xlane.f32.xlu0 %v1917_v33  ;;  %v1919_v3 = vmul.f32 %v4909_v16, %v4909_v16 }
 0x53f   :  { %1982 = vadd.xlane.f32.xlu1 %v1919_v3 }
 0x541   :  { %1886 = vadd.xlane.f32.xlu0 %v4909_v16 }
 0x545   :  { %1980 = vadd.xlane.f32.xlu0 %v1918_v15 }
 0x54a   :  { %v1825_v29 = vpop.xlane.xlu0 %1824 }
 0x54b   :  { %v1984_v54 = vmul.f32 0.03125, %v1825_v29  ;;  %v2278_v29 = vsub.s32 5, %v4061_v38 }
 0x54c   :  { %v1921_v37 = vpop.xlane.xlu1 %1920 }
 0x54d   :  { %v2048_v41 = vmul.f32 %v1984_v54, %v1984_v54  ;;  %v2016_v55 = vmul.f32 0.03125, %v1921_v37 }
 0x54f   :  { %v2080_v27 = vsub.f32 %v2016_v55, %v2048_v41 }
 0x550   :  { %v1923_v1 = vpop.xlane.xlu0 %1922  ;;  %v1827_v25 = vpop.xlane.xlu1 %1826 }
 0x551   :  { %v2112_v30 = vadd.f32 1e-05, %v2080_v27  ;;  %v1985_v31 = vmul.f32 0.03125, %v1827_v25  ;;  %v2017_v58 = vmul.f32 0.03125, %v1923_v1  ;;  %v2176_v27 = vsub.f32 %v4712_v20, %v1984_v54 }
 0x552   :  { %v4935_v1 = vrot.slane %v4706_v11, %v2242_v60  ;;  %v2706_v60 = vld [vmem:[%s5552_s5 + $0x48] sm:$0xff] }
 0x553   :  { %3570 = vrsqrt.f32 %v2112_v30  ;;  %v2049_v53 = vmul.f32 %v1985_v31, %v1985_v31  ;;  %3370 = vmatprep.subr.mxu0 %v2706_v60 }
 0x554   :  { %v1829_v21 = vpop.xlane.xlu0 %1828  ;;  %v1925_v2 = vpop.xlane.xlu1 %1924  ;;  %3371 = vmatpush3.msra.mxu0 %v2706_v60  ;;  %v2702_v60 = vld [vmem:[%s5552_s5 + $0x28] sm:$0xff] }
 0x555   :  { %v2081_v23 = vsub.f32 %v2017_v58, %v2049_v53  ;;  %v4921_v4 = vmul.f32 0.03125, %v1829_v21  ;;  %v2018_v32 = vmul.f32 0.03125, %v1925_v2  ;;  %v4938_v58 = vrot.slane %v4706_v11, %v2278_v29 }
 0x556   :  { %v2177_v11 = vsub.f32 %v4718_v0, %v1985_v31 }
 0x557   :  { %v2113_v46 = vadd.f32 1e-05, %v2081_v23  ;;  %v2050_v5 = vmul.f32 %v4921_v4, %v4921_v4 }
 0x558   :  { %v1831_v42 = vpop.xlane.xlu1 %1830  ;;  %v1927_v52 = vpop.xlane.xlu0 %1926 }
 0x559   :  { %3572 = vrsqrt.f32 %v2113_v46  ;;  %v2082_v36 = vsub.f32 %v2018_v32, %v2050_v5  ;;  %v4925_v26 = vmul.f32 0.03125, %v1831_v42  ;;  %v2019_v3 = vmul.f32 0.03125, %v1927_v52 }
 0x55b   :  { %v2114_v33 = vadd.f32 1e-05, %v2082_v36  ;;  %v2051_v24 = vmul.f32 %v4925_v26, %v4925_v26 }
 0x55c   :  { %v1833_v15 = vpop.xlane.xlu1 %1832 }
 0x55d   :  { %3574 = vrsqrt.f32 %v2114_v33  ;;  %v2083_v37 = vsub.f32 %v2019_v3, %v2051_v24  ;;  %v4931_v41 = vmul.f32 0.03125, %v1833_v15 }
 0x55e   :  { %v1835_v55 = vpop.xlane.xlu0 %1834 }
 0x55f   :  { %v2115_v25 = vadd.f32 1e-05, %v2083_v37  ;;  %v4940_v21 = vmul.f32 0.03125, %v1835_v55  ;;  %v2052_v2 = vmul.f32 %v4931_v41, %v4931_v41  ;;  %v2705_v37 = vld [vmem:[%s5552_s5 + $0x40] sm:$0xff] }
 0x560   :  { %v3571_v30 = vpop.eup %3570  ;;  %v1929_v57 = vpop.xlane.xlu1 %1928  ;;  %3372 = vmatprep.subr.mxu0 %v2705_v37 }
 0x561   :  { %v2208_v53 = vmul.f32 %v3571_v30, %v2176_v27  ;;  %3576 = vrsqrt.f32 %v2115_v25  ;;  %v2020_v23 = vmul.f32 0.03125, %v1929_v57  ;;  %v2053_v52 = vmul.f32 %v4940_v21, %v4940_v21  ;;  %3373 = vmatpush3.msra.mxu0 %v2705_v37 }
 0x562   :  { %v1837_v46 = vpop.xlane.xlu0 %1836  ;;  %v2178_v30 = vsub.f32 %v4723_v56, %v4921_v4  ;;  %v2703_v56 = vld [vmem:[%s5552_s5 + $0x30] sm:$0xff] }
 0x563   :  { %v2244_v20 = vmul.f32 %v4935_v1, %v2208_v53  ;;  %v2084_v54 = vsub.f32 %v2020_v23, %v2052_v2  ;;  %v4945_v5 = vmul.f32 0.03125, %v1837_v46  ;;  %v2704_v53 = vld [vmem:[%s5552_s5 + $0x38] sm:$0xff] }
 0x564   :  { %v1931_v32 = vpop.xlane.xlu1 %1930  ;;  %3374 = vmatprep.subr.mxu0 %v2704_v53 }
 0x565   :  { %v4948_v42 = vadd.f32 %v4938_v58, %v2244_v20  ;;  %v2021_v36 = vmul.f32 0.03125, %v1931_v32  ;;  %v2116_v24 = vadd.f32 1e-05, %v2084_v54  ;;  %v2054_v0 = vmul.f32 %v4945_v5, %v4945_v5  ;;  %3375 = vmatpush3.msra.mxu0 %v2704_v53 }
 0x566   :  { %v3573_v33 = vpop.eup %3572  ;;  %v1933_v3 = vpop.xlane.xlu0 %1932  ;;  %3376 = vmatprep.subr.mxu0 %v2703_v56 }
 0x567   :  { %v2209_v15 = vmul.f32 %v3573_v33, %v2177_v11  ;;  %v2085_v29 = vsub.f32 %v2021_v36, %v2053_v52  ;;  %3578 = vrsqrt.f32 %v2116_v24  ;;  %v2022_v31 = vmul.f32 0.03125, %v1933_v3  ;;  %3377 = vmatpush3.msra.mxu0 %v2703_v56 }
 0x568   :  { %v1839_v55 = vpop.xlane.xlu1 %1838  ;;  %v2344_v27 = vmul.f32 0.70710677, %v4948_v42  ;;  %v2179_v36 = vsub.f32 %v4729_v47, %v4925_v26  ;;  %3378 = vmatprep.subr.mxu0 %v2702_v60  ;;  %v2701_v47 = vld [vmem:[%s5552_s5 + $0x20] sm:$0xff] }
 0x569   :  { %v2245_v25 = vmul.f32 %v4935_v1, %v2209_v15  ;;  %v2117_v57 = vadd.f32 1e-05, %v2085_v29  ;;  %v2086_v23 = vsub.f32 %v2022_v31, %v2054_v0  ;;  %v4968_v46 = vmul.f32 0.03125, %v1839_v55  ;;  %3379 = vmatpush3.msra.mxu0 %v2702_v60  ;;  %v2700_v31 = vld [vmem:[%s5552_s5 + $0x18] sm:$0xff]  ;;  %v2699_v55 = vld [vmem:[%s5552_s5 + $0x10] sm:$0xff] }
 0x56a   :  { %v3575_v2 = vpop.eup %3574  ;;  %3380 = vmatprep.subr.mxu0 %v2701_v47 }
 0x56b   :  { %v4971_v20 = vadd.f32 %v4938_v58, %v2245_v25  ;;  %v2210_v54 = vmul.f32 %v3575_v2, %v2178_v30  ;;  %3580 = vrsqrt.f32 %v2117_v57  ;;  %v2118_v4 = vadd.f32 1e-05, %v2086_v23  ;;  %3381 = vmatpush3.msra.mxu0 %v2701_v47  ;;  %v2698_v2 = vld [vmem:[%s5552_s5 + $0x8] sm:$0xff] }
 0x56c   :  { %v1937_v32 = vpop.xlane.xlu0 %1936  ;;  %v1935_v11 = vpop.xlane.xlu1 %1934  ;;  %3582 = verf.f32 %v2344_v27  ;;  %v2055_v24 = vmul.f32 %v4968_v46, %v4968_v46  ;;  %3382 = vmatprep.subr.mxu0 %v2700_v31  ;;  %v2180_v23 = vsub.f32 %v4736_v34, %v4931_v41 }
 0x56d   :  { %v2345_v52 = vmul.f32 0.70710677, %v4971_v20  ;;  %3584 = vrsqrt.f32 %v2118_v4  ;;  %v2023_v3 = vmul.f32 0.03125, %v1935_v11  ;;  %v2246_v15 = vmul.f32 %v4935_v1, %v2210_v54  ;;  %3383 = vmatpush3.msra.mxu0 %v2700_v31 }
 0x56e   :  { %v3577_v33 = vpop.eup %3576  ;;  %v2024_v54 = vmul.f32 0.03125, %v1937_v32  ;;  %3384 = vmatprep.subr.mxu0 %v2699_v55 }
 0x56f   :  { %3586 = verf.f32 %v2345_v52  ;;  %v2211_v29 = vmul.f32 %v3577_v33, %v2179_v36  ;;  %v2087_v26 = vsub.f32 %v2023_v3, %v2055_v24  ;;  %v5000_v53 = vadd.f32 %v4938_v58, %v2246_v15  ;;  %3385 = vmatpush3.msra.mxu0 %v2699_v55  ;;  %v2697_v33 = vld [vmem:[%s5552_s5] sm:$0xff] }
 0x570   :  { %v1843_v37 = vpop.xlane.xlu0 %1842  ;;  %v1841_v0 = vpop.xlane.xlu1 %1840  ;;  %3386 = vmatprep.subr.mxu0 %v2698_v2  ;;  %v2181_v15 = vsub.f32 %v4739_v59, %v4940_v21 }
 0x571   :  { %v2247_v27 = vmul.f32 %v4935_v1, %v2211_v29  ;;  %v2119_v25 = vadd.f32 1e-05, %v2087_v26  ;;  %v4995_v30 = vmul.f32 0.03125, %v1843_v37  ;;  %v4997_v57 = vmul.f32 0.03125, %v1841_v0  ;;  %3387 = vmatpush3.msra.mxu0 %v2698_v2 }
 0x572   :  { %v2346_v3 = vmul.f32 0.70710677, %v5000_v53  ;;  %v2182_v29 = vsub.f32 %v4746_v61, %v4945_v5  ;;  %v2312_v26 = vmul.f32 0.5, %v4948_v42  ;;  %3388 = vmatprep.subr.mxu0 %v2697_v33 }
 0x573   :  { %3588 = vrsqrt.f32 %v2119_v25  ;;  %v2056_v56 = vmul.f32 %v4997_v57, %v4997_v57  ;;  %v5015_v24 = vadd.f32 %v4938_v58, %v2247_v27  ;;  %v2057_v41 = vmul.f32 %v4995_v30, %v4995_v30  ;;  %3389 = vmatpush3.msra.mxu0 %v2697_v33 }
 0x574   :  { %v1845_v4 = vpop.xlane.xlu0 %1844  ;;  %v1939_v11 = vpop.xlane.xlu1 %1938 }
 0x575   :  { %v3579_v52 = vpop.eup %3578  ;;  %v5009_v36 = vmul.f32 0.03125, %v1845_v4  ;;  %v2025_v60 = vmul.f32 0.03125, %v1939_v11  ;;  %v2088_v32 = vsub.f32 %v2024_v54, %v2056_v56  ;;  %v2347_v21 = vmul.f32 0.70710677, %v5015_v24 }
 0x576   :  { %v2212_v34 = vmul.f32 %v3579_v52, %v2180_v23  ;;  %v2183_v4 = vsub.f32 %v4754_v48, %v4968_v46 }
 0x577   :  { %v2120_v0 = vadd.f32 1e-05, %v2088_v32  ;;  %v2089_v31 = vsub.f32 %v2025_v60, %v2057_v41  ;;  %v2058_v23 = vmul.f32 %v5009_v36, %v5009_v36  ;;  %v2313_v60 = vmul.f32 0.5, %v4971_v20 }
 0x578   :  { %v3581_v47 = vpop.eup %3580  ;;  %v2248_v37 = vmul.f32 %v4935_v1, %v2212_v34  ;;  %v1847_v55 = vpop.xlane.xlu0 %1846 }
 0x579   :  { %v1941_v27 = vpop.xlane.xlu1 %1940  ;;  %v2213_v25 = vmul.f32 %v3581_v47, %v2181_v15  ;;  %v5028_v54 = vmul.f32 0.03125, %v1847_v55  ;;  %v3583_v61 = vpop.eup %3582  ;;  %3590 = vrsqrt.f32 %v2120_v0  ;;  %v2121_v42 = vadd.f32 1e-05, %v2089_v31 }
 0x57a   :  { %v2026_v59 = vmul.f32 0.03125, %v1941_v27  ;;  %v2284_v5 = vadd.f32 %v4938_v58, %v2248_v37  ;;  %v3585_v2 = vpop.eup %3584  ;;  %3592 = verf.f32 %v2346_v3  ;;  %v2408_v31 = vadd.f32 1.0, %v3583_v61 }
 0x57b   :  { %v2249_v56 = vmul.f32 %v4935_v1, %v2213_v25  ;;  %v2214_v34 = vmul.f32 %v3585_v2, %v2182_v29  ;;  %3594 = vrsqrt.f32 %v2121_v42  ;;  %v2059_v33 = vmul.f32 %v5028_v54, %v5028_v54 }
 0x57c   :  { %v2090_v11 = vsub.f32 %v2026_v59, %v2058_v23  ;;  %v3587_v52 = vpop.eup %3586  ;;  %v1943_v41 = vpop.xlane.xlu0 %1942  ;;  %3596 = verf.f32 %v2347_v21  ;;  %v2348_v0 = vmul.f32 0.70710677, %v2284_v5  ;;  %v5043_v55 = vmul.f32 0.5, %v5000_v53 }
 0x57d   :  { %v1849_v32 = vpop.xlane.xlu1 %1848  ;;  %v2409_v15 = vadd.f32 1.0, %v3587_v52  ;;  %v2027_v37 = vmul.f32 0.03125, %v1943_v41  ;;  %v2250_v48 = vmul.f32 %v4935_v1, %v2214_v34  ;;  %v2285_v46 = vadd.f32 %v4938_v58, %v2249_v56 }
 0x57e   :  { %v2122_v47 = vadd.f32 1e-05, %v2090_v11  ;;  %v5038_v3 = vmul.f32 0.03125, %v1849_v32  ;;  %v2185_v27 = vsub.f32 %v4765_v22, %v4995_v30  ;;  %v5052_v34 = vmul.f32 %v2408_v31, %v2312_v26 }
 0x57f   :  { %v2441_v20 = vmul.f32 %v2409_v15, %v2313_v60  ;;  %v2091_v29 = vsub.f32 %v2027_v37, %v2059_v33  ;;  %v2286_v59 = vadd.f32 %v4938_v58, %v2250_v48  ;;  %v2349_v21 = vmul.f32 0.70710677, %v2285_v46 }
 0x580   :  { %3598 = vrsqrt.f32 %v2122_v47  ;;  %v1945_v25 = vpop.xlane.xlu0 %1944  ;;  %v3589_v42 = vpop.eup %3588  ;;  %v2060_v61 = vmul.f32 %v5038_v3, %v5038_v3  ;;  %v5055_v33 = vmul.f32 0.5, %v5015_v24  ;;  %v2184_v41 = vsub.f32 %v4757_v18, %v4997_v57 }
 0x581   :  { %v1851_v23 = vpop.xlane.xlu1 %1850  ;;  %v2478_v2 = vrot.slane %v2441_v20, 4  ;;  %v2123_v11 = vadd.f32 1e-05, %v2091_v29  ;;  %v2028_v56 = vmul.f32 0.03125, %v1945_v25  ;;  %3600 = verf.f32 %v2348_v0 }
 0x582   :  { %v2215_v52 = vmul.f32 %v3589_v42, %v2183_v4  ;;  %v5050_v60 = vmul.f32 0.03125, %v1851_v23  ;;  %v2350_v53 = vmul.f32 0.70710677, %v2286_v59  ;;  %v2186_v48 = vsub.f32 %v4770_v50, %v5009_v36 }
 0x583   :  { %v2479_v22 = vadd.f32 %v2478_v2, %v2441_v20  ;;  %3602 = vrsqrt.f32 %v2123_v11  ;;  %v2092_v30 = vsub.f32 %v2028_v56, %v2060_v61  ;;  %v2187_v57 = vsub.f32 %v4776_v28, %v5028_v54 }
 0x584   :  { %v1853_v32 = vpop.xlane.xlu0 %1852  ;;  %v2251_v47 = vmul.f32 %v4935_v1, %v2215_v52  ;;  %3604 = verf.f32 %v2349_v21  ;;  %v2061_v24 = vmul.f32 %v5050_v60, %v5050_v60  ;;  %v5071_v20 = vmul.f32 0.5, %v2284_v5 }
 0x585   :  { %v1947_v15 = vpop.xlane.xlu1 %1946  ;;  %v2480_v4 = vrot.slane %v2479_v22, 2  ;;  %v2124_v37 = vadd.f32 1e-05, %v2092_v30  ;;  %v5060_v0 = vmul.f32 0.03125, %v1853_v32  ;;  %3606 = verf.f32 %v2350_v53 }
 0x586   :  { %v2029_v26 = vmul.f32 0.03125, %v1947_v15  ;;  %v5067_v31 = vadd.f32 %v4938_v58, %v2251_v47  ;;  %v3591_v18 = vpop.eup %3590  ;;  %v2472_v29 = vrot.slane %v5052_v34, 4  ;;  %v2188_v50 = vsub.f32 %v4782_v14, %v5038_v3 }
 0x587   :  { %3608 = vrsqrt.f32 %v2124_v37  ;;  %v3593_v25 = vpop.eup %3592  ;;  %v2481_v23 = vadd.f32 %v2480_v4, %v2479_v22  ;;  %v2216_v21 = vmul.f32 %v3591_v18, %v2184_v41  ;;  %v2062_v61 = vmul.f32 %v5060_v0, %v5060_v0 }
 0x588   :  { %v2093_v36 = vsub.f32 %v2029_v26, %v2061_v24  ;;  %v1949_v42 = vpop.xlane.xlu0 %1948  ;;  %v3595_v11 = vpop.eup %3594  ;;  %v5078_v28 = vmul.f32 0.5, %v2285_v46  ;;  %v2351_v54 = vmul.f32 0.70710677, %v5067_v31  ;;  %v2189_v41 = vsub.f32 %v4788_v10, %v5050_v60 }
 0x589   :  { %v1855_v2 = vpop.xlane.xlu1 %1854  ;;  %v2030_v56 = vmul.f32 0.03125, %v1949_v42  ;;  %v2252_v5 = vmul.f32 %v4935_v1, %v2216_v21  ;;  %v2217_v52 = vmul.f32 %v3595_v11, %v2185_v27  ;;  %v3597_v30 = vpop.eup %3596  ;;  %v5086_v15 = vmul.f32 0.5, %v2286_v59 }
 0x58a   :  { %v2125_v53 = vadd.f32 1e-05, %v2093_v36  ;;  %v5082_v22 = vmul.f32 0.03125, %v1855_v2  ;;  %v2410_v47 = vadd.f32 1.0, %v3593_v25  ;;  %v2482_v37 = vrot.slane %v2481_v23, 1 }
 0x58b   :  { %v2094_v32 = vsub.f32 %v2030_v56, %v2062_v61  ;;  %v2288_v46 = vadd.f32 %v4938_v58, %v2252_v5  ;;  %v2253_v26 = vmul.f32 %v4935_v1, %v2217_v52  ;;  %v2411_v56 = vadd.f32 1.0, %v3597_v30 }
 0x58c   :  { %3610 = vrsqrt.f32 %v2125_v53  ;;  %v1857_v24 = vpop.xlane.xlu0 %1856  ;;  %v2063_v59 = vmul.f32 %v5082_v22, %v5082_v22  ;;  %v5097_v5 = vmul.f32 %v2410_v47, %v5043_v55  ;;  %v2483_v52 = vadd.f32 %v2482_v37, %v2481_v23 }
 0x58d   :  { %v3599_v4 = vpop.eup %3598  ;;  %v1951_v27 = vpop.xlane.xlu1 %1950  ;;  %v2126_v21 = vadd.f32 1e-05, %v2094_v32  ;;  %v5090_v36 = vmul.f32 0.03125, %v1857_v24  ;;  %3612 = verf.f32 %v2351_v54  ;;  %v2352_v42 = vmul.f32 0.70710677, %v2288_v46 }
 0x58e   :  { %v2218_v18 = vmul.f32 %v3599_v4, %v2186_v48  ;;  %v2289_v2 = vadd.f32 %v4938_v58, %v2253_v26  ;;  %v2031_v25 = vmul.f32 0.03125, %v1951_v27  ;;  %v3601_v11 = vpop.eup %3600  ;;  %v2190_v55 = vsub.f32 %v4794_v19, %v5060_v0 }
 0x58f   :  { %3614 = vrsqrt.f32 %v2126_v21  ;;  %v2064_v27 = vmul.f32 %v5090_v36, %v5090_v36  ;;  %v5105_v23 = vadd.f32 %v2472_v29, %v5052_v34  ;;  %v2412_v0 = vadd.f32 1.0, %v3601_v11 }
 0x590   :  { %v2254_v61 = vmul.f32 %v4935_v1, %v2218_v18  ;;  %v3603_v48 = vpop.eup %3602  ;;  %3616 = verf.f32 %v2352_v42  ;;  %v2353_v53 = vmul.f32 0.70710677, %v2289_v2  ;;  %v2095_v54 = vsub.f32 %v2031_v25, %v2063_v59  ;;  %v1955_v32 = vpop.xlane.xlu0 %1954 }
 0x591   :  { %v1953_v4 = vpop.xlane.xlu1 %1952  ;;  %v3605_v26 = vpop.eup %3604  ;;  %v2219_v39 = vmul.f32 %v3603_v48, %v2187_v57  ;;  %v5109_v59 = vmul.f32 0.5, %v5067_v31  ;;  %v5111_v25 = vmul.f32 0.125, %v2483_v52  ;;  %v5116_v34 = vmul.f32 %v2411_v56, %v5055_v33 }
 0x592   :  { %v2290_v24 = vadd.f32 %v4938_v58, %v2254_v61  ;;  %v2032_v18 = vmul.f32 0.03125, %v1953_v4  ;;  %3618 = verf.f32 %v2353_v53  ;;  %v2127_v30 = vadd.f32 1e-05, %v2095_v54  ;;  %v3607_v47 = vpop.eup %3606 }
 0x593   :  { %v2255_v21 = vmul.f32 %v4935_v1, %v2219_v39  ;;  %v2320_v53 = vmul.f32 0.5, %v2288_v46  ;;  %v2413_v11 = vadd.f32 1.0, %v3605_v26  ;;  %v2474_v60 = vrot.slane %v5105_v23, 2 }
 0x594   :  { %v2354_v37 = vmul.f32 0.70710677, %v2290_v24  ;;  %v2096_v42 = vsub.f32 %v2032_v18, %v2064_v27  ;;  %v3609_v57 = vpop.eup %3608  ;;  %v1861_v48 = vpop.xlane.xlu0 %1860  ;;  %v2414_v27 = vadd.f32 1.0, %v3607_v47  ;;  %v2033_v18 = vmul.f32 0.03125, %v1955_v32 }
 0x595   :  { %v1859_v19 = vpop.xlane.xlu1 %1858  ;;  %v2291_v29 = vadd.f32 %v4938_v58, %v2255_v21  ;;  %v2220_v39 = vmul.f32 %v3609_v57, %v2188_v50  ;;  %v5122_v52 = vmul.f32 0.03125, %v1861_v48  ;;  %v5133_v47 = vmul.f32 0.5, %v2290_v24 }
 0x596   :  { %3620 = verf.f32 %v2354_v37  ;;  %v2128_v31 = vadd.f32 1e-05, %v2096_v42  ;;  %v5124_v54 = vmul.f32 0.03125, %v1859_v19  ;;  %v5141_v19 = vmul.f32 %v2412_v0, %v5071_v20 }
 0x597   :  { %3622 = vrsqrt.f32 %v2127_v30  ;;  %v2355_v4 = vmul.f32 0.70710677, %v2291_v29  ;;  %v2256_v33 = vmul.f32 %v4935_v1, %v2220_v39  ;;  %v2321_v30 = vmul.f32 0.5, %v2289_v2 }
 0x598   :  { %3624 = vrsqrt.f32 %v2128_v31  ;;  %v2065_v14 = vmul.f32 %v5124_v54, %v5124_v54  ;;  %v1957_v3 = vpop.xlane.xlu0 %1956  ;;  %v2066_v37 = vmul.f32 %v5122_v52, %v5122_v52  ;;  %v5144_v2 = vmul.f32 %v2413_v11, %v5078_v28 }
 0x599   :  { %v1863_v50 = vpop.xlane.xlu1 %1862  ;;  %v3611_v46 = vpop.eup %3610  ;;  %3626 = verf.f32 %v2355_v4  ;;  %v2034_v21 = vmul.f32 0.03125, %v1957_v3  ;;  %v5147_v39 = vmul.f32 %v2414_v27, %v5086_v15  ;;  %v2292_v24 = vadd.f32 %v4938_v58, %v2256_v33 }
 0x59a   :  { %v3613_v26 = vpop.eup %3612  ;;  %v2221_v42 = vmul.f32 %v3611_v46, %v2189_v41  ;;  %v2097_v32 = vsub.f32 %v2033_v18, %v2065_v14  ;;  %v5138_v57 = vmul.f32 0.03125, %v1863_v50  ;;  %v5157_v50 = vmul.f32 0.5, %v2291_v29 }
 0x59b   :  { %v2098_v48 = vsub.f32 %v2034_v21, %v2066_v37  ;;  %v5173_v41 = vmul.f32 0.5, %v2292_v24 }
 0x59c   :  { %v3615_v31 = vpop.eup %3614  ;;  %v2129_v4 = vadd.f32 1e-05, %v2097_v32  ;;  %v1865_v3 = vpop.xlane.xlu0 %1864  ;;  %v2257_v20 = vmul.f32 %v4935_v1, %v2221_v42  ;;  %v2067_v15 = vmul.f32 %v5138_v57, %v5138_v57  ;;  %v2193_v42 = vsub.f32 %v4811_v43, %v5124_v54 }
 0x59d   :  { %v1959_v10 = vpop.xlane.xlu1 %1958  ;;  %v3617_v18 = vpop.eup %3616  ;;  %v2222_v0 = vmul.f32 %v3615_v31, %v2190_v55  ;;  %v2130_v14 = vadd.f32 1e-05, %v2098_v48  ;;  %v5153_v28 = vmul.f32 0.03125, %v1865_v3 }
 0x59e   :  { %v2416_v11 = vadd.f32 1.0, %v3617_v18  ;;  %3628 = vrsqrt.f32 %v2129_v4  ;;  %v2035_v27 = vmul.f32 0.03125, %v1959_v10  ;;  %v2356_v4 = vmul.f32 0.70710677, %v2292_v24 }
 0x59f   :  { %v3619_v33 = vpop.eup %3618  ;;  %v2258_v46 = vmul.f32 %v4935_v1, %v2222_v0  ;;  %3630 = vrsqrt.f32 %v2130_v14  ;;  %v5165_v3 = vadd.f32 %v4938_v58, %v2257_v20  ;;  %v2068_v29 = vmul.f32 %v5153_v28, %v5153_v28 }
 0x5a0   :  { %v2448_v21 = vmul.f32 %v2416_v11, %v2320_v53  ;;  %v2417_v55 = vadd.f32 1.0, %v3619_v33  ;;  %v2099_v32 = vsub.f32 %v2035_v27, %v2067_v15  ;;  %v1961_v48 = vpop.xlane.xlu0 %1960  ;;  %v2415_v53 = vadd.f32 1.0, %v3613_v26 }
 0x5a1   :  { %v1867_v31 = vpop.xlane.xlu1 %1866  ;;  %v2036_v10 = vmul.f32 0.03125, %v1961_v48  ;;  %v5170_v14 = vadd.f32 %v4938_v58, %v2258_v46  ;;  %v2475_v11 = vadd.f32 %v2474_v60, %v5105_v23  ;;  %v2195_v48 = vsub.f32 %v4824_v6, %v5138_v57 }
 0x5a2   :  { %v2520_v0 = vrot.slane %v2448_v21, 4  ;;  %v2449_v54 = vmul.f32 %v2417_v55, %v2321_v30  ;;  %v2131_v27 = vadd.f32 1e-05, %v2099_v32  ;;  %v5177_v61 = vmul.f32 0.03125, %v1867_v31 }
 0x5a3   :  { %v3621_v18 = vpop.eup %3620  ;;  %v2100_v33 = vsub.f32 %v2036_v10, %v2068_v29  ;;  %3632 = verf.f32 %v2356_v4  ;;  %v2357_v26 = vmul.f32 0.70710677, %v5165_v3  ;;  %v5561_v23 = vsub.f32 %v4806_v13, %v5090_v36 }
 0x5a4   :  { %v3623_v43 = vpop.eup %3622  ;;  %v2418_v15 = vadd.f32 1.0, %v3621_v18  ;;  %v2521_v20 = vadd.f32 %v2520_v0, %v2448_v21  ;;  %v1963_v56 = vpop.xlane.xlu0 %1962  ;;  %v2358_v24 = vmul.f32 0.70710677, %v5170_v14  ;;  %v5562_v21 = vsub.f32 %v4800_v35, %v5082_v22 }
 0x5a5   :  { %v3625_v37 = vpop.eup %3624  ;;  %v1869_v46 = vpop.xlane.xlu1 %1868  ;;  %v2132_v60 = vadd.f32 1e-05, %v2100_v33  ;;  %3634 = vrsqrt.f32 %v2131_v27  ;;  %v2526_v31 = vrot.slane %v2449_v54, 4  ;;  %v2069_v13 = vmul.f32 %v5177_v61, %v5177_v61 }
 0x5a6   :  { %v2224_v30 = vmul.f32 %v3625_v37, %v5561_v23  ;;  %v3627_v55 = vpop.eup %3626  ;;  %v2522_v32 = vrot.slane %v2521_v20, 2  ;;  %v2223_v29 = vmul.f32 %v3623_v43, %v5562_v21  ;;  %v5188_v10 = vmul.f32 %v2418_v15, %v5133_v47 }
 0x5a7   :  { %3636 = vrsqrt.f32 %v2132_v60  ;;  %v2419_v18 = vadd.f32 1.0, %v3627_v55  ;;  %v2037_v36 = vmul.f32 0.03125, %v1963_v56  ;;  %v2476_v0 = vrot.slane %v2475_v11, 1 }
 0x5a8   :  { %v2260_v4 = vmul.f32 %v4935_v1, %v2224_v30  ;;  %3638 = verf.f32 %v2357_v26  ;;  %v2196_v35 = vsub.f32 %v4830_v12, %v5153_v28  ;;  %v5199_v22 = vmul.f32 %v2415_v53, %v5109_v59  ;;  %v1871_v56 = vpop.xlane.xlu0 %1870 }
 0x5a9   :  { %v1965_v37 = vpop.xlane.xlu1 %1964  ;;  %v2523_v47 = vadd.f32 %v2522_v32, %v2521_v20  ;;  %v5202_v43 = vmul.f32 %v4935_v1, %v2223_v29  ;;  %v2101_v15 = vsub.f32 %v2037_v36, %v2069_v13  ;;  %v5204_v27 = vmul.f32 0.03125, %v1869_v46 }
 0x5aa   :  { %v5194_v33 = vadd.f32 %v4938_v58, %v2260_v4  ;;  %v5206_v30 = vadd.f32 %v2526_v31, %v2449_v54  ;;  %3640 = verf.f32 %v2358_v24  ;;  %v5212_v59 = vmul.f32 %v2419_v18, %v5157_v50 }
 0x5ab   :  { %v3629_v23 = vpop.eup %3628  ;;  %v5215_v60 = vadd.f32 %v2476_v0, %v2475_v11  ;;  %v5219_v55 = vmul.f32 0.03125, %v1871_v56  ;;  %v2038_v54 = vmul.f32 0.03125, %v1965_v37  ;;  %v5564_v32 = vrot.slane %v5097_v5, 4 }
 0x5ac   :  { %v3631_v28 = vpop.eup %3630  ;;  %v2360_v53 = vmul.f32 0.70710677, %v5194_v33  ;;  %v2225_v20 = vmul.f32 %v3629_v23, %v2193_v42  ;;  %v2490_v21 = vrot.slane %v5116_v34, 4  ;;  %v2524_v29 = vrot.slane %v2523_v47, 1 }
 0x5ad   :  { %v5217_v46 = vpop.xlane.xlu1 %1966  ;;  %5563 = vst [vmem:[#allocation12_spill] sm:$0xff] %v5219_v55  ;;  %v2485_v24 = vadd.f32 %v5564_v32, %v5097_v5  ;;  %v2133_v31 = vadd.f32 1e-05, %v2101_v15  ;;  %v2070_v42 = vmul.f32 %v5204_v27, %v5204_v27  ;;  %v5565_v4 = vsub.f32 %v4819_v51, %v5122_v52 }
 0x5ae   :  { %v2261_v50 = vmul.f32 %v4935_v1, %v2225_v20  ;;  %v5228_v11 = vpop.xlane.xlu0 %1874  ;;  %v2491_v36 = vadd.f32 %v2490_v21, %v5116_v34  ;;  %v2496_v5 = vrot.slane %v5141_v19, 4  ;;  %3642 = verf.f32 %v2360_v53 }
 0x5af   :  { %v2226_v18 = vmul.f32 %v3631_v28, %v5565_v4  ;;  %v2486_v13 = vrot.slane %v2485_v24, 2  ;;  %v2502_v0 = vrot.slane %v5144_v2, 4  ;;  %v2508_v15 = vrot.slane %v5147_v39, 4 }
 0x5b0   :  { %v5236_v37 = vadd.f32 %v4938_v58, %v2261_v50  ;;  %v2102_v23 = vsub.f32 %v2038_v54, %v2070_v42  ;;  %v2492_v32 = vrot.slane %v2491_v36, 2  ;;  %v2497_v51 = vadd.f32 %v2496_v5, %v5141_v19  ;;  %v5243_v52 = vpop.eup %3632 }
 0x5b1   :  { %v5240_v56 = vpop.xlane.xlu1 %1872  ;;  %v2487_v20 = vadd.f32 %v2486_v13, %v2485_v24  ;;  %3644 = vrsqrt.f32 %v2133_v31  ;;  %v2503_v28 = vadd.f32 %v2502_v0, %v5144_v2  ;;  %v2509_v53 = vadd.f32 %v2508_v15, %v5147_v39 }
 0x5b2   :  { %v2361_v34 = vmul.f32 0.70710677, %v5236_v37  ;;  %v5248_v21 = vpop.xlane.xlu0 %1970  ;;  %v3635_v50 = vpop.eup %3634  ;;  %v2262_v4 = vmul.f32 %v4935_v1, %v2226_v18  ;;  %v2493_v42 = vadd.f32 %v2492_v32, %v2491_v36  ;;  %v2498_v2 = vrot.slane %v2497_v51, 2 }
 0x5b3   :  { %v2488_v24 = vrot.slane %v2487_v20, 1  ;;  %v2227_v31 = vmul.f32 %v3635_v50, %v2195_v48  ;;  %v2504_v13 = vrot.slane %v2503_v28, 2  ;;  %v2525_v5 = vadd.f32 %v2524_v29, %v2523_v47 }
 0x5b4   :  { %v3637_v19 = vpop.eup %3636  ;;  %3646 = verf.f32 %v2361_v34  ;;  %v2134_v18 = vadd.f32 1e-05, %v2102_v23  ;;  %v2494_v15 = vrot.slane %v2493_v42, 1  ;;  %v2499_v32 = vadd.f32 %v2498_v2, %v2497_v51 }
 0x5b5   :  { %v5256_v39 = vpop.xlane.xlu1 %1968  ;;  %v2228_v0 = vmul.f32 %v3637_v19, %v2196_v35  ;;  %v5258_v26 = vpop.eup %3638  ;;  %v2263_v36 = vmul.f32 %v4935_v1, %v2227_v31  ;;  %v2505_v34 = vadd.f32 %v2504_v13, %v2503_v28  ;;  %v2510_v54 = vrot.slane %v2509_v53, 2 }
 0x5b6   :  { %v5261_v6 = vpop.xlane.xlu0 %1876  ;;  %v5264_v57 = vadd.f32 %v4938_v58, %v2262_v4  ;;  %v2489_v47 = vadd.f32 %v2488_v24, %v2487_v20  ;;  %v2514_v35 = vrot.slane %v5199_v22, 4  ;;  %v2495_v23 = vadd.f32 %v2494_v15, %v2493_v42 }
 0x5b7   :  { %v2264_v48 = vmul.f32 %v4935_v1, %v2228_v0  ;;  %v5268_v29 = vpop.eup %3640  ;;  %v2500_v50 = vrot.slane %v2499_v32, 1  ;;  %v2506_v19 = vrot.slane %v2505_v34, 1  ;;  %v2511_v51 = vadd.f32 %v2510_v54, %v2509_v53 }
 0x5b8   :  { %v5271_v28 = vmul.f32 0.5, %v5194_v33  ;;  %v5274_v31 = vadd.f32 %v4938_v58, %v2263_v36  ;;  %v5278_v4 = vmul.f32 %v5219_v55, %v5219_v55  ;;  %v2515_v20 = vadd.f32 %v2514_v35, %v5199_v22 }
 0x5b9   :  { %3648 = vrsqrt.f32 %v2134_v18  ;;  %v2501_v42 = vadd.f32 %v2500_v50, %v2499_v32  ;;  %v2507_v2 = vadd.f32 %v2506_v19, %v2505_v34  ;;  %v1879_v53 = vpop.xlane.xlu1 %1878  ;;  %v2362_v54 = vmul.f32 0.70710677, %v5264_v57 }
 0x5ba   :  { %v1973_v33 = vpop.xlane.xlu0 %1972  ;;  %v2512_v13 = vrot.slane %v2511_v51, 1  ;;  %v2516_v0 = vrot.slane %v2515_v20, 2  ;;  %v2667_v15 = vmul.f32 0.125, %v2489_v47  ;;  %v5284_v36 = vmul.f32 0.125, %v2525_v5 }
 0x5bb   :  { %v5287_v12 = vadd.f32 %v4938_v58, %v2264_v48  ;;  %v2665_v22 = vmul.f32 0.125, %v5215_v60  ;;  %v2668_v35 = vmul.f32 0.125, %v2495_v23  ;;  %v3643_v24 = vpop.eup %3642  ;;  %v2363_v18 = vmul.f32 0.70710677, %v5274_v31 }
 0x5bc   :  { %5566 = vst [vmem:[#allocation13_spill] sm:$0xff] %v5284_v36  ;;  %v2513_v32 = vadd.f32 %v2512_v13, %v2511_v51  ;;  %v2517_v34 = vadd.f32 %v2516_v0, %v2515_v20  ;;  %v2669_v50 = vmul.f32 0.125, %v2501_v42  ;;  %v2329_v19 = vmul.f32 0.5, %v5236_v37 }
 0x5bd   :  { %v2670_v38 = vmul.f32 0.125, %v2507_v2  ;;  %v2750_v47 = vsel %vm2749_vm1, %v5111_v25, %v2665_v22  ;;  %v2039_v5 = vmul.f32 0.03125, %v5217_v46  ;;  %3650 = verf.f32 %v2362_v54  ;;  %v1975_v2 = vpop.xlane.xlu1 %1974 }
 0x5be   :  { %v1881_v36 = vpop.xlane.xlu0 %1880  ;;  %v3645_v48 = vpop.eup %3644  ;;  %v2518_v55 = vrot.slane %v2517_v34, 1  ;;  %v2752_v60 = vsel %vm2751_vm2, %v2667_v15, %v2750_v47  ;;  %v5297_v23 = vmul.f32 0.03125, %v5228_v11  ;;  %v2424_v51 = vadd.f32 1.0, %v3643_v24 }
 0x5bf   :  { %v2671_v20 = vmul.f32 0.125, %v2513_v32  ;;  %v2754_v42 = vsel %vm2753_vm3, %v2668_v35, %v2752_v60  ;;  %v5301_v37 = vmul.f32 0.03125, %v5240_v56  ;;  %3652 = verf.f32 %v2363_v18 }
 0x5c0   :  { %v2364_v46 = vmul.f32 0.70710677, %v5287_v12  ;;  %v2519_v13 = vadd.f32 %v2518_v55, %v2517_v34  ;;  %v2756_v54 = vsel %vm2755_vm4, %v2669_v50, %v2754_v42  ;;  %v5567_v11 = vsub.f32 %v4836_v17, %v5177_v61 }
 0x5c1   :  { %v3647_v25 = vpop.eup %3646  ;;  %v2758_v24 = vsel %vm2757_vm5, %v2670_v38, %v2756_v54  ;;  %v2103_v22 = vsub.f32 %v2039_v5, %v5278_v4  ;;  %v2073_v56 = vmul.f32 %v5297_v23, %v5297_v23  ;;  %v2072_v18 = vmul.f32 %v5301_v37, %v5301_v37 }
 0x5c2   :  { %v2425_v0 = vadd.f32 1.0, %v3647_v25  ;;  %v2229_v15 = vmul.f32 %v3645_v48, %v5567_v11  ;;  %v2672_v35 = vmul.f32 0.125, %v2519_v13  ;;  %v2041_v55 = vmul.f32 0.03125, %v5248_v21  ;;  %v1883_v32 = vpop.xlane.xlu0 %1882 }
 0x5c3   :  { %v2760_v50 = vsel %vm2759_vm6, %v2671_v20, %v2758_v24  ;;  %v2040_v17 = vmul.f32 0.03125, %v5256_v39  ;;  %v5318_v61 = vmul.f32 0.03125, %v5261_v6  ;;  %v5321_v47 = vmul.f32 0.03125, %v1879_v53 }
 0x5c4   :  { %v2457_v34 = vmul.f32 %v2425_v0, %v2329_v19  ;;  %v2762_v38 = vsel %vm2761_vm7, %v2672_v35, %v2760_v50  ;;  %v2105_v4 = vsub.f32 %v2041_v55, %v2073_v56  ;;  %v2042_v5 = vmul.f32 0.03125, %v1973_v33  ;;  %v1977_v19 = vpop.xlane.xlu1 %1976 }
 0x5c5   :  { %3654 = verf.f32 %v2364_v46  ;;  %3390 = vmatprep.mubr.f32.mxu0 %v2762_v38  ;;  %v2104_v60 = vsub.f32 %v2040_v17, %v2072_v18  ;;  %v2074_v21 = vmul.f32 %v5318_v61, %v5318_v61  ;;  %v2135_v42 = vadd.f32 1e-05, %v2103_v22 }
 0x5c6   :  { %v2574_v48 = vrot.slane %v2457_v34, 4  ;;  %v3649_v20 = vpop.eup %3648  ;;  %v2137_v39 = vadd.f32 1e-05, %v2105_v4  ;;  %v2075_v6 = vmul.f32 %v5321_v47, %v5321_v47  ;;  %v2043_v25 = vmul.f32 0.03125, %v1975_v2  ;;  %v1979_v24 = vpop.xlane.xlu0 %1978 }
 0x5c7   :  { %v2136_v54 = vadd.f32 1e-05, %v2104_v60  ;;  %v2106_v53 = vsub.f32 %v2042_v5, %v2074_v21  ;;  %v5327_v0 = vmul.f32 0.03125, %v1881_v36  ;;  %v2044_v46 = vmul.f32 0.03125, %v1977_v19 }
 0x5c8   :  { %v2575_v13 = vadd.f32 %v2574_v48, %v2457_v34  ;;  %3656 = vrsqrt.f32 %v2137_v39  ;;  %v2107_v33 = vsub.f32 %v2043_v25, %v2075_v6  ;;  %v5329_v11 = vmul.f32 0.03125, %v1883_v32  ;;  %v1885_v60 = vpop.xlane.xlu1 %1884 }
 0x5c9   :  { %v5568_v35 = vsub.f32 %v4842_v40, %v5204_v27  ;;  %3658 = vrsqrt.f32 %v2136_v54  ;;  %v2138_v56 = vadd.f32 1e-05, %v2106_v53  ;;  %v2076_v2 = vmul.f32 %v5327_v0, %v5327_v0 }
 0x5ca   :  { %v5337_v18 = vmul.f32 0.5, %v5264_v57  ;;  %v5340_v36 = vmul.f32 0.5, %v5274_v31  ;;  %3660 = vrsqrt.f32 %v2135_v42  ;;  %v2139_v55 = vadd.f32 1e-05, %v2107_v33  ;;  %v5342_v32 = vpop.eup %3650 }
 0x5cb   :  { %v2230_v22 = vmul.f32 %v3649_v20, %v5568_v35  ;;  %v5345_v34 = vmul.f32 %v2424_v51, %v5271_v28  ;;  %v2576_v40 = vrot.slane %v2575_v13, 2  ;;  %3662 = vrsqrt.f32 %v2138_v56 }
 0x5cc   :  { %v2108_v27 = vsub.f32 %v2044_v46, %v2076_v2  ;;  %3664 = vrsqrt.f32 %v2139_v55  ;;  %v2077_v50 = vmul.f32 %v5329_v11, %v5329_v11  ;;  %v2045_v17 = vmul.f32 0.03125, %v1979_v24  ;;  %v5351_v31 = vpop.eup %3652 }
 0x5cd   :  { %v2295_v57 = vadd.f32 %v4938_v58, %v5202_v43  ;;  %v5354_v38 = vmul.f32 %v4935_v1, %v2229_v15  ;;  %v5357_v4 = vmul.f32 %v4935_v1, %v2230_v22  ;;  %v2201_v28 = vsub.f32 %v4856_v49, %v5297_v23  ;;  %v1887_v15 = vpop.xlane.xlu0 %1886 }
 0x5ce   :  { %v2140_v51 = vadd.f32 1e-05, %v2108_v27  ;;  %v2200_v5 = vsub.f32 %v4859_v9, %v5301_v37  ;;  %v2202_v48 = vsub.f32 %v4866_v63, %v5318_v61  ;;  %v2203_v43 = vsub.f32 %v4871_v7, %v5321_v47 }
 0x5cf   :  { %v2109_v21 = vsub.f32 %v2045_v17, %v2077_v50  ;;  %v2577_v19 = vadd.f32 %v2576_v40, %v2575_v13  ;;  %v2204_v20 = vsub.f32 %v4882_v8, %v5327_v0  ;;  %v2325_v49 = vmul.f32 0.5, %v5165_v3 }
 0x5d0   :  { %3666 = vrsqrt.f32 %v2140_v51  ;;  %v2359_v42 = vmul.f32 0.70710677, %v2295_v57  ;;  %v2420_v9 = vadd.f32 1.0, %v5243_v52  ;;  %v2421_v37 = vadd.f32 1.0, %v5258_v26 }
 0x5d1   :  { %v2141_v23 = vadd.f32 1e-05, %v2109_v21  ;;  %v5372_v63 = vmul.f32 0.03125, %v1885_v60  ;;  %v5374_v61 = vmul.f32 0.03125, %v1887_v15  ;;  %v2326_v7 = vmul.f32 0.5, %v5170_v14 }
 0x5d2   :  { %v2422_v47 = vadd.f32 1.0, %v5268_v29  ;;  %v5378_v39 = vpop.eup %3654  ;;  %v2452_v6 = vmul.f32 %v2420_v9, %v5173_v41  ;;  %v2453_v3 = vmul.f32 %v2421_v37, %v2325_v49  ;;  %v5569_v25 = vrot.slane %v5188_v10, 4 }
 0x5d3   :  { %3668 = vrsqrt.f32 %v2141_v23  ;;  %v2578_v13 = vrot.slane %v2577_v19, 1  ;;  %v2538_v54 = vrot.slane %v5212_v59, 4  ;;  %v2205_v14 = vsub.f32 %v4894_v62, %v5329_v11 }
 0x5d4   :  { %v2533_v52 = vadd.f32 %v5569_v25, %v5188_v10  ;;  %3670 = verf.f32 %v2359_v42  ;;  %v2454_v26 = vmul.f32 %v2422_v47, %v2326_v7  ;;  %v5389_v29 = vmul.f32 %v5372_v63, %v5372_v63 }
 0x5d5   :  { %v2544_v53 = vrot.slane %v2452_v6, 4  ;;  %v2550_v33 = vrot.slane %v2453_v3, 4  ;;  %v3657_v41 = vpop.eup %3656  ;;  %v2206_v46 = vsub.f32 %v4901_v44, %v5372_v63  ;;  %v2528_v10 = vrot.slane %v5206_v30, 2 }
 0x5d6   :  { %v2539_v24 = vadd.f32 %v2538_v54, %v5212_v59  ;;  %v2556_v35 = vrot.slane %v2454_v26, 4  ;;  %v3659_v22 = vpop.eup %3658  ;;  %v2233_v56 = vmul.f32 %v3657_v41, %v2201_v28  ;;  %v2534_v2 = vrot.slane %v2533_v52, 2 }
 0x5d7   :  { %v2545_v55 = vadd.f32 %v2544_v53, %v2452_v6  ;;  %v2551_v62 = vadd.f32 %v2550_v33, %v2453_v3  ;;  %v3661_v11 = vpop.eup %3660  ;;  %v2579_v40 = vadd.f32 %v2578_v13, %v2577_v19  ;;  %v2232_v27 = vmul.f32 %v3659_v22, %v2200_v5  ;;  %v5570_v13 = vld [vmem:[#allocation12_spill] sm:$0xff] }
 0x5d8   :  { %v5397_v50 = vmul.f32 %v5374_v61, %v5374_v61  ;;  %v2540_v17 = vrot.slane %v2539_v24, 2  ;;  %v3663_v51 = vpop.eup %3662  ;;  %v2269_v60 = vmul.f32 %v4935_v1, %v2233_v56  ;;  %v2207_v59 = vsub.f32 %v4909_v16, %v5374_v61 }
 0x5d9   :  { %v2327_v21 = vmul.f32 0.5, %v2295_v57  ;;  %v2546_v15 = vrot.slane %v2545_v55, 2  ;;  %v3665_v28 = vpop.eup %3664  ;;  %v2268_v49 = vmul.f32 %v4935_v1, %v2232_v27  ;;  %v2234_v23 = vmul.f32 %v3663_v51, %v2202_v48  ;;  %v1981_v27 = vpop.xlane.xlu0 %1980 }
 0x5da   :  { %v2552_v42 = vrot.slane %v2551_v62, 2  ;;  %v2557_v19 = vadd.f32 %v2556_v35, %v2454_v26  ;;  %v2305_v5 = vadd.f32 %v4938_v58, %v2269_v60  ;;  %v2235_v9 = vmul.f32 %v3665_v28, %v2203_v43  ;;  %v1983_v43 = vpop.xlane.xlu1 %1982 }
 0x5db   :  { %v2529_v37 = vadd.f32 %v2528_v10, %v5206_v30  ;;  %v2535_v7 = vadd.f32 %v2534_v2, %v2533_v52  ;;  %v5405_v47 = vmul.f32 0.125, %v2579_v40  ;;  %v2304_v6 = vadd.f32 %v4938_v58, %v2268_v49 }
 0x5dc   :  { %v2270_v3 = vmul.f32 %v4935_v1, %v2234_v23  ;;  %v2541_v57 = vadd.f32 %v2540_v17, %v2539_v24  ;;  %v5571_v54 = vsub.f32 %v4848_v45, %v5570_v13  ;;  %v2369_v53 = vmul.f32 0.70710677, %v2305_v5 }
 0x5dd   :  { %v3667_v25 = vpop.eup %3666  ;;  %v2271_v26 = vmul.f32 %v4935_v1, %v2235_v9  ;;  %v2547_v33 = vadd.f32 %v2546_v15, %v2545_v55  ;;  %v2553_v41 = vadd.f32 %v2552_v42, %v2551_v62  ;;  %v2558_v10 = vrot.slane %v2557_v19, 2 }
 0x5de   :  { %v2231_v48 = vmul.f32 %v3661_v11, %v5571_v54  ;;  %v5414_v30 = vadd.f32 %v4938_v58, %v2270_v3  ;;  %v2236_v52 = vmul.f32 %v3667_v25, %v2204_v20  ;;  %v2368_v24 = vmul.f32 0.70710677, %v2304_v6 }
 0x5df   :  { %v5420_v35 = vadd.f32 %v4938_v58, %v2271_v26  ;;  %v2530_v45 = vrot.slane %v2529_v37, 1  ;;  %v2536_v22 = vrot.slane %v2535_v7, 1  ;;  %v2542_v11 = vrot.slane %v2541_v57, 1 }
 0x5e0   :  { %v3669_v56 = vpop.eup %3668  ;;  %v2370_v2 = vmul.f32 0.70710677, %v5414_v30  ;;  %v2272_v55 = vmul.f32 %v4935_v1, %v2236_v52  ;;  %v2047_v40 = vmul.f32 0.03125, %v1983_v43  ;;  %3672 = verf.f32 %v2369_v53 }
 0x5e1   :  { %v3671_v17 = vpop.eup %3670  ;;  %v2371_v8 = vmul.f32 0.70710677, %v5420_v35  ;;  %v2237_v0 = vmul.f32 %v3669_v56, %v2205_v14  ;;  %v2548_v20 = vrot.slane %v2547_v33, 1  ;;  %v2554_v60 = vrot.slane %v2553_v41, 1 }
 0x5e2   :  { %v5426_v62 = vadd.f32 %v4938_v58, %v2272_v55  ;;  %v2423_v51 = vadd.f32 1.0, %v3671_v17  ;;  %v2559_v15 = vadd.f32 %v2558_v10, %v2557_v19  ;;  %3674 = verf.f32 %v2368_v24 }
 0x5e3   :  { %v2531_v28 = vadd.f32 %v2530_v45, %v2529_v37  ;;  %v2537_v49 = vadd.f32 %v2536_v22, %v2535_v7  ;;  %v2046_v23 = vmul.f32 0.03125, %v1981_v27  ;;  %v5428_v42 = vmul.f32 0.5, %v2305_v5 }
 0x5e4   :  { %3676 = verf.f32 %v2370_v2  ;;  %v2455_v9 = vmul.f32 %v2423_v51, %v2327_v21  ;;  %v2543_v3 = vadd.f32 %v2542_v11, %v2541_v57  ;;  %v5430_v25 = vmul.f32 0.5, %v2304_v6 }
 0x5e5   :  { %3678 = verf.f32 %v2371_v8  ;;  %v2372_v14 = vmul.f32 0.70710677, %v5426_v62  ;;  %v2549_v13 = vadd.f32 %v2548_v20, %v2547_v33  ;;  %v2273_v54 = vmul.f32 %v4935_v1, %v2237_v0 }
 0x5e6   :  { %v2555_v53 = vadd.f32 %v2554_v60, %v2553_v41  ;;  %v2560_v26 = vrot.slane %v2559_v15, 1  ;;  %v2562_v19 = vrot.slane %v2455_v9, 4  ;;  %v2674_v43 = vmul.f32 0.125, %v2531_v28 }
 0x5e7   :  { %v2111_v37 = vsub.f32 %v2047_v40, %v5397_v50  ;;  %v2110_v5 = vsub.f32 %v2046_v23, %v5389_v29  ;;  %v2267_v7 = vmul.f32 %v4935_v1, %v2231_v48  ;;  %v2675_v57 = vmul.f32 0.125, %v2537_v49  ;;  %v5572_v48 = vld [vmem:[#allocation13_spill] sm:$0xff] }
 0x5e8   :  { %v2563_v21 = vadd.f32 %v2562_v19, %v2455_v9  ;;  %v2676_v6 = vmul.f32 0.125, %v2543_v3  ;;  %v2301_v52 = vadd.f32 %v4938_v58, %v5354_v38  ;;  %3680 = verf.f32 %v2372_v14 }
 0x5e9   :  { %v2143_v33 = vadd.f32 1e-05, %v2111_v37  ;;  %v2142_v10 = vadd.f32 1e-05, %v2110_v5  ;;  %v5441_v41 = vadd.f32 %v4938_v58, %v5357_v4  ;;  %v2561_v24 = vadd.f32 %v2560_v26, %v2559_v15 }
 0x5ea   :  { %v2564_v45 = vrot.slane %v2563_v21, 2  ;;  %v2677_v50 = vmul.f32 0.125, %v2549_v13  ;;  %v2303_v29 = vadd.f32 %v4938_v58, %v2267_v7  ;;  %v2678_v22 = vmul.f32 0.125, %v2555_v53 }
 0x5eb   :  { %v2763_v56 = vsel %vm2749_vm1, %v2674_v43, %v5572_v48  ;;  %3682 = vrsqrt.f32 %v2143_v33  ;;  %v2365_v2 = vmul.f32 0.70710677, %v2301_v52  ;;  %v2366_v11 = vmul.f32 0.70710677, %v5441_v41 }
 0x5ec   :  { %v2565_v55 = vadd.f32 %v2564_v45, %v2563_v21  ;;  %v2764_v38 = vsel %vm2751_vm2, %v2675_v57, %v2763_v56  ;;  %3684 = vrsqrt.f32 %v2142_v10  ;;  %v2367_v40 = vmul.f32 0.70710677, %v2303_v29 }
 0x5ed   :  { %v2765_v4 = vsel %vm2753_vm3, %v2676_v6, %v2764_v38  ;;  %3686 = verf.f32 %v2365_v2  ;;  %v2426_v27 = vadd.f32 1.0, %v5342_v32  ;;  %v3673_v17 = vpop.eup %3672  ;;  %v2679_v0 = vmul.f32 0.125, %v2561_v24 }
 0x5ee   :  { %v2566_v8 = vrot.slane %v2565_v55, 1  ;;  %3688 = verf.f32 %v2366_v11  ;;  %v2427_v20 = vadd.f32 1.0, %v5351_v31  ;;  %v2332_v51 = vmul.f32 0.5, %v5287_v12 }
 0x5ef   :  { %3690 = verf.f32 %v2367_v40  ;;  %v2428_v60 = vadd.f32 1.0, %v5378_v39  ;;  %v2458_v15 = vmul.f32 %v2426_v27, %v5337_v18  ;;  %v3675_v28 = vpop.eup %3674  ;;  %v2766_v23 = vsel %vm2755_vm4, %v2677_v50, %v2765_v4 }
 0x5f0   :  { %v2567_v49 = vadd.f32 %v2566_v8, %v2565_v55  ;;  %v2459_v9 = vmul.f32 %v2427_v20, %v5340_v36  ;;  %v2568_v32 = vrot.slane %v5345_v34, 4  ;;  %v2767_v14 = vsel %vm2757_vm5, %v2678_v22, %v2766_v23 }
 0x5f1   :  { %v3677_v3 = vpop.eup %3676  ;;  %v2460_v13 = vmul.f32 %v2428_v60, %v2332_v51  ;;  %v2580_v31 = vrot.slane %v2458_v15, 4  ;;  %v2309_v12 = vadd.f32 %v4938_v58, %v2273_v54  ;;  %v2768_v39 = vsel %vm2759_vm6, %v2679_v0, %v2767_v14 }
 0x5f2   :  { %v3679_v53 = vpop.eup %3678  ;;  %v2680_v26 = vmul.f32 0.125, %v2567_v49  ;;  %v2569_v18 = vadd.f32 %v2568_v32, %v5345_v34  ;;  %v2586_v19 = vrot.slane %v2459_v9, 4  ;;  %v2432_v43 = vadd.f32 1.0, %v3675_v28 }
 0x5f3   :  { %v2581_v37 = vadd.f32 %v2580_v31, %v2458_v15  ;;  %v2592_v5 = vrot.slane %v2460_v13, 4  ;;  %v2373_v36 = vmul.f32 0.70710677, %v2309_v12  ;;  %v2433_v7 = vadd.f32 1.0, %v3673_v17 }
 0x5f4   :  { %v2769_v21 = vsel %vm2761_vm7, %v2680_v26, %v2768_v39  ;;  %v2570_v57 = vrot.slane %v2569_v18, 2  ;;  %v2587_v6 = vadd.f32 %v2586_v19, %v2459_v9  ;;  %v2338_v33 = vmul.f32 0.5, %v5414_v30 }
 0x5f5   :  { %3391 = vmatmul.mubr.f32.vlgmr.msra.gmra.mxu0 %v2769_v21  ;;  %v2582_v54 = vrot.slane %v2581_v37, 2  ;;  %v2593_v10 = vadd.f32 %v2592_v5, %v2460_v13  ;;  %3692 = verf.f32 %v2373_v36  ;;  %v3681_v24 = vpop.eup %3680  ;;  %v2339_v45 = vmul.f32 0.5, %v5420_v35 }
 0x5f6   :  { %v2333_v34 = vmul.f32 0.5, %v2301_v52  ;;  %v2571_v50 = vadd.f32 %v2570_v57, %v2569_v18  ;;  %v2588_v22 = vrot.slane %v2587_v6, 2  ;;  %v2464_v48 = vmul.f32 %v2432_v43, %v5430_v25 }
 0x5f7   :  { %v2594_v56 = vrot.slane %v2593_v10, 2  ;;  %v2434_v2 = vadd.f32 1.0, %v3677_v3  ;;  %v2435_v55 = vadd.f32 1.0, %v3679_v53  ;;  %v2465_v11 = vmul.f32 %v2433_v7, %v5428_v42 }
 0x5f8   :  { %v3683_v38 = vpop.eup %3682  ;;  %v2334_v30 = vmul.f32 0.5, %v5441_v41  ;;  %v2335_v4 = vmul.f32 0.5, %v2303_v29  ;;  %v2583_v40 = vadd.f32 %v2582_v54, %v2581_v37  ;;  %v2589_v52 = vadd.f32 %v2588_v22, %v2587_v6 }
 0x5f9   :  { %v3685_v27 = vpop.eup %3684  ;;  %v2239_v35 = vmul.f32 %v3683_v38, %v2207_v59  ;;  %v2340_v17 = vmul.f32 0.5, %v5426_v62  ;;  %v2436_v8 = vadd.f32 1.0, %v3681_v24  ;;  %v2572_v20 = vrot.slane %v2571_v50, 1 }
 0x5fa   :  { %v3687_v25 = vpop.eup %3686  ;;  %v2238_v0 = vmul.f32 %v3685_v27, %v2206_v46  ;;  %v2595_v42 = vadd.f32 %v2594_v56, %v2593_v10  ;;  %v2341_v51 = vmul.f32 0.5, %v2309_v12  ;;  %v2466_v60 = vmul.f32 %v2434_v2, %v2338_v33 }
 0x5fb   :  { %v3689_v41 = vpop.eup %3688  ;;  %v2429_v29 = vadd.f32 1.0, %v3687_v25  ;;  %v2467_v15 = vmul.f32 %v2435_v55, %v2339_v45  ;;  %v2616_v28 = vrot.slane %v2464_v48, 4  ;;  %v2584_v59 = vrot.slane %v2583_v40, 1 }
 0x5fc   :  { %v3691_v49 = vpop.eup %3690  ;;  %v2274_v16 = vmul.f32 %v4935_v1, %v2238_v0  ;;  %v2430_v61 = vadd.f32 1.0, %v3689_v41  ;;  %v2275_v62 = vmul.f32 %v4935_v1, %v2239_v35  ;;  %v2590_v32 = vrot.slane %v2589_v52, 1 }
 0x5fd   :  { %v2431_v23 = vadd.f32 1.0, %v3691_v49  ;;  %v2461_v9 = vmul.f32 %v2429_v29, %v2333_v34  ;;  %v2468_v44 = vmul.f32 %v2436_v8, %v2340_v17  ;;  %v2573_v46 = vadd.f32 %v2572_v20, %v2571_v50 }
 0x5fe   :  { %v2462_v63 = vmul.f32 %v2430_v61, %v2334_v30  ;;  %v2596_v3 = vrot.slane %v2595_v42, 1  ;;  %v5477_v14 = vadd.f32 %v4938_v58, %v2274_v16  ;;  %v2622_v12 = vrot.slane %v2465_v11, 4 }
 0x5ff   :  { %v2463_v13 = vmul.f32 %v2431_v23, %v2335_v4  ;;  %v2598_v31 = vrot.slane %v2461_v9, 4  ;;  %v2628_v53 = vrot.slane %v2466_v60, 4  ;;  %v2585_v26 = vadd.f32 %v2584_v59, %v2583_v40 }
 0x600   :  { %v2604_v39 = vrot.slane %v2462_v63, 4  ;;  %v5480_v18 = vadd.f32 %v4938_v58, %v2275_v62  ;;  %v2617_v1 = vadd.f32 %v2616_v28, %v2464_v48  ;;  %v2591_v19 = vadd.f32 %v2590_v32, %v2589_v52 }
 0x601   :  { %v2599_v43 = vadd.f32 %v2598_v31, %v2461_v9  ;;  %v2610_v37 = vrot.slane %v2463_v13, 4  ;;  %v2374_v5 = vmul.f32 0.70710677, %v5477_v14  ;;  %v2597_v7 = vadd.f32 %v2596_v3, %v2595_v42 }
 0x602   :  { %v3693_v36 = vpop.eup %3692  ;;  %v2605_v21 = vadd.f32 %v2604_v39, %v2462_v63  ;;  %v2681_v57 = vmul.f32 0.125, %v2573_v46  ;;  %v2375_v6 = vmul.f32 0.70710677, %v5480_v18  ;;  %v2683_v45 = vmul.f32 0.125, %v2585_v26 }
 0x603   :  { %v2600_v33 = vrot.slane %v2599_v43, 2  ;;  %v2611_v54 = vadd.f32 %v2610_v37, %v2463_v13  ;;  %3694 = verf.f32 %v2374_v5  ;;  %v2437_v10 = vadd.f32 1.0, %v3693_v36 }
 0x604   :  { %v2606_v24 = vrot.slane %v2605_v21, 2  ;;  %3696 = verf.f32 %v2375_v6  ;;  %v2623_v58 = vadd.f32 %v2622_v12, %v2465_v11  ;;  %v2770_v22 = vsel %vm2749_vm1, %v5405_v47, %v2681_v57 }
 0x605   :  { %v2601_v34 = vadd.f32 %v2600_v33, %v2599_v43  ;;  %v2612_v50 = vrot.slane %v2611_v54, 2  ;;  %v2629_v48 = vadd.f32 %v2628_v53, %v2466_v60  ;;  %v2684_v2 = vmul.f32 0.125, %v2591_v19 }
 0x606   :  { %v2607_v56 = vadd.f32 %v2606_v24, %v2605_v21  ;;  %v2469_v55 = vmul.f32 %v2437_v10, %v2341_v51  ;;  %v2634_v38 = vrot.slane %v2467_v15, 4  ;;  %v2685_v40 = vmul.f32 0.125, %v2597_v7 }
 0x607   :  { %v2602_v30 = vrot.slane %v2601_v34, 1  ;;  %v2613_v4 = vadd.f32 %v2612_v50, %v2611_v54  ;;  %v2640_v27 = vrot.slane %v2468_v44, 4  ;;  %v2771_v52 = vsel %vm2751_vm2, %v2683_v45, %v2770_v22 }
 0x608   :  { %v2608_v35 = vrot.slane %v2607_v56, 1  ;;  %v2618_v17 = vrot.slane %v2617_v1, 2  ;;  %v2635_v8 = vadd.f32 %v2634_v38, %v2467_v15  ;;  %v2630_v0 = vrot.slane %v2629_v48, 2 }
 0x609   :  { %v2603_v11 = vadd.f32 %v2602_v30, %v2601_v34  ;;  %v2614_v25 = vrot.slane %v2613_v4, 1  ;;  %v2641_v20 = vadd.f32 %v2640_v27, %v2468_v44  ;;  %v2772_v47 = vsel %vm2753_vm3, %v2684_v2, %v2771_v52 }
 0x60a   :  { %v2609_v42 = vadd.f32 %v2608_v35, %v2607_v56  ;;  %v2624_v41 = vrot.slane %v2623_v58, 2  ;;  %v2646_v29 = vrot.slane %v2469_v55, 4  ;;  %v2773_v28 = vsel %vm2755_vm4, %v2685_v40, %v2772_v47 }
 0x60b   :  { %v2615_v51 = vadd.f32 %v2614_v25, %v2613_v4  ;;  %v2686_v60 = vmul.f32 0.125, %v2603_v11  ;;  %v2619_v16 = vadd.f32 %v2618_v17, %v2617_v1  ;;  %v2636_v61 = vrot.slane %v2635_v8, 2 }
 0x60c   :  { %v2687_v49 = vmul.f32 0.125, %v2609_v42  ;;  %v2647_v59 = vadd.f32 %v2646_v29, %v2469_v55  ;;  %v2631_v23 = vadd.f32 %v2630_v0, %v2629_v48  ;;  %v2642_v9 = vrot.slane %v2641_v20, 2 }
 0x60d   :  { %v2688_v62 = vmul.f32 0.125, %v2615_v51  ;;  %v2774_v15 = vsel %vm2757_vm5, %v2686_v60, %v2773_v28  ;;  %v2625_v44 = vadd.f32 %v2624_v41, %v2623_v58  ;;  %v2620_v13 = vrot.slane %v2619_v16, 1  ;;  %v5573_v60 = vld [vmem:[#allocation11_spill] sm:$0xff] }
 0x60e   :  { %v2775_v32 = vsel %vm2759_vm6, %v2687_v49, %v2774_v15  ;;  %v2648_v63 = vrot.slane %v2647_v59, 2  ;;  %v2637_v31 = vadd.f32 %v2636_v61, %v2635_v8  ;;  %v2342_v53 = vmul.f32 0.5, %v5477_v14  ;;  %v5505_v49 = vld [vmem:[%s5549_s2] sm:$0xff] }
 0x60f   :  { %v2776_v46 = vsel %vm2761_vm7, %v2688_v62, %v2775_v32  ;;  %v2632_v39 = vrot.slane %v2631_v23, 1  ;;  %v2643_v1 = vadd.f32 %v2642_v9, %v2641_v20  ;;  %v2343_v19 = vmul.f32 0.5, %v5480_v18  ;;  %v2960_v32 = vld [vmem:[#allocation5 + $0x78] sm:$0xff] }
 0x610   :  { %v3695_v3 = vpop.eup %3694  ;;  %3393 = vmatprep.mubr.f32.mxu0 %v2776_v46  ;;  %v2626_v37 = vrot.slane %v2625_v44, 1  ;;  %v2649_v5 = vadd.f32 %v2648_v63, %v2647_v59  ;;  %v2621_v21 = vadd.f32 %v2620_v13, %v2619_v16  ;;  %v2638_v57 = vrot.slane %v2637_v31, 1  ;;  %3396 = vmatprep.subr.mxu0 %v2960_v32  ;;  %v2958_v63 = vld [vmem:[#allocation5 + $0x68] sm:$0xff]  ;;  %v2957_v46 = vld [vmem:[#allocation5 + $0x60] sm:$0xff]  ;;  %v2955_v13 = vld [vmem:[#allocation5 + $0x50] sm:$0xff] }
 0x611   :  { %v3697_v12 = vpop.eup %3696  ;;  %v2438_v26 = vadd.f32 1.0, %v3695_v3  ;;  %v2633_v6 = vadd.f32 %v2632_v39, %v2631_v23  ;;  %v2644_v33 = vrot.slane %v2643_v1, 1  ;;  %v2715_v28 = vsub.s32 6, %v5573_v60  ;;  %3397 = vmatpush3.msra.mxu0 %v2960_v32  ;;  %v2956_v3 = vld [vmem:[#allocation5 + $0x58] sm:$0xff]  ;;  %v2950_v39 = vld [vmem:[#allocation5 + $0x28] sm:$0xff] }
 0x612   :  { %v2439_v43 = vadd.f32 1.0, %v3697_v12  ;;  %v2627_v10 = vadd.f32 %v2626_v37, %v2625_v44  ;;  %v2650_v24 = vrot.slane %v2649_v5, 1  ;;  %v2639_v14 = vadd.f32 %v2638_v57, %v2637_v31  ;;  %v2959_v44 = vld [vmem:[#allocation5 + $0x70] sm:$0xff]  ;;  %v2954_v31 = vld [vmem:[#allocation5 + $0x48] sm:$0xff]  ;;  %v2953_v12 = vld [vmem:[#allocation5 + $0x40] sm:$0xff] }
 0x613   :  { %v2470_v36 = vmul.f32 %v2438_v26, %v2342_v53  ;;  %v2689_v50 = vmul.f32 0.125, %v2621_v21  ;;  %v2645_v22 = vadd.f32 %v2644_v33, %v2643_v1  ;;  %v2691_v18 = vmul.f32 0.125, %v2633_v6  ;;  %3398 = vmatprep.subr.mxu0 %v2959_v44  ;;  %v2952_v53 = vld [vmem:[#allocation5 + $0x38] sm:$0xff]  ;;  %v2951_v26 = vld [vmem:[#allocation5 + $0x30] sm:$0xff]  ;;  %v2949_v1 = vld [vmem:[#allocation5 + $0x20] sm:$0xff] }
 0x614   :  { %v2471_v7 = vmul.f32 %v2439_v43, %v2343_v19  ;;  %v2651_v56 = vadd.f32 %v2650_v24, %v2649_v5  ;;  %v2690_v55 = vmul.f32 0.125, %v2627_v10  ;;  %v2692_v4 = vmul.f32 0.125, %v2639_v14  ;;  %3399 = vmatpush3.msra.mxu0 %v2959_v44  ;;  %v2948_v19 = vld [vmem:[#allocation5 + $0x18] sm:$0xff]  ;;  %v2947_v43 = vld [vmem:[#allocation5 + $0x10] sm:$0xff]  ;;  %v2946_v37 = vld [vmem:[#allocation5 + $0x8] sm:$0xff] }
 0x615   :  { %v2652_v54 = vrot.slane %v2470_v36, 4  ;;  %v2693_v35 = vmul.f32 0.125, %v2645_v22  ;;  %v2716_v16 = vrot.slane %v5505_v49, %v2715_v28  ;;  %3400 = vmatprep.subr.mxu0 %v2958_v63 }
 0x616   :  { %v2658_v45 = vrot.slane %v2471_v7, 4  ;;  %v2777_v40 = vsel %vm2749_vm1, %v2690_v55, %v2689_v50  ;;  %v2694_v8 = vmul.f32 0.125, %v2651_v56  ;;  %3401 = vmatpush3.msra.mxu0 %v2958_v63 }
 0x617   :  { %v2653_v58 = vadd.f32 %v2652_v54, %v2470_v36  ;;  %v2778_v52 = vsel %vm2751_vm2, %v2691_v18, %v2777_v40  ;;  %3402 = vmatprep.subr.mxu0 %v2957_v46 }
 0x618   :  { %v2659_v34 = vadd.f32 %v2658_v45, %v2471_v7  ;;  %v2779_v0 = vsel %vm2753_vm3, %v2692_v4, %v2778_v52  ;;  %3403 = vmatpush3.msra.mxu0 %v2957_v46  ;;  %v2945_v7 = vld [vmem:[#allocation5] sm:$0xff]  ;;  %v152_v4 = vld [vmem:[%s5549_s2 + $0x8] sm:$0xff]  ;;  %s3845_s2 = smov [#allocation7]  }
 0x619   :  { %v2654_v48 = vrot.slane %v2653_v58, 2  ;;  %v2780_v42 = vsel %vm2755_vm4, %v2693_v35, %v2779_v0  ;;  %3404 = vmatprep.subr.mxu0 %v2956_v3  ;;  %s3059_s29 = sshll.u32 %s3845_s2, 4  ;;  %s3060_s29 = int_to_ptr.vmem [resolvable:$true] %s3059_s29 }
 0x61a   :  { %v2660_v2 = vrot.slane %v2659_v34, 2  ;;  %v2781_v41 = vsel %vm2757_vm5, %v2694_v8, %v2780_v42  ;;  %3405 = vmatpush3.msra.mxu0 %v2956_v3  ;;  %v5574_v8 = vsub.s32 0, %v5573_v60  ;;  %s3812_s30 = scalar_lea.vmem %s3060_s29, 512  ;;  %p3817_p11 = scmp.lt.s32.totalorder %s3060_s29, %s3060_s29 }
 0x61b   :  { %v2655_v38 = vadd.f32 %v2654_v48, %v2653_v58  ;;  %3406 = vmatprep.subr.mxu0 %v2955_v13  ;;  %p3813_p10 = scmp.ne.s32.totalorder %s3060_s29, %s3812_s30  ;;  %p3818_p12 = scmp.lt.s32.totalorder %s3812_s30, %s3812_s30 }
 0x61c   :  { %v2661_v30 = vadd.f32 %v2660_v2, %v2659_v34  ;;  %3407 = vmatpush3.msra.mxu0 %v2955_v13 }
 0x61d   :  { %v2656_v27 = vrot.slane %v2655_v38, 1  ;;  %3408 = vmatprep.subr.mxu0 %v2954_v31  ;;  %p3819_p13 = por %p3818_p12, %p3817_p11 }
 0x61e   :  { %v2662_v17 = vrot.slane %v2661_v30, 1  ;;  %3409 = vmatpush3.msra.mxu0 %v2954_v31 }
 0x61f   :  { %v2657_v11 = vadd.f32 %v2656_v27, %v2655_v38  ;;  %3410 = vmatprep.subr.mxu0 %v2953_v12  ;;  %v2927_v38 = vsub.s32 7, %v5573_v60  ;;  %p3820_p0 = pnand %p3819_p13, %p3813_p10 }
 0x620   :  { %v2663_v25 = vadd.f32 %v2662_v17, %v2661_v30  ;;  %3411 = vmatpush3.msra.mxu0 %v2953_v12 }
 0x621   :  { %v2695_v20 = vmul.f32 0.125, %v2657_v11  ;;  %3412 = vmatprep.subr.mxu0 %v2952_v53  ;;  %v2928_v40 = vrot.slane %v5505_v49, %v2927_v38  ;;  %v2936_v11 = vrot.slane %v152_v4, %v5574_v8 }
 0x622   :  { %v2696_v47 = vmul.f32 0.125, %v2663_v25  ;;  %3413 = vmatpush3.msra.mxu0 %v2952_v53 }
 0x623   :  { %v2782_v29 = vsel %vm2759_vm6, %v2695_v20, %v2781_v41  ;;  %3414 = vmatprep.subr.mxu0 %v2951_v26 }
 0x624   :  { %v2783_v51 = vsel %vm2761_vm7, %v2696_v47, %v2782_v29  ;;  %3415 = vmatpush3.msra.mxu0 %v2951_v26 }
 0x625   :  { %3394 = vmatmul.mubr.f32.gmra.mxu0 %v2783_v51  ;;  %3416 = vmatprep.subr.mxu0 %v2950_v39 }
 0x626   :  { %3417 = vmatpush3.msra.mxu0 %v2950_v39 }
 0x627   :  { %3418 = vmatprep.subr.mxu0 %v2949_v1 }
 0x628   :  { %3419 = vmatpush3.msra.mxu0 %v2949_v1 }
 0x629   :  { %3420 = vmatprep.subr.mxu0 %v2948_v19 }
 0x62a   :  { %3421 = vmatpush3.msra.mxu0 %v2948_v19 }
 0x62b   :  { %3422 = vmatprep.subr.mxu0 %v2947_v43 }
 0x62c   :  { %3423 = vmatpush3.msra.mxu0 %v2947_v43 }
 0x62d   :  { %3424 = vmatprep.subr.mxu0 %v2946_v37 }
 0x62e   :  { %3425 = vmatpush3.msra.mxu0 %v2946_v37 }
 0x62f   :  { %3426 = vmatprep.subr.mxu0 %v2945_v7 }
 0x630   :  { %3427 = vmatpush3.msra.mxu0 %v2945_v7  ;;  %v5575_v7 = vsub.s32 1, %v5573_v60 }
 0x6b5   :  { %v3392_v61 = vpop.f32.mrf.mxu0 }
 0x6b6   :  { %v5508_v59 = vadd.f32 %v3392_v61, %v2716_v16 }
 0x6b7   :  { %v2854_v62 = vpop.f32.mrf.mxu0 }
 0x6b8   :  { %v5510_v15 = vadd.f32 %v2854_v62, %v2716_v16  ;;  %2875 = vadd.xlane.f32.xlu1 %v5508_v59  ;;  %v2882_v23 = vmul.f32 %v5508_v59, %v5508_v59 }
 0x6ba   :  { %2873 = vadd.xlane.f32.xlu0 %v5510_v15  ;;  %v2881_v9 = vmul.f32 %v5510_v15, %v5510_v15 }
 0x6bc   :  { %2887 = vadd.xlane.f32.xlu1 %v2882_v23 }
 0x6be   :  { %2885 = vadd.xlane.f32.xlu0 %v2881_v9 }
 0x6e5   :  { %v3395_v5 = vpop.f32.mrf.mxu0 }
 0x6e6   :  { %v5518_v36 = vadd.f32 %v3395_v5, %v2716_v16 }
 0x6e7   :  { %v2864_v21 = vpop.f32.mrf.mxu0 }
 0x6e8   :  { %v5520_v57 = vadd.f32 %v2864_v21, %v2716_v16  ;;  %2879 = vadd.xlane.f32.xlu1 %v5518_v36  ;;  %v2884_v6 = vmul.f32 %v5518_v36, %v5518_v36  ;;  %v2964_v21 = vrot.slane %v152_v4, %v5575_v7 }
 0x6ea   :  { %2877 = vadd.xlane.f32.xlu0 %v5520_v57  ;;  %v2883_v33 = vmul.f32 %v5520_v57, %v5520_v57 }
 0x6ec   :  { %2891 = vadd.xlane.f32.xlu1 %v2884_v6 }
 0x6ee   :  { %2889 = vadd.xlane.f32.xlu0 %v2883_v33 }
 0x741   :  { %v2876_v54 = vpop.xlane.xlu1 %2875 }
 0x742   :  { %v2894_v10 = vmul.f32 0.03125, %v2876_v54 }
 0x743   :  { %v2874_v24 = vpop.xlane.xlu0 %2873 }
 0x744   :  { %v2893_v45 = vmul.f32 0.03125, %v2874_v24  ;;  %v2902_v14 = vmul.f32 %v2894_v10, %v2894_v10  ;;  %v2918_v30 = vsub.f32 %v5508_v59, %v2894_v10 }
 0x745   :  { %v2888_v58 = vpop.xlane.xlu1 %2887 }
 0x746   :  { %v2898_v34 = vmul.f32 0.03125, %v2888_v58  ;;  %v2901_v22 = vmul.f32 %v2893_v45, %v2893_v45  ;;  %v2917_v35 = vsub.f32 %v5510_v15, %v2893_v45 }
 0x747   :  { %v2886_v50 = vpop.xlane.xlu0 %2885 }
 0x748   :  { %v2906_v48 = vsub.f32 %v2898_v34, %v2902_v14  ;;  %v2897_v18 = vmul.f32 0.03125, %v2886_v50 }
 0x74a   :  { %v2910_v56 = vadd.f32 1e-05, %v2906_v48  ;;  %v2905_v2 = vsub.f32 %v2897_v18, %v2901_v22 }
 0x74c   :  { %3698 = vrsqrt.f32 %v2910_v56  ;;  %v2909_v55 = vadd.f32 1e-05, %v2905_v2 }
 0x74e   :  { %3700 = vrsqrt.f32 %v2909_v55 }
 0x759   :  { %v3699_v27 = vpop.eup %3698 }
 0x75a   :  { %v2922_v52 = vmul.f32 %v3699_v27, %v2918_v30 }
 0x75b   :  { %v3701_v17 = vpop.eup %3700 }
 0x75c   :  { %v2921_v25 = vmul.f32 %v3701_v17, %v2917_v35  ;;  %v2930_v0 = vmul.f32 %v2928_v40, %v2922_v52 }
 0x75e   :  { %v2929_v20 = vmul.f32 %v2928_v40, %v2921_v25  ;;  %v2938_v42 = vadd.f32 %v2936_v11, %v2930_v0 }
 0x760   :  { %v2937_v47 = vadd.f32 %v2936_v11, %v2929_v20  ;;  %v2942_v29 = vmax.f32 %v2938_v42, 0.0 }
 0x762   :  { %v2941_v41 = vmax.f32 %v2937_v47, 0.0 }
 0x764   :  { %3428 = vmatprep.mubr.f32.mxu0 %v2941_v41 }
 0x765   :  { %3429 = vmatmul.mubr.f32.vlgmr.msra.gmra.mxu0 %v2942_v29 }
 0x771   :  { %v2880_v51 = vpop.xlane.xlu1 %2879 }
 0x772   :  { %v2896_v28 = vmul.f32 0.03125, %v2880_v51 }
 0x773   :  { %v2878_v49 = vpop.xlane.xlu0 %2877 }
 0x774   :  { %v2895_v16 = vmul.f32 0.03125, %v2878_v49  ;;  %v2904_v59 = vmul.f32 %v2896_v28, %v2896_v28  ;;  %v2920_v3 = vsub.f32 %v5518_v36, %v2896_v28 }
 0x775   :  { %v2892_v61 = vpop.xlane.xlu1 %2891 }
 0x776   :  { %v2900_v62 = vmul.f32 0.03125, %v2892_v61  ;;  %v2903_v23 = vmul.f32 %v2895_v16, %v2895_v16  ;;  %v2919_v31 = vsub.f32 %v5520_v57, %v2895_v16 }
 0x777   :  { %v2890_v15 = vpop.xlane.xlu0 %2889 }
 0x778   :  { %v2908_v9 = vsub.f32 %v2900_v62, %v2904_v59  ;;  %v2899_v32 = vmul.f32 0.03125, %v2890_v15 }
 0x77a   :  { %v2912_v44 = vadd.f32 1e-05, %v2908_v9  ;;  %v2907_v63 = vsub.f32 %v2899_v32, %v2903_v23 }
 0x77c   :  { %3702 = vrsqrt.f32 %v2912_v44  ;;  %v2911_v46 = vadd.f32 1e-05, %v2907_v63 }
 0x77e   :  { %3704 = vrsqrt.f32 %v2911_v46 }
 0x789   :  { %v3703_v13 = vpop.eup %3702 }
 0x78a   :  { %v2924_v12 = vmul.f32 %v3703_v13, %v2920_v3 }
 0x78b   :  { %v3705_v53 = vpop.eup %3704 }
 0x78c   :  { %v2923_v26 = vmul.f32 %v3705_v53, %v2919_v31  ;;  %v2932_v39 = vmul.f32 %v2928_v40, %v2924_v12 }
 0x78e   :  { %v2931_v1 = vmul.f32 %v2928_v40, %v2923_v26  ;;  %v2940_v19 = vadd.f32 %v2936_v11, %v2932_v39 }
 0x790   :  { %v2939_v43 = vadd.f32 %v2936_v11, %v2931_v1  ;;  %v2944_v5 = vmax.f32 %v2940_v19, 0.0 }
 0x792   :  { %v2943_v37 = vmax.f32 %v2939_v43, 0.0 }
 0x794   :  { %3431 = vmatprep.mubr.f32.mxu0 %v2943_v37 }
 0x795   :  { %3432 = vmatmul.mubr.f32.gmra.mxu0 %v2944_v5 }
 0x825   :  { %v3430_v6 = vpop.f32.mrf.mxu0 }
 0x826   :  { %v3037_v33 = vadd.f32 %v3430_v6, %v2964_v21 }
 0x827   :  { %v3031_v36 = vpop.f32.mrf.mxu0 }
 0x828   :  { %3051 = vst [vmem:[#allocation7 + $0x8] sm:$0xff] %v3037_v33  ;;  %v3032_v54 = vadd.f32 %v3031_v36, %v2964_v21 }
 0x82a   :  { %3050 = vst [vmem:[#allocation7] sm:$0xff] %v3032_v54 }
 0x855   :  { %v3433_v57 = vpop.f32.mrf.mxu0 }
 0x856   :  { %v3047_v10 = vadd.f32 %v3433_v57, %v2964_v21 }
 0x857   :  { %v3041_v24 = vpop.f32.mrf.mxu0 }
 0x858   :  { %3053 = vst [vmem:[#allocation7 + $0x18] sm:$0xff] %v3047_v10  ;;  %v3042_v45 = vadd.f32 %v3041_v24, %v2964_v21 }
 0x85a   :  { %3052 = vst [vmem:[#allocation7 + $0x10] sm:$0xff] %v3042_v45 }
 0x85b   :  { %3823 = shalt.err (!%p3820_p0)
}
 0x85c   :  { %3065 = dma.vmem_to_hbm [thread:$0]  %s3060_s29, 512, %s5554_s7, [#allocation4], %s3842_s11, %s3842_s11, %s3843_s12  }
 0x85d   :  { %3836 = dma.done.wait [#allocation4], 512  }
 0x85e   :  { %3837 = vsyncadd [#allocation4], 4294966784 }
 0x85f   :  { %3069 = vsyncpa [#allocation3], 1 }
 0x860   :  { %3070 = vsyncpa [#allocation6], 1 }
 0x861   :  { %3071 = vsyncpa [#allocation4], 1 }

</bundles_post_ra>
